<compile_context>
chip_gen: v7x
topology: tpu7x:2x2x1
jax: 0.10.0
libtpu: 0.0.40
codegen_flags: <defaults>
</compile_context>

<pallas_src>
import jax
import jax.numpy as jnp
import numpy as np
from jax.experimental import pallas as pl
from jax.experimental.pallas import tpu as pltpu

EPS = 1e-5


def _shift_flat(x, off):
    """y[..., p] = x[..., p + off], zero-filled where p + off falls outside [0, HW)."""
    if off == 0:
        return x
    hw = x.shape[-1]
    zeros = jnp.zeros(x.shape[:-1] + (abs(off),), x.dtype)
    if off > 0:
        return jnp.concatenate([x[..., off:], zeros], axis=-1)
    return jnp.concatenate([zeros, x[..., :hw + off]], axis=-1)


def _make_kernel(N, C, H, W):
    HW = H * W
    inv_cnt = 1.0 / float(N * HW)

    def kernel(x_ref, w1_ref, b1_ref, g_ref, beta_ref, w2_ref, b2_ref, out_ref):
        x = x_ref[...]              # (N, C, HW) f32, lane-dense
        w1 = w1_ref[...]            # (C_out, 9*C_in); column index = (kh*3+kw)*C_in + ci
        w2 = w2_ref[...]

        # Width-edge masks, shared by both convs.  Height edges are handled by
        # the zero end-fill of the flat shift (each image owns its own row).
        col = jax.lax.broadcasted_iota(jnp.int32, (1, 1, HW), 2)
        ww = col % W
        mask_wp = ww < (W - 1)      # tap reads from w+1: invalid at w == W-1
        mask_wm = ww > 0            # tap reads from w-1: invalid at w == 0

        def conv3x3(src, wmat):
            cin = src.shape[1]
            cout = wmat.shape[0]
            acc = jnp.zeros((N, cout, HW), jnp.float32)
            for kh in range(3):
                for kw in range(3):
                    dh, dw = kh - 1, kw - 1
                    sh = _shift_flat(src, dh * W + dw)
                    if dw == 1:
                        sh = jnp.where(mask_wp, sh, 0.0)
                    elif dw == -1:
                        sh = jnp.where(mask_wm, sh, 0.0)
                    t = kh * 3 + kw
                    for ci in range(cin):
                        wcol = wmat[:, t * cin + ci:t * cin + ci + 1]   # (C_out, 1)
                        acc = acc + wcol[None, :, :] * sh[:, ci:ci + 1, :]
            return acc

        # ---- BatchNorm batch statistics: single pass (sum + sum of squares) ----
        s = jnp.sum(jnp.sum(x, axis=2, keepdims=True), axis=0, keepdims=True)       # (1,C,1)
        ss = jnp.sum(jnp.sum(x * x, axis=2, keepdims=True), axis=0, keepdims=True)  # (1,C,1)
        mean = s * inv_cnt
        var = ss * inv_cnt - mean * mean
        scale = g_ref[...] * jax.lax.rsqrt(var + EPS)           # gamma / sqrt(var + eps)
        shift = b1_ref[...] + beta_ref[...] - scale * mean      # conv1 bias + BN shift folded

        # ---- x4 = relu(conv1(x) + b1 + BN(x)) ----
        x4 = jnp.maximum(conv3x3(x, w1) + scale * x + shift, 0.0)

        # ---- x6 = conv2(x4) + b2 + x ----
        out_ref[...] = conv3x3(x4, w2) + b2_ref[...] + x

    return kernel


def _prep_conv_weight(w):
    """(C_out, C_in, 3, 3) PyTorch layout -> (C_out, 9*C_in), column = (kh*3+kw)*C_in + ci."""
    cout, cin = w.shape[0], w.shape[1]
    return jnp.transpose(w, (0, 2, 3, 1)).reshape(cout, 9 * cin)


def model_forward(x_nchw, raw_params):
    w1, b1, gamma, beta, w2, b2 = raw_params
    N, C, H, W = x_nchw.shape
    HW = H * W
    # NCHW -> (N, C, H*W) is a pure row-major reshape (no transpose, no pad).
    x_flat = x_nchw.reshape(N, C, HW).astype(jnp.float32)

    kernel = _make_kernel(N, C, H, W)
    vmem = pl.BlockSpec(memory_space=pltpu.MemorySpace.VMEM)
    out = pl.pallas_call(
        kernel,
        out_shape=jax.ShapeDtypeStruct((N, C, HW), jnp.float32),
        in_specs=[vmem] * 7,
        out_specs=vmem,
    )(x_flat,
      _prep_conv_weight(w1), b1.reshape(1, -1, 1),
      gamma.reshape(1, -1, 1), beta.reshape(1, -1, 1),
      _prep_conv_weight(w2), b2.reshape(1, -1, 1))
    return out.reshape(N, C, H, W)


def reference_forward(x_nchw, raw_params):
    """Pure-JAX reference (lax conv) for correctness checking."""
    w1, b1, gamma, beta, w2, b2 = raw_params
    x = jnp.transpose(x_nchw, (0, 2, 3, 1)).astype(jnp.float32)

    def conv(inp, w, b):
        return jax.lax.conv_general_dilated(
            inp, jnp.transpose(w, (2, 3, 1, 0)), (1, 1), 'SAME',
            dimension_numbers=('NHWC', 'HWIO', 'NHWC')) + b

    x1 = conv(x, w1, b1)
    mean = jnp.mean(x, axis=(0, 1, 2), keepdims=True)
    var = jnp.mean((x - mean) ** 2, axis=(0, 1, 2), keepdims=True)
    x2 = gamma * (x - mean) * jax.lax.rsqrt(var + EPS) + beta
    x4 = jnp.maximum(x1 + x2, 0.0)
    x5 = conv(x4, w2, b2)
    return jnp.transpose(x5 + x, (0, 3, 1, 2))


def init_params(key, c_in, c_mid, c_out, ksize=3):
    k1, k2, k3, k4 = jax.random.split(key, 4)
    bound1 = 1.0 / np.sqrt(c_in * ksize * ksize)
    bound2 = 1.0 / np.sqrt(c_mid * ksize * ksize)
    w1 = jax.random.uniform(k1, (c_mid, c_in, ksize, ksize), jnp.float32,
                            -bound1, bound1)
    b1 = jax.random.uniform(k2, (c_mid,), jnp.float32, -bound1, bound1)
    w2 = jax.random.uniform(k3, (c_out, c_mid, ksize, ksize), jnp.float32,
                            -bound2, bound2)
    b2 = jax.random.uniform(k4, (c_out,), jnp.float32, -bound2, bound2)
    gamma = jnp.ones((c_in,), jnp.float32)   # PyTorch BN defaults
    beta = jnp.zeros((c_in,), jnp.float32)
    return (w1, b1, gamma, beta, w2, b2)


if __name__ == "__main__":
    N, C, H, W = 2, 4, 16, 16  # small shapes; channels unified (see TODO above)
    key = jax.random.PRNGKey(0)
    kx, kp = jax.random.split(key)
    x = jax.random.normal(kx, (N, C, H, W), jnp.float32)
    params = init_params(kp, C, C, C)

    out = jax.block_until_ready(model_forward(x, params))
    ref = jax.block_until_ready(reference_forward(x, params))

    np.testing.assert_allclose(np.asarray(out), np.asarray(ref),
                               rtol=1e-2, atol=1e-2)
    print("KERNEL_OK")
</pallas_src>

<mosaic_0001>
module attributes {stable_mosaic.version = 11 : i64} {
  func.func @kernel(%arg0: memref<2x4x256xf32, #tpu.memory_space<vmem>>, %arg1: memref<4x36xf32, #tpu.memory_space<vmem>>, %arg2: memref<1x4x1xf32, #tpu.memory_space<vmem>>, %arg3: memref<1x4x1xf32, #tpu.memory_space<vmem>>, %arg4: memref<1x4x1xf32, #tpu.memory_space<vmem>>, %arg5: memref<4x36xf32, #tpu.memory_space<vmem>>, %arg6: memref<1x4x1xf32, #tpu.memory_space<vmem>>, %arg7: memref<2x4x256xf32, #tpu.memory_space<vmem>>) attributes {dimension_semantics = [], scalar_prefetch = 0 : i64, scratch_operands = 0 : i64, tpu.core_type = #tpu.core_type<tc>} {
    %c0 = arith.constant 0 : index
    %c0_0 = arith.constant 0 : index
    %c0_1 = arith.constant 0 : index
    %0 = vector.load %arg0[%c0, %c0_0, %c0_1] : memref<2x4x256xf32, #tpu.memory_space<vmem>>, vector<2x4x256xf32>
    %c0_2 = arith.constant 0 : index
    %c0_3 = arith.constant 0 : index
    %1 = vector.load %arg1[%c0_2, %c0_3] : memref<4x36xf32, #tpu.memory_space<vmem>>, vector<4x36xf32>
    %c0_4 = arith.constant 0 : index
    %c0_5 = arith.constant 0 : index
    %2 = vector.load %arg5[%c0_4, %c0_5] : memref<4x36xf32, #tpu.memory_space<vmem>>, vector<4x36xf32>
    %3 = tpu.iota {dimensions = array<i32: 2>} : vector<1x1x256xi32>
    %c16_i32 = arith.constant 16 : i32
    %c0_i32 = arith.constant 0 : i32
    %4 = arith.cmpi eq, %c16_i32, %c0_i32 : i32
    %c1_i32 = arith.constant 1 : i32
    %5 = arith.select %4, %c1_i32, %c16_i32 : i32
    %6 = vector.broadcast %5 : i32 to vector<1x1x256xi32>
    %7 = arith.remsi %3, %6 : vector<1x1x256xi32>
    %c0_i32_6 = arith.constant 0 : i32
    %8 = vector.broadcast %c0_i32_6 : i32 to vector<1x1x256xi32>
    %9 = arith.cmpi ne, %7, %8 : vector<1x1x256xi32>
    %c0_i32_7 = arith.constant 0 : i32
    %10 = vector.broadcast %c0_i32_7 : i32 to vector<1x1x256xi32>
    %11 = arith.cmpi slt, %7, %10 : vector<1x1x256xi32>
    %c0_i32_8 = arith.constant 0 : i32
    %12 = arith.cmpi slt, %5, %c0_i32_8 : i32
    %13 = vector.broadcast %12 : i1 to vector<1x1x256xi1>
    %14 = vector.broadcast %13 : vector<1x1x256xi1> to vector<1x1x256xi1>
    %15 = arith.xori %11, %14 : vector<1x1x256xi1>
    %16 = arith.andi %15, %9 : vector<1x1x256xi1>
    %17 = vector.broadcast %5 : i32 to vector<1x1x256xi32>
    %18 = arith.addi %7, %17 : vector<1x1x256xi32>
    %19 = arith.select %16, %18, %7 : vector<1x1x256xi1>, vector<1x1x256xi32>
    %c15_i32 = arith.constant 15 : i32
    %20 = vector.broadcast %c15_i32 : i32 to vector<1x1x256xi32>
    %21 = arith.cmpi slt, %19, %20 : vector<1x1x256xi32>
    %c0_i32_9 = arith.constant 0 : i32
    %22 = vector.broadcast %c0_i32_9 : i32 to vector<1x1x256xi32>
    %23 = arith.cmpi sgt, %19, %22 : vector<1x1x256xi32>
    %cst = arith.constant dense<0.000000e+00> : vector<2x4xf32>
    %24 = vector.multi_reduction <add>, %0, %cst [2] : vector<2x4x256xf32> to vector<2x4xf32>
    %25 = vector.shape_cast %24 : vector<2x4xf32> to vector<2x4x1xf32>
    %cst_10 = arith.constant dense<0.000000e+00> : vector<4x1xf32>
    %26 = vector.multi_reduction <add>, %25, %cst_10 [0] : vector<2x4x1xf32> to vector<4x1xf32>
    %27 = vector.shape_cast %26 : vector<4x1xf32> to vector<1x4x1xf32>
    %28 = arith.mulf %0, %0 : vector<2x4x256xf32>
    %cst_11 = arith.constant dense<0.000000e+00> : vector<2x4xf32>
    %29 = vector.multi_reduction <add>, %28, %cst_11 [2] : vector<2x4x256xf32> to vector<2x4xf32>
    %30 = vector.shape_cast %29 : vector<2x4xf32> to vector<2x4x1xf32>
    %cst_12 = arith.constant dense<0.000000e+00> : vector<4x1xf32>
    %31 = vector.multi_reduction <add>, %30, %cst_12 [0] : vector<2x4x1xf32> to vector<4x1xf32>
    %32 = vector.shape_cast %31 : vector<4x1xf32> to vector<1x4x1xf32>
    %cst_13 = arith.constant 0.001953125 : f32
    %33 = vector.broadcast %cst_13 : f32 to vector<1x4x1xf32>
    %34 = arith.mulf %27, %33 : vector<1x4x1xf32>
    %cst_14 = arith.constant 0.001953125 : f32
    %35 = vector.broadcast %cst_14 : f32 to vector<1x4x1xf32>
    %36 = arith.mulf %32, %35 : vector<1x4x1xf32>
    %37 = arith.mulf %34, %34 : vector<1x4x1xf32>
    %38 = arith.subf %36, %37 : vector<1x4x1xf32>
    %c0_15 = arith.constant 0 : index
    %c0_16 = arith.constant 0 : index
    %c0_17 = arith.constant 0 : index
    %39 = vector.load %arg3[%c0_15, %c0_16, %c0_17] : memref<1x4x1xf32, #tpu.memory_space<vmem>>, vector<1x4x1xf32>
    %cst_18 = arith.constant 9.99999974E-6 : f32
    %40 = vector.broadcast %cst_18 : f32 to vector<1x4x1xf32>
    %41 = arith.addf %38, %40 : vector<1x4x1xf32>
    %42 = math.rsqrt %41 : vector<1x4x1xf32>
    %43 = arith.mulf %39, %42 : vector<1x4x1xf32>
    %c0_19 = arith.constant 0 : index
    %c0_20 = arith.constant 0 : index
    %c0_21 = arith.constant 0 : index
    %44 = vector.load %arg2[%c0_19, %c0_20, %c0_21] : memref<1x4x1xf32, #tpu.memory_space<vmem>>, vector<1x4x1xf32>
    %c0_22 = arith.constant 0 : index
    %c0_23 = arith.constant 0 : index
    %c0_24 = arith.constant 0 : index
    %45 = vector.load %arg4[%c0_22, %c0_23, %c0_24] : memref<1x4x1xf32, #tpu.memory_space<vmem>>, vector<1x4x1xf32>
    %46 = arith.addf %44, %45 : vector<1x4x1xf32>
    %47 = arith.mulf %43, %34 : vector<1x4x1xf32>
    %48 = arith.subf %46, %47 : vector<1x4x1xf32>
    %cst_25 = arith.constant 0.000000e+00 : f32
    %49 = vector.broadcast %cst_25 : f32 to vector<2x4x256xf32>
    %cst_26 = arith.constant 0.000000e+00 : f32
    %50 = vector.broadcast %cst_26 : f32 to vector<2x4x17xf32>
    %51 = vector.extract_strided_slice %0 {offsets = [0, 0, 0], sizes = [2, 4, 239], strides = [1, 1, 1]} : vector<2x4x256xf32> to vector<2x4x239xf32>
    %52 = tpu.concatenate %50, %51 in 2 : vector<2x4x17xf32>, vector<2x4x239xf32> -> vector<2x4x256xf32>
    %cst_27 = arith.constant 0.000000e+00 : f32
    %53 = vector.shape_cast %23 : vector<1x1x256xi1> to vector<1x1x256xi1>
    %54 = vector.broadcast %53 : vector<1x1x256xi1> to vector<2x4x256xi1>
    %55 = vector.broadcast %cst_27 : f32 to vector<2x4x256xf32>
    %56 = arith.select %54, %52, %55 : vector<2x4x256xi1>, vector<2x4x256xf32>
    %57 = vector.extract_strided_slice %1 {offsets = [0, 0], sizes = [4, 1], strides = [1, 1]} : vector<4x36xf32> to vector<4x1xf32>
    %58 = vector.shape_cast %57 : vector<4x1xf32> to vector<1x4x1xf32>
    %59 = vector.extract_strided_slice %56 {offsets = [0, 0, 0], sizes = [2, 1, 256], strides = [1, 1, 1]} : vector<2x4x256xf32> to vector<2x1x256xf32>
    %60 = vector.broadcast %58 : vector<1x4x1xf32> to vector<2x4x256xf32>
    %61 = vector.broadcast %59 : vector<2x1x256xf32> to vector<2x4x256xf32>
    %62 = arith.mulf %60, %61 : vector<2x4x256xf32>
    %63 = arith.addf %49, %62 : vector<2x4x256xf32>
    %64 = vector.extract_strided_slice %1 {offsets = [0, 1], sizes = [4, 1], strides = [1, 1]} : vector<4x36xf32> to vector<4x1xf32>
    %65 = vector.shape_cast %64 : vector<4x1xf32> to vector<1x4x1xf32>
    %66 = vector.extract_strided_slice %56 {offsets = [0, 1, 0], sizes = [2, 1, 256], strides = [1, 1, 1]} : vector<2x4x256xf32> to vector<2x1x256xf32>
    %67 = vector.broadcast %65 : vector<1x4x1xf32> to vector<2x4x256xf32>
    %68 = vector.broadcast %66 : vector<2x1x256xf32> to vector<2x4x256xf32>
    %69 = arith.mulf %67, %68 : vector<2x4x256xf32>
    %70 = arith.addf %63, %69 : vector<2x4x256xf32>
    %71 = vector.extract_strided_slice %1 {offsets = [0, 2], sizes = [4, 1], strides = [1, 1]} : vector<4x36xf32> to vector<4x1xf32>
    %72 = vector.shape_cast %71 : vector<4x1xf32> to vector<1x4x1xf32>
    %73 = vector.extract_strided_slice %56 {offsets = [0, 2, 0], sizes = [2, 1, 256], strides = [1, 1, 1]} : vector<2x4x256xf32> to vector<2x1x256xf32>
    %74 = vector.broadcast %72 : vector<1x4x1xf32> to vector<2x4x256xf32>
    %75 = vector.broadcast %73 : vector<2x1x256xf32> to vector<2x4x256xf32>
    %76 = arith.mulf %74, %75 : vector<2x4x256xf32>
    %77 = arith.addf %70, %76 : vector<2x4x256xf32>
    %78 = vector.extract_strided_slice %1 {offsets = [0, 3], sizes = [4, 1], strides = [1, 1]} : vector<4x36xf32> to vector<4x1xf32>
    %79 = vector.shape_cast %78 : vector<4x1xf32> to vector<1x4x1xf32>
    %80 = vector.extract_strided_slice %56 {offsets = [0, 3, 0], sizes = [2, 1, 256], strides = [1, 1, 1]} : vector<2x4x256xf32> to vector<2x1x256xf32>
    %81 = vector.broadcast %79 : vector<1x4x1xf32> to vector<2x4x256xf32>
    %82 = vector.broadcast %80 : vector<2x1x256xf32> to vector<2x4x256xf32>
    %83 = arith.mulf %81, %82 : vector<2x4x256xf32>
    %84 = arith.addf %77, %83 : vector<2x4x256xf32>
    %cst_28 = arith.constant 0.000000e+00 : f32
    %85 = vector.broadcast %cst_28 : f32 to vector<2x4x16xf32>
    %86 = vector.extract_strided_slice %0 {offsets = [0, 0, 0], sizes = [2, 4, 240], strides = [1, 1, 1]} : vector<2x4x256xf32> to vector<2x4x240xf32>
    %87 = tpu.concatenate %85, %86 in 2 : vector<2x4x16xf32>, vector<2x4x240xf32> -> vector<2x4x256xf32>
    %88 = vector.extract_strided_slice %1 {offsets = [0, 4], sizes = [4, 1], strides = [1, 1]} : vector<4x36xf32> to vector<4x1xf32>
    %89 = vector.shape_cast %88 : vector<4x1xf32> to vector<1x4x1xf32>
    %90 = vector.extract_strided_slice %87 {offsets = [0, 0, 0], sizes = [2, 1, 256], strides = [1, 1, 1]} : vector<2x4x256xf32> to vector<2x1x256xf32>
    %91 = vector.broadcast %89 : vector<1x4x1xf32> to vector<2x4x256xf32>
    %92 = vector.broadcast %90 : vector<2x1x256xf32> to vector<2x4x256xf32>
    %93 = arith.mulf %91, %92 : vector<2x4x256xf32>
    %94 = arith.addf %84, %93 : vector<2x4x256xf32>
    %95 = vector.extract_strided_slice %1 {offsets = [0, 5], sizes = [4, 1], strides = [1, 1]} : vector<4x36xf32> to vector<4x1xf32>
    %96 = vector.shape_cast %95 : vector<4x1xf32> to vector<1x4x1xf32>
    %97 = vector.extract_strided_slice %87 {offsets = [0, 1, 0], sizes = [2, 1, 256], strides = [1, 1, 1]} : vector<2x4x256xf32> to vector<2x1x256xf32>
    %98 = vector.broadcast %96 : vector<1x4x1xf32> to vector<2x4x256xf32>
    %99 = vector.broadcast %97 : vector<2x1x256xf32> to vector<2x4x256xf32>
    %100 = arith.mulf %98, %99 : vector<2x4x256xf32>
    %101 = arith.addf %94, %100 : vector<2x4x256xf32>
    %102 = vector.extract_strided_slice %1 {offsets = [0, 6], sizes = [4, 1], strides = [1, 1]} : vector<4x36xf32> to vector<4x1xf32>
    %103 = vector.shape_cast %102 : vector<4x1xf32> to vector<1x4x1xf32>
    %104 = vector.extract_strided_slice %87 {offsets = [0, 2, 0], sizes = [2, 1, 256], strides = [1, 1, 1]} : vector<2x4x256xf32> to vector<2x1x256xf32>
    %105 = vector.broadcast %103 : vector<1x4x1xf32> to vector<2x4x256xf32>
    %106 = vector.broadcast %104 : vector<2x1x256xf32> to vector<2x4x256xf32>
    %107 = arith.mulf %105, %106 : vector<2x4x256xf32>
    %108 = arith.addf %101, %107 : vector<2x4x256xf32>
    %109 = vector.extract_strided_slice %1 {offsets = [0, 7], sizes = [4, 1], strides = [1, 1]} : vector<4x36xf32> to vector<4x1xf32>
    %110 = vector.shape_cast %109 : vector<4x1xf32> to vector<1x4x1xf32>
    %111 = vector.extract_strided_slice %87 {offsets = [0, 3, 0], sizes = [2, 1, 256], strides = [1, 1, 1]} : vector<2x4x256xf32> to vector<2x1x256xf32>
    %112 = vector.broadcast %110 : vector<1x4x1xf32> to vector<2x4x256xf32>
    %113 = vector.broadcast %111 : vector<2x1x256xf32> to vector<2x4x256xf32>
    %114 = arith.mulf %112, %113 : vector<2x4x256xf32>
    %115 = arith.addf %108, %114 : vector<2x4x256xf32>
    %cst_29 = arith.constant 0.000000e+00 : f32
    %116 = vector.broadcast %cst_29 : f32 to vector<2x4x15xf32>
    %117 = vector.extract_strided_slice %0 {offsets = [0, 0, 0], sizes = [2, 4, 241], strides = [1, 1, 1]} : vector<2x4x256xf32> to vector<2x4x241xf32>
    %118 = tpu.concatenate %116, %117 in 2 : vector<2x4x15xf32>, vector<2x4x241xf32> -> vector<2x4x256xf32>
    %cst_30 = arith.constant 0.000000e+00 : f32
    %119 = vector.shape_cast %21 : vector<1x1x256xi1> to vector<1x1x256xi1>
    %120 = vector.broadcast %119 : vector<1x1x256xi1> to vector<2x4x256xi1>
    %121 = vector.broadcast %cst_30 : f32 to vector<2x4x256xf32>
    %122 = arith.select %120, %118, %121 : vector<2x4x256xi1>, vector<2x4x256xf32>
    %123 = vector.extract_strided_slice %1 {offsets = [0, 8], sizes = [4, 1], strides = [1, 1]} : vector<4x36xf32> to vector<4x1xf32>
    %124 = vector.shape_cast %123 : vector<4x1xf32> to vector<1x4x1xf32>
    %125 = vector.extract_strided_slice %122 {offsets = [0, 0, 0], sizes = [2, 1, 256], strides = [1, 1, 1]} : vector<2x4x256xf32> to vector<2x1x256xf32>
    %126 = vector.broadcast %124 : vector<1x4x1xf32> to vector<2x4x256xf32>
    %127 = vector.broadcast %125 : vector<2x1x256xf32> to vector<2x4x256xf32>
    %128 = arith.mulf %126, %127 : vector<2x4x256xf32>
    %129 = arith.addf %115, %128 : vector<2x4x256xf32>
    %130 = vector.extract_strided_slice %1 {offsets = [0, 9], sizes = [4, 1], strides = [1, 1]} : vector<4x36xf32> to vector<4x1xf32>
    %131 = vector.shape_cast %130 : vector<4x1xf32> to vector<1x4x1xf32>
    %132 = vector.extract_strided_slice %122 {offsets = [0, 1, 0], sizes = [2, 1, 256], strides = [1, 1, 1]} : vector<2x4x256xf32> to vector<2x1x256xf32>
    %133 = vector.broadcast %131 : vector<1x4x1xf32> to vector<2x4x256xf32>
    %134 = vector.broadcast %132 : vector<2x1x256xf32> to vector<2x4x256xf32>
    %135 = arith.mulf %133, %134 : vector<2x4x256xf32>
    %136 = arith.addf %129, %135 : vector<2x4x256xf32>
    %137 = vector.extract_strided_slice %1 {offsets = [0, 10], sizes = [4, 1], strides = [1, 1]} : vector<4x36xf32> to vector<4x1xf32>
    %138 = vector.shape_cast %137 : vector<4x1xf32> to vector<1x4x1xf32>
    %139 = vector.extract_strided_slice %122 {offsets = [0, 2, 0], sizes = [2, 1, 256], strides = [1, 1, 1]} : vector<2x4x256xf32> to vector<2x1x256xf32>
    %140 = vector.broadcast %138 : vector<1x4x1xf32> to vector<2x4x256xf32>
    %141 = vector.broadcast %139 : vector<2x1x256xf32> to vector<2x4x256xf32>
    %142 = arith.mulf %140, %141 : vector<2x4x256xf32>
    %143 = arith.addf %136, %142 : vector<2x4x256xf32>
    %144 = vector.extract_strided_slice %1 {offsets = [0, 11], sizes = [4, 1], strides = [1, 1]} : vector<4x36xf32> to vector<4x1xf32>
    %145 = vector.shape_cast %144 : vector<4x1xf32> to vector<1x4x1xf32>
    %146 = vector.extract_strided_slice %122 {offsets = [0, 3, 0], sizes = [2, 1, 256], strides = [1, 1, 1]} : vector<2x4x256xf32> to vector<2x1x256xf32>
    %147 = vector.broadcast %145 : vector<1x4x1xf32> to vector<2x4x256xf32>
    %148 = vector.broadcast %146 : vector<2x1x256xf32> to vector<2x4x256xf32>
    %149 = arith.mulf %147, %148 : vector<2x4x256xf32>
    %150 = arith.addf %143, %149 : vector<2x4x256xf32>
    %cst_31 = arith.constant 0.000000e+00 : f32
    %151 = vector.broadcast %cst_31 : f32 to vector<2x4x1xf32>
    %152 = vector.extract_strided_slice %0 {offsets = [0, 0, 0], sizes = [2, 4, 255], strides = [1, 1, 1]} : vector<2x4x256xf32> to vector<2x4x255xf32>
    %153 = tpu.concatenate %151, %152 in 2 : vector<2x4x1xf32>, vector<2x4x255xf32> -> vector<2x4x256xf32>
    %cst_32 = arith.constant 0.000000e+00 : f32
    %154 = vector.shape_cast %23 : vector<1x1x256xi1> to vector<1x1x256xi1>
    %155 = vector.broadcast %154 : vector<1x1x256xi1> to vector<2x4x256xi1>
    %156 = vector.broadcast %cst_32 : f32 to vector<2x4x256xf32>
    %157 = arith.select %155, %153, %156 : vector<2x4x256xi1>, vector<2x4x256xf32>
    %158 = vector.extract_strided_slice %1 {offsets = [0, 12], sizes = [4, 1], strides = [1, 1]} : vector<4x36xf32> to vector<4x1xf32>
    %159 = vector.shape_cast %158 : vector<4x1xf32> to vector<1x4x1xf32>
    %160 = vector.extract_strided_slice %157 {offsets = [0, 0, 0], sizes = [2, 1, 256], strides = [1, 1, 1]} : vector<2x4x256xf32> to vector<2x1x256xf32>
    %161 = vector.broadcast %159 : vector<1x4x1xf32> to vector<2x4x256xf32>
    %162 = vector.broadcast %160 : vector<2x1x256xf32> to vector<2x4x256xf32>
    %163 = arith.mulf %161, %162 : vector<2x4x256xf32>
    %164 = arith.addf %150, %163 : vector<2x4x256xf32>
    %165 = vector.extract_strided_slice %1 {offsets = [0, 13], sizes = [4, 1], strides = [1, 1]} : vector<4x36xf32> to vector<4x1xf32>
    %166 = vector.shape_cast %165 : vector<4x1xf32> to vector<1x4x1xf32>
    %167 = vector.extract_strided_slice %157 {offsets = [0, 1, 0], sizes = [2, 1, 256], strides = [1, 1, 1]} : vector<2x4x256xf32> to vector<2x1x256xf32>
    %168 = vector.broadcast %166 : vector<1x4x1xf32> to vector<2x4x256xf32>
    %169 = vector.broadcast %167 : vector<2x1x256xf32> to vector<2x4x256xf32>
    %170 = arith.mulf %168, %169 : vector<2x4x256xf32>
    %171 = arith.addf %164, %170 : vector<2x4x256xf32>
    %172 = vector.extract_strided_slice %1 {offsets = [0, 14], sizes = [4, 1], strides = [1, 1]} : vector<4x36xf32> to vector<4x1xf32>
    %173 = vector.shape_cast %172 : vector<4x1xf32> to vector<1x4x1xf32>
    %174 = vector.extract_strided_slice %157 {offsets = [0, 2, 0], sizes = [2, 1, 256], strides = [1, 1, 1]} : vector<2x4x256xf32> to vector<2x1x256xf32>
    %175 = vector.broadcast %173 : vector<1x4x1xf32> to vector<2x4x256xf32>
    %176 = vector.broadcast %174 : vector<2x1x256xf32> to vector<2x4x256xf32>
    %177 = arith.mulf %175, %176 : vector<2x4x256xf32>
    %178 = arith.addf %171, %177 : vector<2x4x256xf32>
    %179 = vector.extract_strided_slice %1 {offsets = [0, 15], sizes = [4, 1], strides = [1, 1]} : vector<4x36xf32> to vector<4x1xf32>
    %180 = vector.shape_cast %179 : vector<4x1xf32> to vector<1x4x1xf32>
    %181 = vector.extract_strided_slice %157 {offsets = [0, 3, 0], sizes = [2, 1, 256], strides = [1, 1, 1]} : vector<2x4x256xf32> to vector<2x1x256xf32>
    %182 = vector.broadcast %180 : vector<1x4x1xf32> to vector<2x4x256xf32>
    %183 = vector.broadcast %181 : vector<2x1x256xf32> to vector<2x4x256xf32>
    %184 = arith.mulf %182, %183 : vector<2x4x256xf32>
    %185 = arith.addf %178, %184 : vector<2x4x256xf32>
    %186 = vector.extract_strided_slice %1 {offsets = [0, 16], sizes = [4, 1], strides = [1, 1]} : vector<4x36xf32> to vector<4x1xf32>
    %187 = vector.shape_cast %186 : vector<4x1xf32> to vector<1x4x1xf32>
    %188 = vector.extract_strided_slice %0 {offsets = [0, 0, 0], sizes = [2, 1, 256], strides = [1, 1, 1]} : vector<2x4x256xf32> to vector<2x1x256xf32>
    %189 = vector.broadcast %187 : vector<1x4x1xf32> to vector<2x4x256xf32>
    %190 = vector.broadcast %188 : vector<2x1x256xf32> to vector<2x4x256xf32>
    %191 = arith.mulf %189, %190 : vector<2x4x256xf32>
    %192 = arith.addf %185, %191 : vector<2x4x256xf32>
    %193 = vector.extract_strided_slice %1 {offsets = [0, 17], sizes = [4, 1], strides = [1, 1]} : vector<4x36xf32> to vector<4x1xf32>
    %194 = vector.shape_cast %193 : vector<4x1xf32> to vector<1x4x1xf32>
    %195 = vector.extract_strided_slice %0 {offsets = [0, 1, 0], sizes = [2, 1, 256], strides = [1, 1, 1]} : vector<2x4x256xf32> to vector<2x1x256xf32>
    %196 = vector.broadcast %194 : vector<1x4x1xf32> to vector<2x4x256xf32>
    %197 = vector.broadcast %195 : vector<2x1x256xf32> to vector<2x4x256xf32>
    %198 = arith.mulf %196, %197 : vector<2x4x256xf32>
    %199 = arith.addf %192, %198 : vector<2x4x256xf32>
    %200 = vector.extract_strided_slice %1 {offsets = [0, 18], sizes = [4, 1], strides = [1, 1]} : vector<4x36xf32> to vector<4x1xf32>
    %201 = vector.shape_cast %200 : vector<4x1xf32> to vector<1x4x1xf32>
    %202 = vector.extract_strided_slice %0 {offsets = [0, 2, 0], sizes = [2, 1, 256], strides = [1, 1, 1]} : vector<2x4x256xf32> to vector<2x1x256xf32>
    %203 = vector.broadcast %201 : vector<1x4x1xf32> to vector<2x4x256xf32>
    %204 = vector.broadcast %202 : vector<2x1x256xf32> to vector<2x4x256xf32>
    %205 = arith.mulf %203, %204 : vector<2x4x256xf32>
    %206 = arith.addf %199, %205 : vector<2x4x256xf32>
    %207 = vector.extract_strided_slice %1 {offsets = [0, 19], sizes = [4, 1], strides = [1, 1]} : vector<4x36xf32> to vector<4x1xf32>
    %208 = vector.shape_cast %207 : vector<4x1xf32> to vector<1x4x1xf32>
    %209 = vector.extract_strided_slice %0 {offsets = [0, 3, 0], sizes = [2, 1, 256], strides = [1, 1, 1]} : vector<2x4x256xf32> to vector<2x1x256xf32>
    %210 = vector.broadcast %208 : vector<1x4x1xf32> to vector<2x4x256xf32>
    %211 = vector.broadcast %209 : vector<2x1x256xf32> to vector<2x4x256xf32>
    %212 = arith.mulf %210, %211 : vector<2x4x256xf32>
    %213 = arith.addf %206, %212 : vector<2x4x256xf32>
    %cst_33 = arith.constant 0.000000e+00 : f32
    %214 = vector.broadcast %cst_33 : f32 to vector<2x4x1xf32>
    %215 = vector.extract_strided_slice %0 {offsets = [0, 0, 1], sizes = [2, 4, 255], strides = [1, 1, 1]} : vector<2x4x256xf32> to vector<2x4x255xf32>
    %216 = tpu.concatenate %215, %214 in 2 : vector<2x4x255xf32>, vector<2x4x1xf32> -> vector<2x4x256xf32>
    %cst_34 = arith.constant 0.000000e+00 : f32
    %217 = vector.shape_cast %21 : vector<1x1x256xi1> to vector<1x1x256xi1>
    %218 = vector.broadcast %217 : vector<1x1x256xi1> to vector<2x4x256xi1>
    %219 = vector.broadcast %cst_34 : f32 to vector<2x4x256xf32>
    %220 = arith.select %218, %216, %219 : vector<2x4x256xi1>, vector<2x4x256xf32>
    %221 = vector.extract_strided_slice %1 {offsets = [0, 20], sizes = [4, 1], strides = [1, 1]} : vector<4x36xf32> to vector<4x1xf32>
    %222 = vector.shape_cast %221 : vector<4x1xf32> to vector<1x4x1xf32>
    %223 = vector.extract_strided_slice %220 {offsets = [0, 0, 0], sizes = [2, 1, 256], strides = [1, 1, 1]} : vector<2x4x256xf32> to vector<2x1x256xf32>
    %224 = vector.broadcast %222 : vector<1x4x1xf32> to vector<2x4x256xf32>
    %225 = vector.broadcast %223 : vector<2x1x256xf32> to vector<2x4x256xf32>
    %226 = arith.mulf %224, %225 : vector<2x4x256xf32>
    %227 = arith.addf %213, %226 : vector<2x4x256xf32>
    %228 = vector.extract_strided_slice %1 {offsets = [0, 21], sizes = [4, 1], strides = [1, 1]} : vector<4x36xf32> to vector<4x1xf32>
    %229 = vector.shape_cast %228 : vector<4x1xf32> to vector<1x4x1xf32>
    %230 = vector.extract_strided_slice %220 {offsets = [0, 1, 0], sizes = [2, 1, 256], strides = [1, 1, 1]} : vector<2x4x256xf32> to vector<2x1x256xf32>
    %231 = vector.broadcast %229 : vector<1x4x1xf32> to vector<2x4x256xf32>
    %232 = vector.broadcast %230 : vector<2x1x256xf32> to vector<2x4x256xf32>
    %233 = arith.mulf %231, %232 : vector<2x4x256xf32>
    %234 = arith.addf %227, %233 : vector<2x4x256xf32>
    %235 = vector.extract_strided_slice %1 {offsets = [0, 22], sizes = [4, 1], strides = [1, 1]} : vector<4x36xf32> to vector<4x1xf32>
    %236 = vector.shape_cast %235 : vector<4x1xf32> to vector<1x4x1xf32>
    %237 = vector.extract_strided_slice %220 {offsets = [0, 2, 0], sizes = [2, 1, 256], strides = [1, 1, 1]} : vector<2x4x256xf32> to vector<2x1x256xf32>
    %238 = vector.broadcast %236 : vector<1x4x1xf32> to vector<2x4x256xf32>
    %239 = vector.broadcast %237 : vector<2x1x256xf32> to vector<2x4x256xf32>
    %240 = arith.mulf %238, %239 : vector<2x4x256xf32>
    %241 = arith.addf %234, %240 : vector<2x4x256xf32>
    %242 = vector.extract_strided_slice %1 {offsets = [0, 23], sizes = [4, 1], strides = [1, 1]} : vector<4x36xf32> to vector<4x1xf32>
    %243 = vector.shape_cast %242 : vector<4x1xf32> to vector<1x4x1xf32>
    %244 = vector.extract_strided_slice %220 {offsets = [0, 3, 0], sizes = [2, 1, 256], strides = [1, 1, 1]} : vector<2x4x256xf32> to vector<2x1x256xf32>
    %245 = vector.broadcast %243 : vector<1x4x1xf32> to vector<2x4x256xf32>
    %246 = vector.broadcast %244 : vector<2x1x256xf32> to vector<2x4x256xf32>
    %247 = arith.mulf %245, %246 : vector<2x4x256xf32>
    %248 = arith.addf %241, %247 : vector<2x4x256xf32>
    %cst_35 = arith.constant 0.000000e+00 : f32
    %249 = vector.broadcast %cst_35 : f32 to vector<2x4x15xf32>
    %250 = vector.extract_strided_slice %0 {offsets = [0, 0, 15], sizes = [2, 4, 241], strides = [1, 1, 1]} : vector<2x4x256xf32> to vector<2x4x241xf32>
    %251 = tpu.concatenate %250, %249 in 2 : vector<2x4x241xf32>, vector<2x4x15xf32> -> vector<2x4x256xf32>
    %cst_36 = arith.constant 0.000000e+00 : f32
    %252 = vector.shape_cast %23 : vector<1x1x256xi1> to vector<1x1x256xi1>
    %253 = vector.broadcast %252 : vector<1x1x256xi1> to vector<2x4x256xi1>
    %254 = vector.broadcast %cst_36 : f32 to vector<2x4x256xf32>
    %255 = arith.select %253, %251, %254 : vector<2x4x256xi1>, vector<2x4x256xf32>
    %256 = vector.extract_strided_slice %1 {offsets = [0, 24], sizes = [4, 1], strides = [1, 1]} : vector<4x36xf32> to vector<4x1xf32>
    %257 = vector.shape_cast %256 : vector<4x1xf32> to vector<1x4x1xf32>
    %258 = vector.extract_strided_slice %255 {offsets = [0, 0, 0], sizes = [2, 1, 256], strides = [1, 1, 1]} : vector<2x4x256xf32> to vector<2x1x256xf32>
    %259 = vector.broadcast %257 : vector<1x4x1xf32> to vector<2x4x256xf32>
    %260 = vector.broadcast %258 : vector<2x1x256xf32> to vector<2x4x256xf32>
    %261 = arith.mulf %259, %260 : vector<2x4x256xf32>
    %262 = arith.addf %248, %261 : vector<2x4x256xf32>
    %263 = vector.extract_strided_slice %1 {offsets = [0, 25], sizes = [4, 1], strides = [1, 1]} : vector<4x36xf32> to vector<4x1xf32>
    %264 = vector.shape_cast %263 : vector<4x1xf32> to vector<1x4x1xf32>
    %265 = vector.extract_strided_slice %255 {offsets = [0, 1, 0], sizes = [2, 1, 256], strides = [1, 1, 1]} : vector<2x4x256xf32> to vector<2x1x256xf32>
    %266 = vector.broadcast %264 : vector<1x4x1xf32> to vector<2x4x256xf32>
    %267 = vector.broadcast %265 : vector<2x1x256xf32> to vector<2x4x256xf32>
    %268 = arith.mulf %266, %267 : vector<2x4x256xf32>
    %269 = arith.addf %262, %268 : vector<2x4x256xf32>
    %270 = vector.extract_strided_slice %1 {offsets = [0, 26], sizes = [4, 1], strides = [1, 1]} : vector<4x36xf32> to vector<4x1xf32>
    %271 = vector.shape_cast %270 : vector<4x1xf32> to vector<1x4x1xf32>
    %272 = vector.extract_strided_slice %255 {offsets = [0, 2, 0], sizes = [2, 1, 256], strides = [1, 1, 1]} : vector<2x4x256xf32> to vector<2x1x256xf32>
    %273 = vector.broadcast %271 : vector<1x4x1xf32> to vector<2x4x256xf32>
    %274 = vector.broadcast %272 : vector<2x1x256xf32> to vector<2x4x256xf32>
    %275 = arith.mulf %273, %274 : vector<2x4x256xf32>
    %276 = arith.addf %269, %275 : vector<2x4x256xf32>
    %277 = vector.extract_strided_slice %1 {offsets = [0, 27], sizes = [4, 1], strides = [1, 1]} : vector<4x36xf32> to vector<4x1xf32>
    %278 = vector.shape_cast %277 : vector<4x1xf32> to vector<1x4x1xf32>
    %279 = vector.extract_strided_slice %255 {offsets = [0, 3, 0], sizes = [2, 1, 256], strides = [1, 1, 1]} : vector<2x4x256xf32> to vector<2x1x256xf32>
    %280 = vector.broadcast %278 : vector<1x4x1xf32> to vector<2x4x256xf32>
    %281 = vector.broadcast %279 : vector<2x1x256xf32> to vector<2x4x256xf32>
    %282 = arith.mulf %280, %281 : vector<2x4x256xf32>
    %283 = arith.addf %276, %282 : vector<2x4x256xf32>
    %cst_37 = arith.constant 0.000000e+00 : f32
    %284 = vector.broadcast %cst_37 : f32 to vector<2x4x16xf32>
    %285 = vector.extract_strided_slice %0 {offsets = [0, 0, 16], sizes = [2, 4, 240], strides = [1, 1, 1]} : vector<2x4x256xf32> to vector<2x4x240xf32>
    %286 = tpu.concatenate %285, %284 in 2 : vector<2x4x240xf32>, vector<2x4x16xf32> -> vector<2x4x256xf32>
    %287 = vector.extract_strided_slice %1 {offsets = [0, 28], sizes = [4, 1], strides = [1, 1]} : vector<4x36xf32> to vector<4x1xf32>
    %288 = vector.shape_cast %287 : vector<4x1xf32> to vector<1x4x1xf32>
    %289 = vector.extract_strided_slice %286 {offsets = [0, 0, 0], sizes = [2, 1, 256], strides = [1, 1, 1]} : vector<2x4x256xf32> to vector<2x1x256xf32>
    %290 = vector.broadcast %288 : vector<1x4x1xf32> to vector<2x4x256xf32>
    %291 = vector.broadcast %289 : vector<2x1x256xf32> to vector<2x4x256xf32>
    %292 = arith.mulf %290, %291 : vector<2x4x256xf32>
    %293 = arith.addf %283, %292 : vector<2x4x256xf32>
    %294 = vector.extract_strided_slice %1 {offsets = [0, 29], sizes = [4, 1], strides = [1, 1]} : vector<4x36xf32> to vector<4x1xf32>
    %295 = vector.shape_cast %294 : vector<4x1xf32> to vector<1x4x1xf32>
    %296 = vector.extract_strided_slice %286 {offsets = [0, 1, 0], sizes = [2, 1, 256], strides = [1, 1, 1]} : vector<2x4x256xf32> to vector<2x1x256xf32>
    %297 = vector.broadcast %295 : vector<1x4x1xf32> to vector<2x4x256xf32>
    %298 = vector.broadcast %296 : vector<2x1x256xf32> to vector<2x4x256xf32>
    %299 = arith.mulf %297, %298 : vector<2x4x256xf32>
    %300 = arith.addf %293, %299 : vector<2x4x256xf32>
    %301 = vector.extract_strided_slice %1 {offsets = [0, 30], sizes = [4, 1], strides = [1, 1]} : vector<4x36xf32> to vector<4x1xf32>
    %302 = vector.shape_cast %301 : vector<4x1xf32> to vector<1x4x1xf32>
    %303 = vector.extract_strided_slice %286 {offsets = [0, 2, 0], sizes = [2, 1, 256], strides = [1, 1, 1]} : vector<2x4x256xf32> to vector<2x1x256xf32>
    %304 = vector.broadcast %302 : vector<1x4x1xf32> to vector<2x4x256xf32>
    %305 = vector.broadcast %303 : vector<2x1x256xf32> to vector<2x4x256xf32>
    %306 = arith.mulf %304, %305 : vector<2x4x256xf32>
    %307 = arith.addf %300, %306 : vector<2x4x256xf32>
    %308 = vector.extract_strided_slice %1 {offsets = [0, 31], sizes = [4, 1], strides = [1, 1]} : vector<4x36xf32> to vector<4x1xf32>
    %309 = vector.shape_cast %308 : vector<4x1xf32> to vector<1x4x1xf32>
    %310 = vector.extract_strided_slice %286 {offsets = [0, 3, 0], sizes = [2, 1, 256], strides = [1, 1, 1]} : vector<2x4x256xf32> to vector<2x1x256xf32>
    %311 = vector.broadcast %309 : vector<1x4x1xf32> to vector<2x4x256xf32>
    %312 = vector.broadcast %310 : vector<2x1x256xf32> to vector<2x4x256xf32>
    %313 = arith.mulf %311, %312 : vector<2x4x256xf32>
    %314 = arith.addf %307, %313 : vector<2x4x256xf32>
    %cst_38 = arith.constant 0.000000e+00 : f32
    %315 = vector.broadcast %cst_38 : f32 to vector<2x4x17xf32>
    %316 = vector.extract_strided_slice %0 {offsets = [0, 0, 17], sizes = [2, 4, 239], strides = [1, 1, 1]} : vector<2x4x256xf32> to vector<2x4x239xf32>
    %317 = tpu.concatenate %316, %315 in 2 : vector<2x4x239xf32>, vector<2x4x17xf32> -> vector<2x4x256xf32>
    %cst_39 = arith.constant 0.000000e+00 : f32
    %318 = vector.shape_cast %21 : vector<1x1x256xi1> to vector<1x1x256xi1>
    %319 = vector.broadcast %318 : vector<1x1x256xi1> to vector<2x4x256xi1>
    %320 = vector.broadcast %cst_39 : f32 to vector<2x4x256xf32>
    %321 = arith.select %319, %317, %320 : vector<2x4x256xi1>, vector<2x4x256xf32>
    %322 = vector.extract_strided_slice %1 {offsets = [0, 32], sizes = [4, 1], strides = [1, 1]} : vector<4x36xf32> to vector<4x1xf32>
    %323 = vector.shape_cast %322 : vector<4x1xf32> to vector<1x4x1xf32>
    %324 = vector.extract_strided_slice %321 {offsets = [0, 0, 0], sizes = [2, 1, 256], strides = [1, 1, 1]} : vector<2x4x256xf32> to vector<2x1x256xf32>
    %325 = vector.broadcast %323 : vector<1x4x1xf32> to vector<2x4x256xf32>
    %326 = vector.broadcast %324 : vector<2x1x256xf32> to vector<2x4x256xf32>
    %327 = arith.mulf %325, %326 : vector<2x4x256xf32>
    %328 = arith.addf %314, %327 : vector<2x4x256xf32>
    %329 = vector.extract_strided_slice %1 {offsets = [0, 33], sizes = [4, 1], strides = [1, 1]} : vector<4x36xf32> to vector<4x1xf32>
    %330 = vector.shape_cast %329 : vector<4x1xf32> to vector<1x4x1xf32>
    %331 = vector.extract_strided_slice %321 {offsets = [0, 1, 0], sizes = [2, 1, 256], strides = [1, 1, 1]} : vector<2x4x256xf32> to vector<2x1x256xf32>
    %332 = vector.broadcast %330 : vector<1x4x1xf32> to vector<2x4x256xf32>
    %333 = vector.broadcast %331 : vector<2x1x256xf32> to vector<2x4x256xf32>
    %334 = arith.mulf %332, %333 : vector<2x4x256xf32>
    %335 = arith.addf %328, %334 : vector<2x4x256xf32>
    %336 = vector.extract_strided_slice %1 {offsets = [0, 34], sizes = [4, 1], strides = [1, 1]} : vector<4x36xf32> to vector<4x1xf32>
    %337 = vector.shape_cast %336 : vector<4x1xf32> to vector<1x4x1xf32>
    %338 = vector.extract_strided_slice %321 {offsets = [0, 2, 0], sizes = [2, 1, 256], strides = [1, 1, 1]} : vector<2x4x256xf32> to vector<2x1x256xf32>
    %339 = vector.broadcast %337 : vector<1x4x1xf32> to vector<2x4x256xf32>
    %340 = vector.broadcast %338 : vector<2x1x256xf32> to vector<2x4x256xf32>
    %341 = arith.mulf %339, %340 : vector<2x4x256xf32>
    %342 = arith.addf %335, %341 : vector<2x4x256xf32>
    %343 = vector.extract_strided_slice %1 {offsets = [0, 35], sizes = [4, 1], strides = [1, 1]} : vector<4x36xf32> to vector<4x1xf32>
    %344 = vector.shape_cast %343 : vector<4x1xf32> to vector<1x4x1xf32>
    %345 = vector.extract_strided_slice %321 {offsets = [0, 3, 0], sizes = [2, 1, 256], strides = [1, 1, 1]} : vector<2x4x256xf32> to vector<2x1x256xf32>
    %346 = vector.broadcast %344 : vector<1x4x1xf32> to vector<2x4x256xf32>
    %347 = vector.broadcast %345 : vector<2x1x256xf32> to vector<2x4x256xf32>
    %348 = arith.mulf %346, %347 : vector<2x4x256xf32>
    %349 = arith.addf %342, %348 : vector<2x4x256xf32>
    %350 = vector.broadcast %43 : vector<1x4x1xf32> to vector<2x4x256xf32>
    %351 = arith.mulf %350, %0 : vector<2x4x256xf32>
    %352 = arith.addf %349, %351 : vector<2x4x256xf32>
    %353 = vector.broadcast %48 : vector<1x4x1xf32> to vector<2x4x256xf32>
    %354 = arith.addf %352, %353 : vector<2x4x256xf32>
    %cst_40 = arith.constant 0.000000e+00 : f32
    %355 = vector.broadcast %cst_40 : f32 to vector<2x4x256xf32>
    %356 = arith.maximumf %354, %355 : vector<2x4x256xf32>
    %cst_41 = arith.constant 0.000000e+00 : f32
    %357 = vector.broadcast %cst_41 : f32 to vector<2x4x256xf32>
    %cst_42 = arith.constant 0.000000e+00 : f32
    %358 = vector.broadcast %cst_42 : f32 to vector<2x4x17xf32>
    %359 = vector.extract_strided_slice %356 {offsets = [0, 0, 0], sizes = [2, 4, 239], strides = [1, 1, 1]} : vector<2x4x256xf32> to vector<2x4x239xf32>
    %360 = tpu.concatenate %358, %359 in 2 : vector<2x4x17xf32>, vector<2x4x239xf32> -> vector<2x4x256xf32>
    %cst_43 = arith.constant 0.000000e+00 : f32
    %361 = vector.shape_cast %23 : vector<1x1x256xi1> to vector<1x1x256xi1>
    %362 = vector.broadcast %361 : vector<1x1x256xi1> to vector<2x4x256xi1>
    %363 = vector.broadcast %cst_43 : f32 to vector<2x4x256xf32>
    %364 = arith.select %362, %360, %363 : vector<2x4x256xi1>, vector<2x4x256xf32>
    %365 = vector.extract_strided_slice %2 {offsets = [0, 0], sizes = [4, 1], strides = [1, 1]} : vector<4x36xf32> to vector<4x1xf32>
    %366 = vector.shape_cast %365 : vector<4x1xf32> to vector<1x4x1xf32>
    %367 = vector.extract_strided_slice %364 {offsets = [0, 0, 0], sizes = [2, 1, 256], strides = [1, 1, 1]} : vector<2x4x256xf32> to vector<2x1x256xf32>
    %368 = vector.broadcast %366 : vector<1x4x1xf32> to vector<2x4x256xf32>
    %369 = vector.broadcast %367 : vector<2x1x256xf32> to vector<2x4x256xf32>
    %370 = arith.mulf %368, %369 : vector<2x4x256xf32>
    %371 = arith.addf %357, %370 : vector<2x4x256xf32>
    %372 = vector.extract_strided_slice %2 {offsets = [0, 1], sizes = [4, 1], strides = [1, 1]} : vector<4x36xf32> to vector<4x1xf32>
    %373 = vector.shape_cast %372 : vector<4x1xf32> to vector<1x4x1xf32>
    %374 = vector.extract_strided_slice %364 {offsets = [0, 1, 0], sizes = [2, 1, 256], strides = [1, 1, 1]} : vector<2x4x256xf32> to vector<2x1x256xf32>
    %375 = vector.broadcast %373 : vector<1x4x1xf32> to vector<2x4x256xf32>
    %376 = vector.broadcast %374 : vector<2x1x256xf32> to vector<2x4x256xf32>
    %377 = arith.mulf %375, %376 : vector<2x4x256xf32>
    %378 = arith.addf %371, %377 : vector<2x4x256xf32>
    %379 = vector.extract_strided_slice %2 {offsets = [0, 2], sizes = [4, 1], strides = [1, 1]} : vector<4x36xf32> to vector<4x1xf32>
    %380 = vector.shape_cast %379 : vector<4x1xf32> to vector<1x4x1xf32>
    %381 = vector.extract_strided_slice %364 {offsets = [0, 2, 0], sizes = [2, 1, 256], strides = [1, 1, 1]} : vector<2x4x256xf32> to vector<2x1x256xf32>
    %382 = vector.broadcast %380 : vector<1x4x1xf32> to vector<2x4x256xf32>
    %383 = vector.broadcast %381 : vector<2x1x256xf32> to vector<2x4x256xf32>
    %384 = arith.mulf %382, %383 : vector<2x4x256xf32>
    %385 = arith.addf %378, %384 : vector<2x4x256xf32>
    %386 = vector.extract_strided_slice %2 {offsets = [0, 3], sizes = [4, 1], strides = [1, 1]} : vector<4x36xf32> to vector<4x1xf32>
    %387 = vector.shape_cast %386 : vector<4x1xf32> to vector<1x4x1xf32>
    %388 = vector.extract_strided_slice %364 {offsets = [0, 3, 0], sizes = [2, 1, 256], strides = [1, 1, 1]} : vector<2x4x256xf32> to vector<2x1x256xf32>
    %389 = vector.broadcast %387 : vector<1x4x1xf32> to vector<2x4x256xf32>
    %390 = vector.broadcast %388 : vector<2x1x256xf32> to vector<2x4x256xf32>
    %391 = arith.mulf %389, %390 : vector<2x4x256xf32>
    %392 = arith.addf %385, %391 : vector<2x4x256xf32>
    %cst_44 = arith.constant 0.000000e+00 : f32
    %393 = vector.broadcast %cst_44 : f32 to vector<2x4x16xf32>
    %394 = vector.extract_strided_slice %356 {offsets = [0, 0, 0], sizes = [2, 4, 240], strides = [1, 1, 1]} : vector<2x4x256xf32> to vector<2x4x240xf32>
    %395 = tpu.concatenate %393, %394 in 2 : vector<2x4x16xf32>, vector<2x4x240xf32> -> vector<2x4x256xf32>
    %396 = vector.extract_strided_slice %2 {offsets = [0, 4], sizes = [4, 1], strides = [1, 1]} : vector<4x36xf32> to vector<4x1xf32>
    %397 = vector.shape_cast %396 : vector<4x1xf32> to vector<1x4x1xf32>
    %398 = vector.extract_strided_slice %395 {offsets = [0, 0, 0], sizes = [2, 1, 256], strides = [1, 1, 1]} : vector<2x4x256xf32> to vector<2x1x256xf32>
    %399 = vector.broadcast %397 : vector<1x4x1xf32> to vector<2x4x256xf32>
    %400 = vector.broadcast %398 : vector<2x1x256xf32> to vector<2x4x256xf32>
    %401 = arith.mulf %399, %400 : vector<2x4x256xf32>
    %402 = arith.addf %392, %401 : vector<2x4x256xf32>
    %403 = vector.extract_strided_slice %2 {offsets = [0, 5], sizes = [4, 1], strides = [1, 1]} : vector<4x36xf32> to vector<4x1xf32>
    %404 = vector.shape_cast %403 : vector<4x1xf32> to vector<1x4x1xf32>
    %405 = vector.extract_strided_slice %395 {offsets = [0, 1, 0], sizes = [2, 1, 256], strides = [1, 1, 1]} : vector<2x4x256xf32> to vector<2x1x256xf32>
    %406 = vector.broadcast %404 : vector<1x4x1xf32> to vector<2x4x256xf32>
    %407 = vector.broadcast %405 : vector<2x1x256xf32> to vector<2x4x256xf32>
    %408 = arith.mulf %406, %407 : vector<2x4x256xf32>
    %409 = arith.addf %402, %408 : vector<2x4x256xf32>
    %410 = vector.extract_strided_slice %2 {offsets = [0, 6], sizes = [4, 1], strides = [1, 1]} : vector<4x36xf32> to vector<4x1xf32>
    %411 = vector.shape_cast %410 : vector<4x1xf32> to vector<1x4x1xf32>
    %412 = vector.extract_strided_slice %395 {offsets = [0, 2, 0], sizes = [2, 1, 256], strides = [1, 1, 1]} : vector<2x4x256xf32> to vector<2x1x256xf32>
    %413 = vector.broadcast %411 : vector<1x4x1xf32> to vector<2x4x256xf32>
    %414 = vector.broadcast %412 : vector<2x1x256xf32> to vector<2x4x256xf32>
    %415 = arith.mulf %413, %414 : vector<2x4x256xf32>
    %416 = arith.addf %409, %415 : vector<2x4x256xf32>
    %417 = vector.extract_strided_slice %2 {offsets = [0, 7], sizes = [4, 1], strides = [1, 1]} : vector<4x36xf32> to vector<4x1xf32>
    %418 = vector.shape_cast %417 : vector<4x1xf32> to vector<1x4x1xf32>
    %419 = vector.extract_strided_slice %395 {offsets = [0, 3, 0], sizes = [2, 1, 256], strides = [1, 1, 1]} : vector<2x4x256xf32> to vector<2x1x256xf32>
    %420 = vector.broadcast %418 : vector<1x4x1xf32> to vector<2x4x256xf32>
    %421 = vector.broadcast %419 : vector<2x1x256xf32> to vector<2x4x256xf32>
    %422 = arith.mulf %420, %421 : vector<2x4x256xf32>
    %423 = arith.addf %416, %422 : vector<2x4x256xf32>
    %cst_45 = arith.constant 0.000000e+00 : f32
    %424 = vector.broadcast %cst_45 : f32 to vector<2x4x15xf32>
    %425 = vector.extract_strided_slice %356 {offsets = [0, 0, 0], sizes = [2, 4, 241], strides = [1, 1, 1]} : vector<2x4x256xf32> to vector<2x4x241xf32>
    %426 = tpu.concatenate %424, %425 in 2 : vector<2x4x15xf32>, vector<2x4x241xf32> -> vector<2x4x256xf32>
    %cst_46 = arith.constant 0.000000e+00 : f32
    %427 = vector.shape_cast %21 : vector<1x1x256xi1> to vector<1x1x256xi1>
    %428 = vector.broadcast %427 : vector<1x1x256xi1> to vector<2x4x256xi1>
    %429 = vector.broadcast %cst_46 : f32 to vector<2x4x256xf32>
    %430 = arith.select %428, %426, %429 : vector<2x4x256xi1>, vector<2x4x256xf32>
    %431 = vector.extract_strided_slice %2 {offsets = [0, 8], sizes = [4, 1], strides = [1, 1]} : vector<4x36xf32> to vector<4x1xf32>
    %432 = vector.shape_cast %431 : vector<4x1xf32> to vector<1x4x1xf32>
    %433 = vector.extract_strided_slice %430 {offsets = [0, 0, 0], sizes = [2, 1, 256], strides = [1, 1, 1]} : vector<2x4x256xf32> to vector<2x1x256xf32>
    %434 = vector.broadcast %432 : vector<1x4x1xf32> to vector<2x4x256xf32>
    %435 = vector.broadcast %433 : vector<2x1x256xf32> to vector<2x4x256xf32>
    %436 = arith.mulf %434, %435 : vector<2x4x256xf32>
    %437 = arith.addf %423, %436 : vector<2x4x256xf32>
    %438 = vector.extract_strided_slice %2 {offsets = [0, 9], sizes = [4, 1], strides = [1, 1]} : vector<4x36xf32> to vector<4x1xf32>
    %439 = vector.shape_cast %438 : vector<4x1xf32> to vector<1x4x1xf32>
    %440 = vector.extract_strided_slice %430 {offsets = [0, 1, 0], sizes = [2, 1, 256], strides = [1, 1, 1]} : vector<2x4x256xf32> to vector<2x1x256xf32>
    %441 = vector.broadcast %439 : vector<1x4x1xf32> to vector<2x4x256xf32>
    %442 = vector.broadcast %440 : vector<2x1x256xf32> to vector<2x4x256xf32>
    %443 = arith.mulf %441, %442 : vector<2x4x256xf32>
    %444 = arith.addf %437, %443 : vector<2x4x256xf32>
    %445 = vector.extract_strided_slice %2 {offsets = [0, 10], sizes = [4, 1], strides = [1, 1]} : vector<4x36xf32> to vector<4x1xf32>
    %446 = vector.shape_cast %445 : vector<4x1xf32> to vector<1x4x1xf32>
    %447 = vector.extract_strided_slice %430 {offsets = [0, 2, 0], sizes = [2, 1, 256], strides = [1, 1, 1]} : vector<2x4x256xf32> to vector<2x1x256xf32>
    %448 = vector.broadcast %446 : vector<1x4x1xf32> to vector<2x4x256xf32>
    %449 = vector.broadcast %447 : vector<2x1x256xf32> to vector<2x4x256xf32>
    %450 = arith.mulf %448, %449 : vector<2x4x256xf32>
    %451 = arith.addf %444, %450 : vector<2x4x256xf32>
    %452 = vector.extract_strided_slice %2 {offsets = [0, 11], sizes = [4, 1], strides = [1, 1]} : vector<4x36xf32> to vector<4x1xf32>
    %453 = vector.shape_cast %452 : vector<4x1xf32> to vector<1x4x1xf32>
    %454 = vector.extract_strided_slice %430 {offsets = [0, 3, 0], sizes = [2, 1, 256], strides = [1, 1, 1]} : vector<2x4x256xf32> to vector<2x1x256xf32>
    %455 = vector.broadcast %453 : vector<1x4x1xf32> to vector<2x4x256xf32>
    %456 = vector.broadcast %454 : vector<2x1x256xf32> to vector<2x4x256xf32>
    %457 = arith.mulf %455, %456 : vector<2x4x256xf32>
    %458 = arith.addf %451, %457 : vector<2x4x256xf32>
    %cst_47 = arith.constant 0.000000e+00 : f32
    %459 = vector.broadcast %cst_47 : f32 to vector<2x4x1xf32>
    %460 = vector.extract_strided_slice %356 {offsets = [0, 0, 0], sizes = [2, 4, 255], strides = [1, 1, 1]} : vector<2x4x256xf32> to vector<2x4x255xf32>
    %461 = tpu.concatenate %459, %460 in 2 : vector<2x4x1xf32>, vector<2x4x255xf32> -> vector<2x4x256xf32>
    %cst_48 = arith.constant 0.000000e+00 : f32
    %462 = vector.shape_cast %23 : vector<1x1x256xi1> to vector<1x1x256xi1>
    %463 = vector.broadcast %462 : vector<1x1x256xi1> to vector<2x4x256xi1>
    %464 = vector.broadcast %cst_48 : f32 to vector<2x4x256xf32>
    %465 = arith.select %463, %461, %464 : vector<2x4x256xi1>, vector<2x4x256xf32>
    %466 = vector.extract_strided_slice %2 {offsets = [0, 12], sizes = [4, 1], strides = [1, 1]} : vector<4x36xf32> to vector<4x1xf32>
    %467 = vector.shape_cast %466 : vector<4x1xf32> to vector<1x4x1xf32>
    %468 = vector.extract_strided_slice %465 {offsets = [0, 0, 0], sizes = [2, 1, 256], strides = [1, 1, 1]} : vector<2x4x256xf32> to vector<2x1x256xf32>
    %469 = vector.broadcast %467 : vector<1x4x1xf32> to vector<2x4x256xf32>
    %470 = vector.broadcast %468 : vector<2x1x256xf32> to vector<2x4x256xf32>
    %471 = arith.mulf %469, %470 : vector<2x4x256xf32>
    %472 = arith.addf %458, %471 : vector<2x4x256xf32>
    %473 = vector.extract_strided_slice %2 {offsets = [0, 13], sizes = [4, 1], strides = [1, 1]} : vector<4x36xf32> to vector<4x1xf32>
    %474 = vector.shape_cast %473 : vector<4x1xf32> to vector<1x4x1xf32>
    %475 = vector.extract_strided_slice %465 {offsets = [0, 1, 0], sizes = [2, 1, 256], strides = [1, 1, 1]} : vector<2x4x256xf32> to vector<2x1x256xf32>
    %476 = vector.broadcast %474 : vector<1x4x1xf32> to vector<2x4x256xf32>
    %477 = vector.broadcast %475 : vector<2x1x256xf32> to vector<2x4x256xf32>
    %478 = arith.mulf %476, %477 : vector<2x4x256xf32>
    %479 = arith.addf %472, %478 : vector<2x4x256xf32>
    %480 = vector.extract_strided_slice %2 {offsets = [0, 14], sizes = [4, 1], strides = [1, 1]} : vector<4x36xf32> to vector<4x1xf32>
    %481 = vector.shape_cast %480 : vector<4x1xf32> to vector<1x4x1xf32>
    %482 = vector.extract_strided_slice %465 {offsets = [0, 2, 0], sizes = [2, 1, 256], strides = [1, 1, 1]} : vector<2x4x256xf32> to vector<2x1x256xf32>
    %483 = vector.broadcast %481 : vector<1x4x1xf32> to vector<2x4x256xf32>
    %484 = vector.broadcast %482 : vector<2x1x256xf32> to vector<2x4x256xf32>
    %485 = arith.mulf %483, %484 : vector<2x4x256xf32>
    %486 = arith.addf %479, %485 : vector<2x4x256xf32>
    %487 = vector.extract_strided_slice %2 {offsets = [0, 15], sizes = [4, 1], strides = [1, 1]} : vector<4x36xf32> to vector<4x1xf32>
    %488 = vector.shape_cast %487 : vector<4x1xf32> to vector<1x4x1xf32>
    %489 = vector.extract_strided_slice %465 {offsets = [0, 3, 0], sizes = [2, 1, 256], strides = [1, 1, 1]} : vector<2x4x256xf32> to vector<2x1x256xf32>
    %490 = vector.broadcast %488 : vector<1x4x1xf32> to vector<2x4x256xf32>
    %491 = vector.broadcast %489 : vector<2x1x256xf32> to vector<2x4x256xf32>
    %492 = arith.mulf %490, %491 : vector<2x4x256xf32>
    %493 = arith.addf %486, %492 : vector<2x4x256xf32>
    %494 = vector.extract_strided_slice %2 {offsets = [0, 16], sizes = [4, 1], strides = [1, 1]} : vector<4x36xf32> to vector<4x1xf32>
    %495 = vector.shape_cast %494 : vector<4x1xf32> to vector<1x4x1xf32>
    %496 = vector.extract_strided_slice %356 {offsets = [0, 0, 0], sizes = [2, 1, 256], strides = [1, 1, 1]} : vector<2x4x256xf32> to vector<2x1x256xf32>
    %497 = vector.broadcast %495 : vector<1x4x1xf32> to vector<2x4x256xf32>
    %498 = vector.broadcast %496 : vector<2x1x256xf32> to vector<2x4x256xf32>
    %499 = arith.mulf %497, %498 : vector<2x4x256xf32>
    %500 = arith.addf %493, %499 : vector<2x4x256xf32>
    %501 = vector.extract_strided_slice %2 {offsets = [0, 17], sizes = [4, 1], strides = [1, 1]} : vector<4x36xf32> to vector<4x1xf32>
    %502 = vector.shape_cast %501 : vector<4x1xf32> to vector<1x4x1xf32>
    %503 = vector.extract_strided_slice %356 {offsets = [0, 1, 0], sizes = [2, 1, 256], strides = [1, 1, 1]} : vector<2x4x256xf32> to vector<2x1x256xf32>
    %504 = vector.broadcast %502 : vector<1x4x1xf32> to vector<2x4x256xf32>
    %505 = vector.broadcast %503 : vector<2x1x256xf32> to vector<2x4x256xf32>
    %506 = arith.mulf %504, %505 : vector<2x4x256xf32>
    %507 = arith.addf %500, %506 : vector<2x4x256xf32>
    %508 = vector.extract_strided_slice %2 {offsets = [0, 18], sizes = [4, 1], strides = [1, 1]} : vector<4x36xf32> to vector<4x1xf32>
    %509 = vector.shape_cast %508 : vector<4x1xf32> to vector<1x4x1xf32>
    %510 = vector.extract_strided_slice %356 {offsets = [0, 2, 0], sizes = [2, 1, 256], strides = [1, 1, 1]} : vector<2x4x256xf32> to vector<2x1x256xf32>
    %511 = vector.broadcast %509 : vector<1x4x1xf32> to vector<2x4x256xf32>
    %512 = vector.broadcast %510 : vector<2x1x256xf32> to vector<2x4x256xf32>
    %513 = arith.mulf %511, %512 : vector<2x4x256xf32>
    %514 = arith.addf %507, %513 : vector<2x4x256xf32>
    %515 = vector.extract_strided_slice %2 {offsets = [0, 19], sizes = [4, 1], strides = [1, 1]} : vector<4x36xf32> to vector<4x1xf32>
    %516 = vector.shape_cast %515 : vector<4x1xf32> to vector<1x4x1xf32>
    %517 = vector.extract_strided_slice %356 {offsets = [0, 3, 0], sizes = [2, 1, 256], strides = [1, 1, 1]} : vector<2x4x256xf32> to vector<2x1x256xf32>
    %518 = vector.broadcast %516 : vector<1x4x1xf32> to vector<2x4x256xf32>
    %519 = vector.broadcast %517 : vector<2x1x256xf32> to vector<2x4x256xf32>
    %520 = arith.mulf %518, %519 : vector<2x4x256xf32>
    %521 = arith.addf %514, %520 : vector<2x4x256xf32>
    %cst_49 = arith.constant 0.000000e+00 : f32
    %522 = vector.broadcast %cst_49 : f32 to vector<2x4x1xf32>
    %523 = vector.extract_strided_slice %356 {offsets = [0, 0, 1], sizes = [2, 4, 255], strides = [1, 1, 1]} : vector<2x4x256xf32> to vector<2x4x255xf32>
    %524 = tpu.concatenate %523, %522 in 2 : vector<2x4x255xf32>, vector<2x4x1xf32> -> vector<2x4x256xf32>
    %cst_50 = arith.constant 0.000000e+00 : f32
    %525 = vector.shape_cast %21 : vector<1x1x256xi1> to vector<1x1x256xi1>
    %526 = vector.broadcast %525 : vector<1x1x256xi1> to vector<2x4x256xi1>
    %527 = vector.broadcast %cst_50 : f32 to vector<2x4x256xf32>
    %528 = arith.select %526, %524, %527 : vector<2x4x256xi1>, vector<2x4x256xf32>
    %529 = vector.extract_strided_slice %2 {offsets = [0, 20], sizes = [4, 1], strides = [1, 1]} : vector<4x36xf32> to vector<4x1xf32>
    %530 = vector.shape_cast %529 : vector<4x1xf32> to vector<1x4x1xf32>
    %531 = vector.extract_strided_slice %528 {offsets = [0, 0, 0], sizes = [2, 1, 256], strides = [1, 1, 1]} : vector<2x4x256xf32> to vector<2x1x256xf32>
    %532 = vector.broadcast %530 : vector<1x4x1xf32> to vector<2x4x256xf32>
    %533 = vector.broadcast %531 : vector<2x1x256xf32> to vector<2x4x256xf32>
    %534 = arith.mulf %532, %533 : vector<2x4x256xf32>
    %535 = arith.addf %521, %534 : vector<2x4x256xf32>
    %536 = vector.extract_strided_slice %2 {offsets = [0, 21], sizes = [4, 1], strides = [1, 1]} : vector<4x36xf32> to vector<4x1xf32>
    %537 = vector.shape_cast %536 : vector<4x1xf32> to vector<1x4x1xf32>
    %538 = vector.extract_strided_slice %528 {offsets = [0, 1, 0], sizes = [2, 1, 256], strides = [1, 1, 1]} : vector<2x4x256xf32> to vector<2x1x256xf32>
    %539 = vector.broadcast %537 : vector<1x4x1xf32> to vector<2x4x256xf32>
    %540 = vector.broadcast %538 : vector<2x1x256xf32> to vector<2x4x256xf32>
    %541 = arith.mulf %539, %540 : vector<2x4x256xf32>
    %542 = arith.addf %535, %541 : vector<2x4x256xf32>
    %543 = vector.extract_strided_slice %2 {offsets = [0, 22], sizes = [4, 1], strides = [1, 1]} : vector<4x36xf32> to vector<4x1xf32>
    %544 = vector.shape_cast %543 : vector<4x1xf32> to vector<1x4x1xf32>
    %545 = vector.extract_strided_slice %528 {offsets = [0, 2, 0], sizes = [2, 1, 256], strides = [1, 1, 1]} : vector<2x4x256xf32> to vector<2x1x256xf32>
    %546 = vector.broadcast %544 : vector<1x4x1xf32> to vector<2x4x256xf32>
    %547 = vector.broadcast %545 : vector<2x1x256xf32> to vector<2x4x256xf32>
    %548 = arith.mulf %546, %547 : vector<2x4x256xf32>
    %549 = arith.addf %542, %548 : vector<2x4x256xf32>
    %550 = vector.extract_strided_slice %2 {offsets = [0, 23], sizes = [4, 1], strides = [1, 1]} : vector<4x36xf32> to vector<4x1xf32>
    %551 = vector.shape_cast %550 : vector<4x1xf32> to vector<1x4x1xf32>
    %552 = vector.extract_strided_slice %528 {offsets = [0, 3, 0], sizes = [2, 1, 256], strides = [1, 1, 1]} : vector<2x4x256xf32> to vector<2x1x256xf32>
    %553 = vector.broadcast %551 : vector<1x4x1xf32> to vector<2x4x256xf32>
    %554 = vector.broadcast %552 : vector<2x1x256xf32> to vector<2x4x256xf32>
    %555 = arith.mulf %553, %554 : vector<2x4x256xf32>
    %556 = arith.addf %549, %555 : vector<2x4x256xf32>
    %cst_51 = arith.constant 0.000000e+00 : f32
    %557 = vector.broadcast %cst_51 : f32 to vector<2x4x15xf32>
    %558 = vector.extract_strided_slice %356 {offsets = [0, 0, 15], sizes = [2, 4, 241], strides = [1, 1, 1]} : vector<2x4x256xf32> to vector<2x4x241xf32>
    %559 = tpu.concatenate %558, %557 in 2 : vector<2x4x241xf32>, vector<2x4x15xf32> -> vector<2x4x256xf32>
    %cst_52 = arith.constant 0.000000e+00 : f32
    %560 = vector.shape_cast %23 : vector<1x1x256xi1> to vector<1x1x256xi1>
    %561 = vector.broadcast %560 : vector<1x1x256xi1> to vector<2x4x256xi1>
    %562 = vector.broadcast %cst_52 : f32 to vector<2x4x256xf32>
    %563 = arith.select %561, %559, %562 : vector<2x4x256xi1>, vector<2x4x256xf32>
    %564 = vector.extract_strided_slice %2 {offsets = [0, 24], sizes = [4, 1], strides = [1, 1]} : vector<4x36xf32> to vector<4x1xf32>
    %565 = vector.shape_cast %564 : vector<4x1xf32> to vector<1x4x1xf32>
    %566 = vector.extract_strided_slice %563 {offsets = [0, 0, 0], sizes = [2, 1, 256], strides = [1, 1, 1]} : vector<2x4x256xf32> to vector<2x1x256xf32>
    %567 = vector.broadcast %565 : vector<1x4x1xf32> to vector<2x4x256xf32>
    %568 = vector.broadcast %566 : vector<2x1x256xf32> to vector<2x4x256xf32>
    %569 = arith.mulf %567, %568 : vector<2x4x256xf32>
    %570 = arith.addf %556, %569 : vector<2x4x256xf32>
    %571 = vector.extract_strided_slice %2 {offsets = [0, 25], sizes = [4, 1], strides = [1, 1]} : vector<4x36xf32> to vector<4x1xf32>
    %572 = vector.shape_cast %571 : vector<4x1xf32> to vector<1x4x1xf32>
    %573 = vector.extract_strided_slice %563 {offsets = [0, 1, 0], sizes = [2, 1, 256], strides = [1, 1, 1]} : vector<2x4x256xf32> to vector<2x1x256xf32>
    %574 = vector.broadcast %572 : vector<1x4x1xf32> to vector<2x4x256xf32>
    %575 = vector.broadcast %573 : vector<2x1x256xf32> to vector<2x4x256xf32>
    %576 = arith.mulf %574, %575 : vector<2x4x256xf32>
    %577 = arith.addf %570, %576 : vector<2x4x256xf32>
    %578 = vector.extract_strided_slice %2 {offsets = [0, 26], sizes = [4, 1], strides = [1, 1]} : vector<4x36xf32> to vector<4x1xf32>
    %579 = vector.shape_cast %578 : vector<4x1xf32> to vector<1x4x1xf32>
    %580 = vector.extract_strided_slice %563 {offsets = [0, 2, 0], sizes = [2, 1, 256], strides = [1, 1, 1]} : vector<2x4x256xf32> to vector<2x1x256xf32>
    %581 = vector.broadcast %579 : vector<1x4x1xf32> to vector<2x4x256xf32>
    %582 = vector.broadcast %580 : vector<2x1x256xf32> to vector<2x4x256xf32>
    %583 = arith.mulf %581, %582 : vector<2x4x256xf32>
    %584 = arith.addf %577, %583 : vector<2x4x256xf32>
    %585 = vector.extract_strided_slice %2 {offsets = [0, 27], sizes = [4, 1], strides = [1, 1]} : vector<4x36xf32> to vector<4x1xf32>
    %586 = vector.shape_cast %585 : vector<4x1xf32> to vector<1x4x1xf32>
    %587 = vector.extract_strided_slice %563 {offsets = [0, 3, 0], sizes = [2, 1, 256], strides = [1, 1, 1]} : vector<2x4x256xf32> to vector<2x1x256xf32>
    %588 = vector.broadcast %586 : vector<1x4x1xf32> to vector<2x4x256xf32>
    %589 = vector.broadcast %587 : vector<2x1x256xf32> to vector<2x4x256xf32>
    %590 = arith.mulf %588, %589 : vector<2x4x256xf32>
    %591 = arith.addf %584, %590 : vector<2x4x256xf32>
    %cst_53 = arith.constant 0.000000e+00 : f32
    %592 = vector.broadcast %cst_53 : f32 to vector<2x4x16xf32>
    %593 = vector.extract_strided_slice %356 {offsets = [0, 0, 16], sizes = [2, 4, 240], strides = [1, 1, 1]} : vector<2x4x256xf32> to vector<2x4x240xf32>
    %594 = tpu.concatenate %593, %592 in 2 : vector<2x4x240xf32>, vector<2x4x16xf32> -> vector<2x4x256xf32>
    %595 = vector.extract_strided_slice %2 {offsets = [0, 28], sizes = [4, 1], strides = [1, 1]} : vector<4x36xf32> to vector<4x1xf32>
    %596 = vector.shape_cast %595 : vector<4x1xf32> to vector<1x4x1xf32>
    %597 = vector.extract_strided_slice %594 {offsets = [0, 0, 0], sizes = [2, 1, 256], strides = [1, 1, 1]} : vector<2x4x256xf32> to vector<2x1x256xf32>
    %598 = vector.broadcast %596 : vector<1x4x1xf32> to vector<2x4x256xf32>
    %599 = vector.broadcast %597 : vector<2x1x256xf32> to vector<2x4x256xf32>
    %600 = arith.mulf %598, %599 : vector<2x4x256xf32>
    %601 = arith.addf %591, %600 : vector<2x4x256xf32>
    %602 = vector.extract_strided_slice %2 {offsets = [0, 29], sizes = [4, 1], strides = [1, 1]} : vector<4x36xf32> to vector<4x1xf32>
    %603 = vector.shape_cast %602 : vector<4x1xf32> to vector<1x4x1xf32>
    %604 = vector.extract_strided_slice %594 {offsets = [0, 1, 0], sizes = [2, 1, 256], strides = [1, 1, 1]} : vector<2x4x256xf32> to vector<2x1x256xf32>
    %605 = vector.broadcast %603 : vector<1x4x1xf32> to vector<2x4x256xf32>
    %606 = vector.broadcast %604 : vector<2x1x256xf32> to vector<2x4x256xf32>
    %607 = arith.mulf %605, %606 : vector<2x4x256xf32>
    %608 = arith.addf %601, %607 : vector<2x4x256xf32>
    %609 = vector.extract_strided_slice %2 {offsets = [0, 30], sizes = [4, 1], strides = [1, 1]} : vector<4x36xf32> to vector<4x1xf32>
    %610 = vector.shape_cast %609 : vector<4x1xf32> to vector<1x4x1xf32>
    %611 = vector.extract_strided_slice %594 {offsets = [0, 2, 0], sizes = [2, 1, 256], strides = [1, 1, 1]} : vector<2x4x256xf32> to vector<2x1x256xf32>
    %612 = vector.broadcast %610 : vector<1x4x1xf32> to vector<2x4x256xf32>
    %613 = vector.broadcast %611 : vector<2x1x256xf32> to vector<2x4x256xf32>
    %614 = arith.mulf %612, %613 : vector<2x4x256xf32>
    %615 = arith.addf %608, %614 : vector<2x4x256xf32>
    %616 = vector.extract_strided_slice %2 {offsets = [0, 31], sizes = [4, 1], strides = [1, 1]} : vector<4x36xf32> to vector<4x1xf32>
    %617 = vector.shape_cast %616 : vector<4x1xf32> to vector<1x4x1xf32>
    %618 = vector.extract_strided_slice %594 {offsets = [0, 3, 0], sizes = [2, 1, 256], strides = [1, 1, 1]} : vector<2x4x256xf32> to vector<2x1x256xf32>
    %619 = vector.broadcast %617 : vector<1x4x1xf32> to vector<2x4x256xf32>
    %620 = vector.broadcast %618 : vector<2x1x256xf32> to vector<2x4x256xf32>
    %621 = arith.mulf %619, %620 : vector<2x4x256xf32>
    %622 = arith.addf %615, %621 : vector<2x4x256xf32>
    %cst_54 = arith.constant 0.000000e+00 : f32
    %623 = vector.broadcast %cst_54 : f32 to vector<2x4x17xf32>
    %624 = vector.extract_strided_slice %356 {offsets = [0, 0, 17], sizes = [2, 4, 239], strides = [1, 1, 1]} : vector<2x4x256xf32> to vector<2x4x239xf32>
    %625 = tpu.concatenate %624, %623 in 2 : vector<2x4x239xf32>, vector<2x4x17xf32> -> vector<2x4x256xf32>
    %cst_55 = arith.constant 0.000000e+00 : f32
    %626 = vector.shape_cast %21 : vector<1x1x256xi1> to vector<1x1x256xi1>
    %627 = vector.broadcast %626 : vector<1x1x256xi1> to vector<2x4x256xi1>
    %628 = vector.broadcast %cst_55 : f32 to vector<2x4x256xf32>
    %629 = arith.select %627, %625, %628 : vector<2x4x256xi1>, vector<2x4x256xf32>
    %630 = vector.extract_strided_slice %2 {offsets = [0, 32], sizes = [4, 1], strides = [1, 1]} : vector<4x36xf32> to vector<4x1xf32>
    %631 = vector.shape_cast %630 : vector<4x1xf32> to vector<1x4x1xf32>
    %632 = vector.extract_strided_slice %629 {offsets = [0, 0, 0], sizes = [2, 1, 256], strides = [1, 1, 1]} : vector<2x4x256xf32> to vector<2x1x256xf32>
    %633 = vector.broadcast %631 : vector<1x4x1xf32> to vector<2x4x256xf32>
    %634 = vector.broadcast %632 : vector<2x1x256xf32> to vector<2x4x256xf32>
    %635 = arith.mulf %633, %634 : vector<2x4x256xf32>
    %636 = arith.addf %622, %635 : vector<2x4x256xf32>
    %637 = vector.extract_strided_slice %2 {offsets = [0, 33], sizes = [4, 1], strides = [1, 1]} : vector<4x36xf32> to vector<4x1xf32>
    %638 = vector.shape_cast %637 : vector<4x1xf32> to vector<1x4x1xf32>
    %639 = vector.extract_strided_slice %629 {offsets = [0, 1, 0], sizes = [2, 1, 256], strides = [1, 1, 1]} : vector<2x4x256xf32> to vector<2x1x256xf32>
    %640 = vector.broadcast %638 : vector<1x4x1xf32> to vector<2x4x256xf32>
    %641 = vector.broadcast %639 : vector<2x1x256xf32> to vector<2x4x256xf32>
    %642 = arith.mulf %640, %641 : vector<2x4x256xf32>
    %643 = arith.addf %636, %642 : vector<2x4x256xf32>
    %644 = vector.extract_strided_slice %2 {offsets = [0, 34], sizes = [4, 1], strides = [1, 1]} : vector<4x36xf32> to vector<4x1xf32>
    %645 = vector.shape_cast %644 : vector<4x1xf32> to vector<1x4x1xf32>
    %646 = vector.extract_strided_slice %629 {offsets = [0, 2, 0], sizes = [2, 1, 256], strides = [1, 1, 1]} : vector<2x4x256xf32> to vector<2x1x256xf32>
    %647 = vector.broadcast %645 : vector<1x4x1xf32> to vector<2x4x256xf32>
    %648 = vector.broadcast %646 : vector<2x1x256xf32> to vector<2x4x256xf32>
    %649 = arith.mulf %647, %648 : vector<2x4x256xf32>
    %650 = arith.addf %643, %649 : vector<2x4x256xf32>
    %651 = vector.extract_strided_slice %2 {offsets = [0, 35], sizes = [4, 1], strides = [1, 1]} : vector<4x36xf32> to vector<4x1xf32>
    %652 = vector.shape_cast %651 : vector<4x1xf32> to vector<1x4x1xf32>
    %653 = vector.extract_strided_slice %629 {offsets = [0, 3, 0], sizes = [2, 1, 256], strides = [1, 1, 1]} : vector<2x4x256xf32> to vector<2x1x256xf32>
    %654 = vector.broadcast %652 : vector<1x4x1xf32> to vector<2x4x256xf32>
    %655 = vector.broadcast %653 : vector<2x1x256xf32> to vector<2x4x256xf32>
    %656 = arith.mulf %654, %655 : vector<2x4x256xf32>
    %657 = arith.addf %650, %656 : vector<2x4x256xf32>
    %c0_56 = arith.constant 0 : index
    %c0_57 = arith.constant 0 : index
    %c0_58 = arith.constant 0 : index
    %658 = vector.load %arg6[%c0_56, %c0_57, %c0_58] : memref<1x4x1xf32, #tpu.memory_space<vmem>>, vector<1x4x1xf32>
    %659 = vector.broadcast %658 : vector<1x4x1xf32> to vector<2x4x256xf32>
    %660 = arith.addf %657, %659 : vector<2x4x256xf32>
    %661 = arith.addf %660, %0 : vector<2x4x256xf32>
    %c0_59 = arith.constant 0 : index
    %c0_60 = arith.constant 0 : index
    %c0_61 = arith.constant 0 : index
    %662 = vector.load %arg7[%c0_59, %c0_60, %c0_61] : memref<2x4x256xf32, #tpu.memory_space<vmem>>, vector<2x4x256xf32>
    tpu.vector_store %arg7[%c0_59, %c0_60, %c0_61], %661 {strides = array<i32>} : memref<2x4x256xf32, #tpu.memory_space<vmem>>, vector<2x4x256xf32>,
    return
  }
}

</mosaic_0001>

<bundles_post_ra>
// kernel: tpu_custom_call.1
= control target key start
LH: loop header
LB: loop body
LE: loop exit
PB: predicated region body
PF: predicated region fallthrough
CT: control target
= control target key end

     0   :  { %vm68_vm0 = vcmask 1043456   ;;  %v4493_v6 = vmov 0   ;;  %v2760_v7 = vmov 1   ;;  %s4472_s0 = inlined_call_operand.vmem [shape: f32[2,4,256], index: 0, kind: input, shape index: {}]   ;;  %s4473_s1 = inlined_call_operand.vmem [shape: f32[4,36], index: 1, kind: input, shape index: {}]   ;;  %s4474_s2 = inlined_call_operand.vmem [shape: f32[1,4,1], index: 2, kind: input, shape index: {}]   ;;  %s4475_s3 = inlined_call_operand.vmem [shape: f32[1,4,1], index: 3, kind: input, shape index: {}]   ;;  %s4476_s4 = inlined_call_operand.vmem [shape: f32[1,4,1], index: 4, kind: input, shape index: {}]   ;;  %s4477_s5 = inlined_call_operand.vmem [shape: f32[4,36], index: 5, kind: input, shape index: {}]   ;;  %s4478_s6 = inlined_call_operand.vmem [shape: f32[1,4,1], index: 6, kind: input, shape index: {}]   ;;  %s4479_s7 = inlined_call_operand.hbm [shape: f32[2,4,256], index: 7, kind: output, shape index: {}]  }
   0x1   :  { %v2849_v0 = vld [vmem:[%s4472_s0] sm:$0xff]  ;;  %v2854_v1 = vld [vmem:[%s4472_s0 + $0x8] sm:$0xff]  ;;  %2651 = vset.pattern.permute.xlu0 %v4493_v6  ;;  %2652 = vset.pattern.permute.xlu1 %v2760_v7 }
   0x2   :  { %v2858_v2 = vcombine.high %v2849_v0, %v2849_v0  ;;  %v69_v3 = vsel %vm68_vm0, %v2849_v0, 0.0  ;;  %v82_v4 = vmul.f32 %v2849_v0, %v2849_v0  ;;  %v2866_v5 = vcombine.high %v2854_v1, %v2854_v1 }
   0x3   :  { %v74_v8 = vsel %vm68_vm0, %v2854_v1, 0.0  ;;  %v83_v9 = vmul.f32 %v2854_v1, %v2854_v1 }
   0x4   :  { %4515 = vst [vmem:[#allocation5_spill] sm:$0xff] %v2858_v2  ;;  %4516 = vst [vmem:[#allocation6_spill] sm:$0xff] %v2866_v5  ;;  %v70_v10 = vsel %vm68_vm0, %v2858_v2, 0.0  ;;  %v86_v11 = vcombine.high %v82_v4, %v82_v4  ;;  %v90_v12 = vsel %vm68_vm0, %v82_v4, 0.0  ;;  %v75_v13 = vsel %vm68_vm0, %v2866_v5, 0.0 }
   0x5   :  { %12 = vsyncpa [#allocation3], 0  ;;  %v71_v14 = vadd.f32 %v70_v10, %v69_v3  ;;  %v87_v15 = vcombine.high %v83_v9, %v83_v9  ;;  %v95_v17 = vsel %vm68_vm0, %v83_v9, 0.0  ;;  %v76_v19 = vadd.f32 %v75_v13, %v74_v8  ;;  %s2761_s28 = smov 17   ;;  %v2891_v22 = vld [vmem:[%s4473_s1] sm:$0xf] }
   0x6   :  { %v91_v16 = vsel %vm68_vm0, %v86_v11, 0.0  ;;  %v2762_v23 = vmov 3   ;;  %v4505_v24 = vmov 2   ;;  %s2764_s8 = smov 16   ;;  %v2765_v25 = vmov 4   ;;  %s2768_s1 = smov 15  }
   0x7   :  { %72 = vadd.xlane.f32.xlu0 %v71_v14  ;;  %v92_v18 = vadd.f32 %v91_v16, %v90_v12  ;;  %v96_v20 = vsel %vm68_vm0, %v87_v15, 0.0  ;;  %v4503_v26 = vmov 5   ;;  %v2767_v27 = vmov 7   ;;  %s2772_s9 = smov 1   ;;  %s2778_s10 = smov 127  }
   0x8   :  { %v97_v21 = vadd.f32 %v96_v20, %v95_v17  ;;  %v2769_v28 = vmov 8   ;;  %v4502_v29 = vmov 6   ;;  %v2771_v30 = vmov 11   ;;  %s2781_s11 = smov 113   ;;  %s2787_s12 = smov 112  }
   0x9   :  { %93 = vadd.xlane.f32.xlu1 %v92_v18  ;;  %v4501_v31 = vmov 9   ;;  %v2774_v32 = vmov 12   ;;  %v2775_v33 = vmov 15   ;;  %v2776_v34 = vmov 18   ;;  %s2792_s13 = smov 111   ;;  %s2803_s27 = smov [#allocation2]  }
   0xa   :  { %v4500_v35 = vmov 10   ;;  %v2779_v36 = vmov 21   ;;  %v4499_v37 = vmov 13   ;;  %v4490_v38 = vmov 24   ;;  %v2994_v50 = vld [vmem:[%s4477_s5] sm:$0xf] }
   0xb   :  { %77 = vadd.xlane.f32.xlu0 %v76_v19  ;;  %v4498_v39 = vmov 14   ;;  %v4497_v40 = vmov 16   ;;  %v4489_v41 = vmov 27   ;;  %v4496_v42 = vmov 17  }
   0xc   :  { %v4483_v43 = vmov 28   ;;  %v4495_v44 = vmov 19   ;;  %v4482_v45 = vmov 31   ;;  %v4492_v46 = vmov 20  }
   0xd   :  { %98 = vadd.xlane.f32.xlu1 %v97_v21  ;;  %v4481_v47 = vmov 32   ;;  %v4480_v48 = vmov 35   ;;  %v2795_v49 = vmov 22   ;;  %v4491_v51 = vmov 23  }
   0xe   :  { %v2797_v53 = vmov 25   ;;  %v4488_v58 = vmov 26   ;;  %v4487_v63 = vmov 29   ;;  %v4486_v18 = vmov 30  }
   0xf   :  { %v31_v21 = vlaneseq  ;;  %vm124_vm2 = vcmask 138240   ;;  %vm262_vm4 = vcmask 130048   ;;  %vm391_vm5 = vcmask 121856  }
  0x10   :  { %vm528_vm8 = vcmask 7168   ;;  %vm853_vm9 = vcmask 1039360   ;;  %vm986_vm10 = vcmask 924672   ;;  %vm1119_vm11 = vcmask 916480  }
  0x11   :  { %vm1248_vm12 = vcmask 908288  }
  0x1e   :  { %118 = vrot.lane.b32.xlu1 %v2858_v2, %s2761_s28 }
  0x21   :  { %116 = vrot.lane.b32.xlu0 %v2849_v0, %s2761_s28 }
  0x22   :  { %120 = vrot.lane.b32.xlu1 %v2854_v1, %s2761_s28 }
  0x25   :  { %143 = vperm.xlu0 %2651, %v2891_v22  }
  0x26   :  { %122 = vrot.lane.b32.xlu1 %v2866_v5, %s2761_s28 }
  0x29   :  { %2654 = vset.pattern.permute.xlu0 %v2762_v23 }
  0x2a   :  { %171 = vperm.xlu1 %2652, %v2891_v22   ;;  %227 = vperm.xlu0 %2654, %v2891_v22  }
  0x2e   :  { %2653 = vset.pattern.permute.xlu1 %v4505_v24  ;;  %258 = vrot.lane.b32.xlu0 %v2854_v1, %s2764_s8 }
  0x2f   :  { %199 = vperm.xlu1 %2653, %v2891_v22   ;;  %2655 = vset.pattern.permute.xlu0 %v2765_v25 }
  0x32   :  { %272 = vperm.xlu0 %2655, %v2891_v22  }
  0x33   :  { %254 = vrot.lane.b32.xlu1 %v2849_v0, %s2764_s8 }
  0x34   :  { %2656 = vset.pattern.permute.xlu1 %v4503_v26 }
  0x36   :  { %2658 = vset.pattern.permute.xlu0 %v2767_v27 }
  0x37   :  { %256 = vrot.lane.b32.xlu1 %v2858_v2, %s2764_s8  ;;  %356 = vperm.xlu0 %2658, %v2891_v22  }
  0x3b   :  { %260 = vrot.lane.b32.xlu1 %v2866_v5, %s2764_s8  ;;  %387 = vrot.lane.b32.xlu0 %v2854_v1, %s2768_s1 }
  0x3c   :  { %2659 = vset.pattern.permute.xlu0 %v2769_v28 }
  0x3f   :  { %300 = vperm.xlu1 %2656, %v2891_v22   ;;  %409 = vperm.xlu0 %2659, %v2891_v22  }
  0x43   :  { %2657 = vset.pattern.permute.xlu1 %v4502_v29  ;;  %2662 = vset.pattern.permute.xlu0 %v2771_v30 }
  0x44   :  { %328 = vperm.xlu1 %2657, %v2891_v22   ;;  %493 = vperm.xlu0 %2662, %v2891_v22  }
  0x48   :  { %383 = vrot.lane.b32.xlu1 %v2849_v0, %s2768_s1  ;;  %524 = vrot.lane.b32.xlu0 %v2854_v1, %s2772_s9 }
  0x49   :  { %2660 = vset.pattern.permute.xlu1 %v4501_v31  ;;  %2663 = vset.pattern.permute.xlu0 %v2774_v32 }
  0x4c   :  { %385 = vrot.lane.b32.xlu1 %v2858_v2, %s2768_s1  ;;  %542 = vperm.xlu0 %2663, %v2891_v22  }
  0x50   :  { %389 = vrot.lane.b32.xlu1 %v2866_v5, %s2768_s1  ;;  %2666 = vset.pattern.permute.xlu0 %v2775_v33 }
  0x51   :  { %626 = vperm.xlu0 %2666, %v2891_v22  }
  0x54   :  { %437 = vperm.xlu1 %2660, %v2891_v22  }
  0x55   :  { %2669 = vset.pattern.permute.xlu0 %v2776_v34 }
  0x56   :  { %750 = vperm.xlu0 %2669, %v2891_v22  }
  0x58   :  { %2661 = vset.pattern.permute.xlu1 %v4500_v35 }
  0x59   :  { %465 = vperm.xlu1 %2661, %v2891_v22  }
  0x5a   :  { %847 = vrot.lane.b32.xlu0 %v2858_v2, %s2778_s10 }
  0x5b   :  { %2672 = vset.pattern.permute.xlu0 %v2779_v36 }
  0x5d   :  { %520 = vrot.lane.b32.xlu1 %v2849_v0, %s2772_s9 }
  0x5e   :  { %2664 = vset.pattern.permute.xlu1 %v4499_v37  ;;  %851 = vrot.lane.b32.xlu0 %v2866_v5, %s2778_s10 }
  0x61   :  { %522 = vrot.lane.b32.xlu1 %v2858_v2, %s2772_s9 }
  0x62   :  { %895 = vperm.xlu0 %2672, %v2891_v22  }
  0x65   :  { %526 = vrot.lane.b32.xlu1 %v2866_v5, %s2772_s9 }
  0x66   :  { %978 = vrot.lane.b32.xlu0 %v2849_v0, %s2781_s11 }
  0x67   :  { %2675 = vset.pattern.permute.xlu0 %v4490_v38 }
  0x69   :  { %570 = vperm.xlu1 %2664, %v2891_v22  }
  0x6a   :  { %982 = vrot.lane.b32.xlu0 %v2854_v1, %s2781_s11 }
  0x6d   :  { %2665 = vset.pattern.permute.xlu1 %v4498_v39 }
  0x6e   :  { %598 = vperm.xlu1 %2665, %v2891_v22   ;;  %1000 = vperm.xlu0 %2675, %v2891_v22  }
  0x72   :  { %2667 = vset.pattern.permute.xlu1 %v4497_v40  ;;  %2678 = vset.pattern.permute.xlu0 %v4489_v41 }
  0x73   :  { %654 = vperm.xlu1 %2667, %v2891_v22   ;;  %1084 = vperm.xlu0 %2678, %v2891_v22  }
  0x77   :  { %2668 = vset.pattern.permute.xlu1 %v4496_v42  ;;  %1115 = vrot.lane.b32.xlu0 %v2854_v1, %s2787_s12 }
  0x78   :  { %702 = vperm.xlu1 %2668, %v2891_v22   ;;  %2679 = vset.pattern.permute.xlu0 %v4483_v43 }
  0x7b   :  { %1129 = vperm.xlu0 %2679, %v2891_v22  }
  0x7c   :  { %2670 = vset.pattern.permute.xlu1 %v4495_v44 }
  0x7d   :  { %798 = vperm.xlu1 %2670, %v2891_v22  }
  0x7f   :  { %2682 = vset.pattern.permute.xlu0 %v4482_v45 }
  0x80   :  { %1213 = vperm.xlu0 %2682, %v2891_v22  }
  0x81   :  { %845 = vrot.lane.b32.xlu1 %v2849_v0, %s2778_s10 }
  0x82   :  { %2671 = vset.pattern.permute.xlu1 %v4492_v46 }
  0x84   :  { %1244 = vrot.lane.b32.xlu0 %v2854_v1, %s2792_s13 }
  0x85   :  { %849 = vrot.lane.b32.xlu1 %v2854_v1, %s2778_s10  ;;  %2683 = vset.pattern.permute.xlu0 %v4481_v47 }
  0x88   :  { %1262 = vperm.xlu0 %2683, %v2891_v22  }
  0x89   :  { %867 = vperm.xlu1 %2671, %v2891_v22  }
  0x8c   :  { %2686 = vset.pattern.permute.xlu0 %v4480_v48 }
  0x8d   :  { %2673 = vset.pattern.permute.xlu1 %v2795_v49  ;;  %1346 = vperm.xlu0 %2686, %v2891_v22  }
  0x8e   :  { %923 = vperm.xlu1 %2673, %v2891_v22  }
  0x91   :  { %2688 = vset.pattern.permute.xlu0 %v4493_v6 }
  0x92   :  { %2674 = vset.pattern.permute.xlu1 %v4491_v51  ;;  %1425 = vperm.xlu0 %2688, %v2994_v50  }
  0x93   :  { %951 = vperm.xlu1 %2674, %v2891_v22  }
  0x94   :  { %v73_v56 = vpop.xlane.xlu0 %72 }
  0x95   :  { %v79_v61 = vsel %vm68_vm0, %v73_v56, 0.0  ;;  %v107_v56 = vld [vmem:[%s4475_s3] sm:$0xf] }
  0x96   :  { %v94_v52 = vpop.xlane.xlu1 %93  ;;  %2691 = vset.pattern.permute.xlu0 %v2762_v23 }
  0x97   :  { %980 = vrot.lane.b32.xlu1 %v2858_v2, %s2781_s11  ;;  %1509 = vperm.xlu0 %2691, %v2994_v50   ;;  %v100_v10 = vsel %vm68_vm0, %v94_v52, 0.0 }
  0x98   :  { %2676 = vset.pattern.permute.xlu1 %v2797_v53  ;;  %v78_v59 = vpop.xlane.xlu0 %77 }
  0x99   :  { %v80_v62 = vsel %vm68_vm0, %v78_v59, 0.0 }
  0x9a   :  { %v99_v54 = vpop.xlane.xlu1 %98  ;;  %v81_v4 = vadd.f32 %v80_v62, %v79_v61 }
  0x9b   :  { %984 = vrot.lane.b32.xlu1 %v2866_v5, %s2781_s11  ;;  %2692 = vset.pattern.permute.xlu0 %v2765_v25  ;;  %v101_v8 = vsel %vm68_vm0, %v99_v54, 0.0  ;;  %v4485_v25 = vmov 33  }
  0x9c   :  { %1553 = vperm.xlu0 %2692, %v2994_v50   ;;  %v3038_v11 = vmul.f32 0.001953125, %v81_v4  ;;  %v102_v12 = vadd.f32 %v101_v8, %v100_v10  ;;  %v4484_v8 = vmov 34  }
  0x9e   :  { %v3009_v55 = vpop.permute.xlu1 %118  ;;  %v105_v14 = vmul.f32 %v3038_v11, %v3038_v11  ;;  %v104_v15 = vmul.f32 0.001953125, %v102_v12 }
  0x9f   :  { %1028 = vperm.xlu1 %2676, %v2891_v22  }
  0xa0   :  { %2695 = vset.pattern.permute.xlu0 %v2767_v27  ;;  %v106_v17 = vsub.f32 %v104_v15, %v105_v14  ;;  %v117_v27 = vpop.permute.xlu0 %116  ;;  %v111_v15 = vld [vmem:[%s4474_s2] sm:$0xf] }
  0xa1   :  { %1637 = vperm.xlu0 %2695, %v2994_v50  }
  0xa2   :  { %v3014_v57 = vpop.permute.xlu1 %120  ;;  %v108_v20 = vadd.f32 1e-05, %v106_v17  ;;  %v112_v17 = vld [vmem:[%s4476_s4] sm:$0xf] }
  0xa3   :  { %2677 = vset.pattern.permute.xlu1 %v4488_v58  ;;  %v132_v45 = vsel %vm124_vm2, 0.0, %v3014_v57  ;;  %v113_v58 = vadd.f32 %v112_v17, %v111_v15  ;;  %v125_v15 = vsel %vm124_vm2, %v117_v27, %v3009_v55 }
  0xa4   :  { %1056 = vperm.xlu1 %2677, %v2891_v22   ;;  %2728 = vrsqrt.f32 %v108_v20 }
  0xa5   :  { %2696 = vset.pattern.permute.xlu0 %v2769_v28  ;;  %v3065_v28 = vand.u32 127, %v31_v21 }
  0xa6   :  { %v3019_v60 = vpop.permute.xlu1 %122  ;;  %1685 = vperm.xlu0 %2696, %v2994_v50  }
  0xa7   :  { %v4506_v59 = vand.u32 15, %v3065_v28 }
  0xa8   :  { %1111 = vrot.lane.b32.xlu1 %v2849_v0, %s2787_s12 }
  0xa9   :  { %2680 = vset.pattern.permute.xlu1 %v4487_v63  ;;  %vm3125_vm3 = vcmp.gt.s32.totalorder %v4506_v59, 0 }
  0xaa   :  { %v3027_v3 = vpop.permute.xlu1 %171  ;;  %2699 = vset.pattern.permute.xlu0 %v2771_v30 }
  0xab   :  { %1769 = vperm.xlu0 %2699, %v2994_v50  }
  0xac   :  { %1113 = vrot.lane.b32.xlu1 %v2858_v2, %s2787_s12 }
  0xae   :  { %v3034_v9 = vpop.permute.xlu1 %199  ;;  %v2729_v54 = vpop.eup %2728 }
  0xaf   :  { %2700 = vset.pattern.permute.xlu0 %v2774_v32  ;;  %v3071_v32 = vpop.permute.xlu0 %143  ;;  %v110_v10 = vmul.f32 %v2729_v54, %v107_v56 }
  0xb0   :  { %1117 = vrot.lane.b32.xlu1 %v2866_v5, %s2787_s12  ;;  %1817 = vperm.xlu0 %2700, %v2994_v50  }
  0xb1   :  { %v114_v41 = vmul.f32 %v110_v10, %v3038_v11  ;;  %v139_v11 = vsel %vm3125_vm3, %v132_v45, 0.0 }
  0xb2   :  { %v3043_v13 = vpop.permute.xlu1 %254 }
  0xb4   :  { %1157 = vperm.xlu1 %2680, %v2891_v22   ;;  %2703 = vset.pattern.permute.xlu0 %v2775_v33  ;;  %v3075_v33 = vadd.s32 128, %v3065_v28 }
  0xb5   :  { %1901 = vperm.xlu0 %2703, %v2994_v50  }
  0xb6   :  { %v3049_v16 = vpop.permute.xlu1 %256  ;;  %v4504_v52 = vand.u32 15, %v3075_v33 }
  0xb8   :  { %2681 = vset.pattern.permute.xlu1 %v4486_v18  ;;  %vm3101_vm1 = vcmp.gt.s32.totalorder %v4504_v52, 0 }
  0xb9   :  { %1185 = vperm.xlu1 %2681, %v2891_v22   ;;  %2706 = vset.pattern.permute.xlu0 %v2776_v34 }
  0xba   :  { %v3054_v19 = vpop.permute.xlu1 %260  ;;  %1985 = vperm.xlu0 %2706, %v2994_v50  }
  0xbd   :  { %1240 = vrot.lane.b32.xlu1 %v2849_v0, %s2792_s13 }
  0xbe   :  { %v3060_v23 = vpop.permute.xlu1 %300  ;;  %2684 = vset.pattern.permute.xlu1 %v4485_v25  ;;  %2709 = vset.pattern.permute.xlu0 %v2779_v36  ;;  %v3082_v36 = vshrl.u32 %v31_v21, 7 }
  0xbf   :  { %2089 = vperm.xlu0 %2709, %v2994_v50  }
  0xc0   :  { %v663_v62 = vsub.s32 4, %v3082_v36  ;;  %v3097_v4 = vsub.s32 0, %v3082_v36  ;;  %v3107_v12 = vsub.s32 1, %v3082_v36  ;;  %v3110_v14 = vsub.s32 2, %v3082_v36 }
  0xc1   :  { %1242 = vrot.lane.b32.xlu1 %v2858_v2, %s2792_s13  ;;  %v711_v47 = vsub.s32 5, %v3082_v36  ;;  %v3148_v63 = vsub.s32 3, %v3082_v36 }
  0xc2   :  { %v660_v20 = vrot.slane %v2849_v0, %v3097_v4  ;;  %v668_v21 = vrot.slane %v2854_v1, %v3097_v4  ;;  %v3133_v48 = vrot.slane %v2849_v0, %v663_v62  ;;  %v708_v25 = vrot.slane %v2849_v0, %v3107_v12 }
  0xc3   :  { %v3069_v30 = vpop.permute.xlu1 %328  ;;  %2710 = vset.pattern.permute.xlu0 %v2795_v49  ;;  %v3087_v49 = vpop.permute.xlu0 %227  ;;  %v716_v18 = vrot.slane %v2854_v1, %v3107_v12  ;;  %v241_v26 = vrot.slane %v139_v11, %v3148_v63 }
  0xc4   :  { %2117 = vperm.xlu0 %2710, %v2994_v50   ;;  %v3160_v51 = vrot.slane %v660_v20, %v3097_v4  ;;  %v3163_v46 = vrot.slane %v668_v21, %v3097_v4  ;;  %v3182_v55 = vrot.slane %v708_v25, %v3107_v12  ;;  %v115_v21 = vsub.f32 %v113_v58, %v114_v41 }
  0xc5   :  { %1246 = vrot.lane.b32.xlu1 %v2866_v5, %s2792_s13  ;;  %v3185_v45 = vrot.slane %v716_v18, %v3107_v12  ;;  %v157_v25 = vrot.slane %v139_v11, %v3097_v4  ;;  %v185_v18 = vrot.slane %v139_v11, %v3107_v12 }
  0xc7   :  { %v3080_v34 = vpop.permute.xlu1 %383  ;;  %v3138_v43 = vpop.permute.xlu0 %258  ;;  %v192_v39 = vmul.f32 %v185_v18, %v3027_v3  ;;  %v164_v18 = vmul.f32 %v157_v25, %v3071_v32 }
  0xc8   :  { %2713 = vset.pattern.permute.xlu0 %v2797_v53 }
  0xc9   :  { %1290 = vperm.xlu1 %2684, %v2891_v22   ;;  %v196_v25 = vadd.f32 %v192_v39, %v164_v18 }
  0xcb   :  { %v3093_v61 = vpop.permute.xlu1 %385  ;;  %v3201_v20 = vpop.permute.xlu0 %272 }
  0xcd   :  { %2685 = vset.pattern.permute.xlu1 %v4484_v8  ;;  %v3141_v8 = vrot.slane %v2854_v1, %v663_v62  ;;  %v126_v62 = vsel %vm124_vm2, %v3014_v57, %v3019_v60  ;;  %v3175_v57 = vrot.slane %v2854_v1, %v711_v47 }
  0xce   :  { %1318 = vperm.xlu1 %2685, %v2891_v22   ;;  %v131_v22 = vsel %vm124_vm2, 0.0, %v117_v27 }
  0xcf   :  { %v3130_v56 = vpop.permute.xlu1 %389  ;;  %v3153_v38 = vsel %vm3125_vm3, %v131_v22, 0.0  ;;  %v3172_v22 = vrot.slane %v2849_v0, %v711_v47  ;;  %v3193_v47 = vsel %vm3101_vm1, %v126_v62, 0.0  ;;  %v3244_v24 = vpop.permute.xlu0 %356 }
  0xd0   :  { %v149_v27 = vrot.slane %v3153_v38, %v3097_v4  ;;  %v205_v44 = vrot.slane %v3153_v38, %v3110_v14  ;;  %v161_v42 = vrot.slane %v3193_v47, %v3097_v4  ;;  %v189_v40 = vrot.slane %v3193_v47, %v3107_v12 }
  0xd1   :  { %v233_v41 = vrot.slane %v3153_v38, %v3148_v63  ;;  %v217_v60 = vrot.slane %v3193_v47, %v3110_v14 }
  0xd2   :  { %2687 = vset.pattern.permute.xlu1 %v4493_v6  ;;  %v3197_v6 = vsel %vm3101_vm1, %v125_v15, 0.0  ;;  %v213_v15 = vrot.slane %v139_v11, %v3110_v14  ;;  %v162_v58 = vmul.f32 %v149_v27, %v3071_v32  ;;  %v3238_v27 = vsel %vm262_vm4, 0.0, %v3138_v43 }
  0xd3   :  { %v3169_v17 = vpop.permute.xlu1 %437  ;;  %1375 = vperm.xlu1 %2687, %v110_v10   ;;  %v177_v10 = vrot.slane %v3153_v38, %v3107_v12  ;;  %v181_v62 = vrot.slane %v3197_v6, %v3107_v12  ;;  %v153_v35 = vrot.slane %v3197_v6, %v3097_v4  ;;  %v209_v31 = vrot.slane %v3197_v6, %v3110_v14 }
  0xd4   :  { %v220_v29 = vmul.f32 %v213_v15, %v3034_v9  ;;  %v193_v52 = vmul.f32 %v189_v40, %v3027_v3  ;;  %v218_v15 = vmul.f32 %v205_v44, %v3034_v9  ;;  %v221_v39 = vmul.f32 %v217_v60, %v3034_v9 }
  0xd5   :  { %v190_v37 = vmul.f32 %v177_v10, %v3027_v3  ;;  %v191_v38 = vmul.f32 %v181_v62, %v3027_v3  ;;  %v165_v10 = vmul.f32 %v161_v42, %v3071_v32  ;;  %v163_v62 = vmul.f32 %v153_v35, %v3071_v32 }
  0xd6   :  { %v219_v5 = vmul.f32 %v209_v31, %v3034_v9  ;;  %v224_v40 = vadd.f32 %v220_v29, %v196_v25  ;;  %v286_v42 = vrot.slane %v3238_v27, %v3097_v4  ;;  %v3261_v44 = vsel %vm262_vm4, %v3138_v43, %v3054_v19 }
  0xd7   :  { %1388 = vperm.xlu1 %2687, %v115_v21   ;;  %v194_v59 = vadd.f32 %v190_v37, %v162_v58  ;;  %v245_v35 = vrot.slane %v3193_v47, %v3148_v63  ;;  %v246_v31 = vmul.f32 %v233_v41, %v3087_v49  ;;  %v248_v37 = vmul.f32 %v241_v26, %v3087_v49  ;;  %v388_v47 = vpop.permute.xlu0 %387 }
  0xd8   :  { %v3218_v21 = vpop.permute.xlu1 %465  ;;  %v195_v3 = vadd.f32 %v191_v38, %v163_v62  ;;  %v4521_v32 = vand.u32 15, %v3065_v28  ;;  %v197_v9 = vadd.f32 %v193_v52, %v165_v10  ;;  %v3278_v19 = vsel %vm262_vm4, %v3043_v13, %v3049_v16 }
  0xd9   :  { %v222_v60 = vadd.f32 %v218_v15, %v194_v59  ;;  %v4524_v26 = vmov 2   ;;  %v237_v28 = vrot.slane %v3197_v6, %v3148_v63  ;;  %v290_v52 = vrot.slane %v3261_v44, %v3097_v4 }
  0xda   :  { %vm3269_vm6 = vcmp.lt.s32.totalorder %v4521_v32, 15  ;;  %v223_v58 = vadd.f32 %v219_v5, %v195_v3  ;;  %v4525_v59 = vand.u32 15, %v3075_v33  ;;  %v225_v38 = vadd.f32 %v221_v39, %v197_v9 }
  0xdb   :  { %2689 = vset.pattern.permute.xlu1 %v2760_v7  ;;  %v3253_v7 = vsel %vm262_vm4, 0.0, %v3043_v13  ;;  %v4528_v13 = vsub.s32 6, %v3082_v36  ;;  %v252_v10 = vadd.f32 %v248_v37, %v224_v40  ;;  %v293_v5 = vmul.f32 %v286_v42, %v3201_v20 }
  0xdc   :  { %v3246_v11 = vpop.permute.xlu1 %520  ;;  %1453 = vperm.xlu1 %2689, %v2994_v50   ;;  %v278_v43 = vrot.slane %v3253_v7, %v3097_v4  ;;  %vm3289_vm7 = vcmp.lt.s32.totalorder %v4525_v59, 15  ;;  %v247_v33 = vmul.f32 %v237_v28, %v3087_v49  ;;  %v249_v25 = vmul.f32 %v245_v35, %v3087_v49 }
  0xdd   :  { %v3297_v16 = vrot.slane %v2849_v0, %v4528_v13  ;;  %v370_v15 = vrot.slane %v3238_v27, %v3148_v63  ;;  %v282_v62 = vrot.slane %v3278_v19, %v3097_v4  ;;  %v314_v3 = vrot.slane %v3238_v27, %v3107_v12 }
  0xde   :  { %v342_v39 = vrot.slane %v3238_v27, %v3110_v14  ;;  %v250_v40 = vadd.f32 %v246_v31, %v222_v60  ;;  %v291_v42 = vmul.f32 %v278_v43, %v3201_v20  ;;  %v306_v49 = vrot.slane %v3253_v7, %v3107_v12  ;;  %v3325_v43 = vpop.permute.xlu0 %409 }
  0xdf   :  { %v251_v35 = vadd.f32 %v247_v33, %v223_v58  ;;  %v294_v32 = vmul.f32 %v290_v52, %v3201_v20  ;;  %v318_v9 = vrot.slane %v3261_v44, %v3107_v12  ;;  %v334_v28 = vrot.slane %v3253_v7, %v3110_v14 }
  0xe0   :  { %v3280_v41 = vpop.permute.xlu1 %522  ;;  %2690 = vset.pattern.permute.xlu1 %v4524_v26  ;;  %v4529_v26 = vmov 5   ;;  %v362_v27 = vrot.slane %v3253_v7, %v3148_v63  ;;  %v297_v31 = vadd.f32 %v293_v5, %v252_v10  ;;  %v253_v60 = vadd.f32 %v249_v25, %v225_v38 }
  0xe1   :  { %1481 = vperm.xlu1 %2690, %v2994_v50   ;;  %v292_v58 = vmul.f32 %v282_v62, %v3201_v20  ;;  %v377_v52 = vmul.f32 %v370_v15, %v3244_v24  ;;  %v399_v59 = vsel %vm391_vm5, 0.0, %v388_v47  ;;  %v393_v13 = vsel %vm391_vm5, %v388_v47, %v3130_v56 }
  0xe2   :  { %v295_v33 = vadd.f32 %v291_v42, %v250_v40  ;;  %v338_v7 = vrot.slane %v3278_v19, %v3110_v14  ;;  %v321_v38 = vmul.f32 %v314_v3, %v3060_v23  ;;  %v298_v20 = vadd.f32 %v294_v32, %v253_v60 }
  0xe3   :  { %v346_v5 = vrot.slane %v3261_v44, %v3110_v14  ;;  %v319_v25 = vmul.f32 %v306_v49, %v3060_v23  ;;  %v322_v56 = vmul.f32 %v318_v9, %v3060_v23  ;;  %v349_v15 = vmul.f32 %v342_v39, %v3069_v30 }
  0xe4   :  { %v3313_v37 = vpop.permute.xlu1 %526  ;;  %v3348_v62 = vsel %vm3269_vm6, %v399_v59, 0.0  ;;  %v3352_v3 = vsel %vm3289_vm7, %v393_v13, 0.0  ;;  %v4530_v40 = vmov 6   ;;  %v296_v42 = vadd.f32 %v292_v58, %v251_v35  ;;  %v3365_v13 = vpop.permute.xlu0 %493 }
  0xe5   :  { %2693 = vset.pattern.permute.xlu1 %v4529_v26  ;;  %v310_v26 = vrot.slane %v3278_v19, %v3107_v12  ;;  %v366_v49 = vrot.slane %v3278_v19, %v3148_v63  ;;  %v350_v32 = vmul.f32 %v346_v5, %v3069_v30  ;;  %v374_v39 = vrot.slane %v3261_v44, %v3148_v63 }
  0xe6   :  { %1581 = vperm.xlu1 %2693, %v2994_v50   ;;  %v325_v9 = vadd.f32 %v321_v38, %v297_v31  ;;  %v347_v60 = vmul.f32 %v334_v28, %v3069_v30  ;;  %v348_v59 = vmul.f32 %v338_v7, %v3069_v30  ;;  %v323_v35 = vadd.f32 %v319_v25, %v295_v33 }
  0xe7   :  { %v320_v47 = vmul.f32 %v310_v26, %v3060_v23  ;;  %v398_v23 = vsel %vm391_vm5, 0.0, %v3080_v34  ;;  %v326_v58 = vadd.f32 %v322_v56, %v298_v20  ;;  %v423_v19 = vrot.slane %v3348_v62, %v3097_v4 }
  0xe8   :  { %v3338_v10 = vpop.permute.xlu1 %570  ;;  %v427_v26 = vrot.slane %v3352_v3, %v3097_v4  ;;  %v353_v6 = vadd.f32 %v349_v15, %v325_v9  ;;  %v3375_v44 = vsel %vm3269_vm6, %v398_v23, 0.0  ;;  %v392_v30 = vsel %vm391_vm5, %v3080_v34, %v3093_v61  ;;  %v525_v61 = vpop.permute.xlu0 %524 }
  0xe9   :  { %v354_v28 = vadd.f32 %v350_v32, %v326_v58  ;;  %v4531_v31 = vmov 9   ;;  %v4532_v33 = vsub.s32 6, %v3082_v36  ;;  %v807_v20 = vsub.s32 7, %v3082_v36 }
  0xea   :  { %2694 = vset.pattern.permute.xlu1 %v4530_v40  ;;  %v324_v40 = vadd.f32 %v320_v47, %v296_v42  ;;  %v375_v25 = vmul.f32 %v362_v27, %v3244_v24  ;;  %v351_v56 = vadd.f32 %v347_v60, %v323_v35  ;;  %v507_v34 = vrot.slane %v3348_v62, %v3148_v63 }
  0xeb   :  { %1609 = vperm.xlu1 %2694, %v2994_v50   ;;  %v3384_v7 = vrot.slane %v2854_v1, %v4532_v33  ;;  %v378_v15 = vmul.f32 %v374_v39, %v3244_v24  ;;  %v415_v42 = vrot.slane %v3375_v44, %v3097_v4  ;;  %v3398_v32 = vsel %vm3289_vm7, %v392_v30, 0.0 }
  0xec   :  { %v352_v47 = vadd.f32 %v348_v59, %v324_v40  ;;  %v431_v23 = vmul.f32 %v427_v26, %v3325_v43  ;;  %v376_v27 = vmul.f32 %v366_v49, %v3244_v24  ;;  %v451_v9 = vrot.slane %v3348_v62, %v3107_v12 }
  0xed   :  { %v3371_v5 = vpop.permute.xlu1 %598  ;;  %v381_v60 = vadd.f32 %v377_v52, %v353_v6  ;;  %v430_v59 = vmul.f32 %v423_v19, %v3325_v43  ;;  %v382_v39 = vadd.f32 %v378_v15, %v354_v28  ;;  %v479_v58 = vrot.slane %v3348_v62, %v3110_v14 }
  0xee   :  { %v455_v40 = vrot.slane %v3352_v3, %v3107_v12  ;;  %v536_v30 = vsel %vm528_vm8, 0.0, %v525_v61  ;;  %v380_v26 = vadd.f32 %v376_v27, %v352_v47  ;;  %v419_v24 = vrot.slane %v3398_v32, %v3097_v4 }
  0xef   :  { %2697 = vset.pattern.permute.xlu1 %v4531_v31  ;;  %v379_v31 = vadd.f32 %v375_v25, %v351_v56  ;;  %v3415_v6 = vmul.f32 %v507_v34, %v3365_v13  ;;  %v4533_v52 = vmov 10   ;;  %v443_v49 = vrot.slane %v3375_v44, %v3107_v12 }
  0xf0   :  { %1713 = vperm.xlu1 %2697, %v2994_v50   ;;  %v428_v62 = vmul.f32 %v415_v42, %v3325_v43  ;;  %v435_v19 = vadd.f32 %v431_v23, %v382_v39  ;;  %v530_v28 = vsel %vm528_vm8, %v525_v61, %v3313_v37  ;;  %v471_v33 = vrot.slane %v3375_v44, %v3110_v14  ;;  %v543_v42 = vpop.permute.xlu0 %542 }
  0xf1   :  { %v434_v25 = vadd.f32 %v430_v59, %v381_v60  ;;  %v499_v56 = vrot.slane %v3375_v44, %v3148_v63  ;;  %v3430_v47 = vsel %vm3125_vm3, %v536_v30, 0.0  ;;  %v447_v34 = vrot.slane %v3398_v32, %v3107_v12 }
  0xf2   :  { %v3405_v35 = vpop.permute.xlu1 %654  ;;  %v483_v15 = vrot.slane %v3352_v3, %v3110_v14  ;;  %v459_v37 = vmul.f32 %v455_v40, %v3169_v17  ;;  %v535_v61 = vsel %vm528_vm8, 0.0, %v3246_v11  ;;  %v429_v44 = vmul.f32 %v419_v24, %v3325_v43 }
  0xf3   :  { %v458_v27 = vmul.f32 %v451_v9, %v3169_v17  ;;  %v529_v60 = vsel %vm528_vm8, %v3246_v11, %v3280_v41  ;;  %v3448_v59 = vsel %vm3101_vm1, %v530_v28, 0.0  ;;  %v432_v39 = vadd.f32 %v428_v62, %v379_v31 }
  0xf4   :  { %2698 = vset.pattern.permute.xlu1 %v4533_v52  ;;  %v456_v40 = vmul.f32 %v443_v49, %v3169_v17  ;;  %v463_v30 = vadd.f32 %v459_v37, %v435_v19  ;;  %v487_v52 = vmul.f32 %v483_v15, %v3218_v21  ;;  %v4534_v38 = vmov 13   ;;  %v3479_v37 = vpop.permute.xlu0 %626 }
  0xf5   :  { %1741 = vperm.xlu1 %2698, %v2994_v50   ;;  %v475_v43 = vrot.slane %v3398_v32, %v3110_v14  ;;  %v457_v9 = vmul.f32 %v447_v34, %v3169_v17  ;;  %v486_v24 = vmul.f32 %v479_v58, %v3218_v21  ;;  %v3459_v11 = vsel %vm3125_vm3, %v535_v61, 0.0 }
  0xf6   :  { %v511_v41 = vrot.slane %v3352_v3, %v3148_v63  ;;  %v484_v31 = vmul.f32 %v471_v33, %v3218_v21  ;;  %v560_v17 = vrot.slane %v3448_v59, %v3097_v4  ;;  %v433_v49 = vadd.f32 %v429_v44, %v380_v26 }
  0xf7   :  { %v3439_v23 = vpop.permute.xlu1 %702  ;;  %v462_v58 = vadd.f32 %v458_v27, %v434_v25  ;;  %v485_v62 = vmul.f32 %v475_v43, %v3218_v21  ;;  %v556_v19 = vrot.slane %v3430_v47, %v3097_v4  ;;  %v512_v3 = vmul.f32 %v499_v56, %v3365_v13 }
  0xf8   :  { %v460_v34 = vadd.f32 %v456_v40, %v432_v39  ;;  %v491_v33 = vadd.f32 %v487_v52, %v463_v30  ;;  %v548_v15 = vrot.slane %v3459_v11, %v3097_v4  ;;  %v503_v26 = vrot.slane %v3398_v32, %v3148_v63 }
  0xf9   :  { %2701 = vset.pattern.permute.xlu1 %v4534_v38  ;;  %v3467_v38 = vsel %vm3101_vm1, %v529_v60, 0.0  ;;  %v461_v25 = vadd.f32 %v457_v9, %v433_v49  ;;  %v490_v61 = vadd.f32 %v486_v24, %v462_v58  ;;  %v4535_v44 = vmov 14  }
  0xfa   :  { %1845 = vperm.xlu1 %2701, %v2994_v50   ;;  %v552_v21 = vrot.slane %v3467_v38, %v3097_v4  ;;  %v515_v27 = vmul.f32 %v511_v41, %v3365_v13  ;;  %v488_v56 = vadd.f32 %v484_v31, %v460_v34  ;;  %v584_v60 = vrot.slane %v3430_v47, %v3107_v12 }
  0xfb   :  { %v564_v39 = vmul.f32 %v560_v17, %v543_v42  ;;  %v489_v40 = vadd.f32 %v485_v62, %v461_v25  ;;  %v612_v32 = vrot.slane %v3430_v47, %v3110_v14  ;;  %v640_v30 = vrot.slane %v3430_v47, %v3148_v63  ;;  %v3500_v17 = vpop.permute.xlu0 %750 }
  0xfc   :  { %v3474_v28 = vpop.permute.xlu1 %798  ;;  %v563_v52 = vmul.f32 %v556_v19, %v543_v42  ;;  %v519_v9 = vadd.f32 %v515_v27, %v491_v33  ;;  %v576_v24 = vrot.slane %v3459_v11, %v3107_v12  ;;  %v561_v41 = vmul.f32 %v548_v15, %v543_v42 }
  0xfd   :  { %v588_v31 = vrot.slane %v3448_v59, %v3107_v12  ;;  %v513_v49 = vmul.f32 %v503_v26, %v3365_v13  ;;  %v518_v58 = vadd.f32 %v3415_v6, %v490_v61  ;;  %v562_v62 = vmul.f32 %v552_v21, %v543_v42 }
  0xfe   :  { %2702 = vset.pattern.permute.xlu1 %v4535_v44  ;;  %v580_v47 = vrot.slane %v3467_v38, %v3107_v12  ;;  %v604_v19 = vrot.slane %v3459_v11, %v3110_v14  ;;  %v516_v34 = vadd.f32 %v512_v3, %v488_v56  ;;  %v568_v33 = vadd.f32 %v564_v39, %v519_v9 }
  0xff   :  { %1873 = vperm.xlu1 %2702, %v2994_v50   ;;  %v589_v15 = vmul.f32 %v576_v24, %v3338_v10  ;;  %v4536_v25 = vmov 16   ;;  %v517_v44 = vadd.f32 %v513_v49, %v489_v40  ;;  %v608_v27 = vrot.slane %v3467_v38, %v3110_v14 }
 0x100   :  { %v3494_v43 = vpop.permute.xlu1 %845  ;;  %v590_v13 = vmul.f32 %v580_v47, %v3338_v10  ;;  %v591_v6 = vmul.f32 %v584_v60, %v3338_v10  ;;  %v565_v26 = vadd.f32 %v561_v41, %v516_v34  ;;  %v616_v3 = vrot.slane %v3448_v59, %v3110_v14  ;;  %v848_v47 = vpop.permute.xlu0 %847 }
 0x101   :  { %v592_v61 = vmul.f32 %v588_v31, %v3338_v10  ;;  %v617_v21 = vmul.f32 %v604_v19, %v3371_v5  ;;  %v567_v56 = vadd.f32 %v563_v52, %v518_v58  ;;  %v566_v39 = vadd.f32 %v562_v62, %v517_v44  ;;  %v3531_v52 = vld [vmem:[%s4472_s0] sm:$0xff] }
 0x102   :  { %v618_v40 = vmul.f32 %v608_v27, %v3371_v5  ;;  %v619_v9 = vmul.f32 %v612_v32, %v3371_v5  ;;  %v632_v60 = vrot.slane %v3459_v11, %v3148_v63  ;;  %v593_v24 = vadd.f32 %v589_v15, %v565_v26 }
 0x103   :  { %2704 = vset.pattern.permute.xlu1 %v4536_v25  ;;  %v596_v49 = vadd.f32 %v592_v61, %v568_v33  ;;  %v620_v41 = vmul.f32 %v616_v3, %v3371_v5  ;;  %v636_v34 = vrot.slane %v3467_v38, %v3148_v63  ;;  %v594_v10 = vadd.f32 %v590_v13, %v566_v39  ;;  %v3550_v33 = vld [vmem:[%s4472_s0 + $0x8] sm:$0xff] }
 0x104   :  { %v3514_v42 = vpop.permute.xlu1 %849  ;;  %1929 = vperm.xlu1 %2704, %v2994_v50   ;;  %v595_v31 = vadd.f32 %v591_v6, %v567_v56  ;;  %v3536_v32 = vrot.slane %v3531_v52, %v807_v20  ;;  %v4537_v58 = vmov 17   ;;  %v644_v5 = vrot.slane %v3448_v59, %v3148_v63  ;;  %v852_v36 = vpop.permute.xlu0 %851 }
 0x105   :  { %v621_v38 = vadd.f32 %v617_v21, %v593_v24  ;;  %v4538_v62 = vrot.slane %v2849_v0, %v3110_v14  ;;  %v812_v15 = vrot.slane %v3550_v33, %v3148_v63  ;;  %v647_v25 = vmul.f32 %v640_v30, %v3479_v37 }
 0x106   :  { %v622_v44 = vadd.f32 %v618_v40, %v594_v10  ;;  %v623_v59 = vadd.f32 %v619_v9, %v595_v31  ;;  %v780_v27 = vrot.slane %v3297_v16, %v3110_v14  ;;  %v645_v13 = vmul.f32 %v632_v60, %v3479_v37 }
 0x107   :  { %v776_v19 = vrot.slane %v4538_v62, %v3110_v14  ;;  %v624_v6 = vadd.f32 %v620_v41, %v596_v49  ;;  %v4539_v26 = vrot.slane %v2854_v1, %v3110_v14  ;;  %v788_v61 = vrot.slane %v3384_v7, %v3110_v14 }
 0x108   :  { %v3538_v11 = vpop.permute.xlu1 %867  ;;  %2705 = vset.pattern.permute.xlu1 %v4537_v58  ;;  %v646_v21 = vmul.f32 %v636_v34, %v3479_v37  ;;  %v3569_v30 = vrot.slane %v3550_v33, %v807_v20  ;;  %v4540_v16 = vrot.slane %v2849_v0, %v3148_v63  ;;  %v828_v39 = vrot.slane %v3536_v32, %v3148_v63 }
 0x109   :  { %1957 = vperm.xlu1 %2705, %v2994_v50   ;;  %v784_v3 = vrot.slane %v4539_v26, %v3110_v14  ;;  %v648_v1 = vmul.f32 %v644_v5, %v3479_v37  ;;  %v649_v40 = vadd.f32 %v645_v13, %v621_v38  ;;  %v693_v7 = vmul.f32 %v3160_v51, %v3405_v35 }
 0x10a   :  { %v824_v56 = vrot.slane %v4540_v16, %v3148_v63  ;;  %v832_v9 = vrot.slane %v812_v15, %v3148_v63  ;;  %v4541_v20 = vmov 19   ;;  %v650_v24 = vadd.f32 %v646_v21, %v622_v44 }
 0x10b   :  { %v651_v49 = vadd.f32 %v647_v25, %v623_v59  ;;  %v4542_v0 = vrot.slane %v3133_v48, %v3097_v4  ;;  %v652_v37 = vadd.f32 %v648_v1, %v624_v6  ;;  %v695_v51 = vmul.f32 %v3163_v46, %v3405_v35 }
 0x10c   :  { %v4543_v34 = vrot.slane %v3141_v8, %v3097_v4  ;;  %v741_v31 = vmul.f32 %v3182_v55, %v3439_v23  ;;  %v4544_v48 = vrot.slane %v3172_v22, %v3107_v12  ;;  %v836_v58 = vrot.slane %v3569_v30, %v3148_v63 }
 0x10d   :  { %v3581_v60 = vpop.permute.xlu1 %923  ;;  %2707 = vset.pattern.permute.xlu1 %v4541_v20  ;;  %v694_v41 = vmul.f32 %v4542_v0, %v3405_v35  ;;  %v860_v5 = vsel %vm853_vm9, %v848_v47, 0.0  ;;  %v861_v46 = vsel %vm853_vm9, %v852_v36, 0.0  ;;  %v697_v38 = vadd.f32 %v693_v7, %v649_v40 }
 0x10e   :  { %2013 = vperm.xlu1 %2707, %v2994_v50   ;;  %v696_v10 = vmul.f32 %v4543_v34, %v3405_v35  ;;  %v742_v32 = vmul.f32 %v4544_v48, %v3439_v23  ;;  %v743_v8 = vmul.f32 %v3185_v45, %v3439_v23  ;;  %v4545_v55 = vrot.slane %v3175_v57, %v3107_v12 }
 0x10f   :  { %v855_v22 = vsel %vm853_vm9, %v3514_v42, %v852_v36  ;;  %v698_v62 = vadd.f32 %v694_v41, %v650_v24  ;;  %v789_v15 = vmul.f32 %v776_v19, %v3500_v17  ;;  %v790_v25 = vmul.f32 %v780_v27, %v3500_v17 }
 0x110   :  { %v744_v35 = vmul.f32 %v4545_v55, %v3439_v23  ;;  %v854_v44 = vsel %vm853_vm9, %v3494_v43, %v848_v47  ;;  %v4546_v13 = vmov 20   ;;  %v699_v45 = vadd.f32 %v695_v51, %v651_v49  ;;  %v896_v23 = vpop.permute.xlu0 %895 }
 0x111   :  { %v700_v6 = vadd.f32 %v696_v10, %v652_v37  ;;  %v745_v26 = vadd.f32 %v741_v31, %v697_v38  ;;  %v3622_v57 = vsel %vm3289_vm7, %v860_v5, 0.0  ;;  %v746_v42 = vadd.f32 %v742_v32, %v698_v62 }
 0x112   :  { %v3617_v59 = vpop.permute.xlu1 %951  ;;  %2708 = vset.pattern.permute.xlu1 %v4546_v13  ;;  %v791_v19 = vmul.f32 %v784_v3, %v3500_v17  ;;  %v3628_v43 = vsel %vm3289_vm7, %v861_v46, 0.0  ;;  %v3632_v47 = vsel %vm3269_vm6, %v855_v22, 0.0  ;;  %v747_v27 = vadd.f32 %v743_v8, %v699_v45 }
 0x113   :  { %2061 = vperm.xlu1 %2708, %v2994_v50   ;;  %v748_v21 = vadd.f32 %v744_v35, %v700_v6  ;;  %v792_v30 = vmul.f32 %v788_v61, %v3500_v17  ;;  %v3637_v16 = vsel %vm3269_vm6, %v854_v44, 0.0  ;;  %v877_v1 = vrot.slane %v3622_v57, %v3097_v4 }
 0x114   :  { %v905_v3 = vrot.slane %v3622_v57, %v3107_v12  ;;  %v793_v7 = vadd.f32 %v789_v15, %v745_v26  ;;  %v885_v36 = vrot.slane %v3628_v43, %v3097_v4  ;;  %v913_v20 = vrot.slane %v3628_v43, %v3107_v12  ;;  %v979_v61 = vpop.permute.xlu0 %978 }
 0x115   :  { %v881_v17 = vrot.slane %v3632_v47, %v3097_v4  ;;  %v4547_v24 = vmov 23   ;;  %v794_v49 = vadd.f32 %v790_v25, %v746_v42  ;;  %v837_v0 = vmul.f32 %v824_v56, %v3474_v28 }
 0x116   :  { %v981_v40 = vpop.permute.xlu1 %980  ;;  %v838_v41 = vmul.f32 %v828_v39, %v3474_v28  ;;  %v873_v37 = vrot.slane %v3637_v16, %v3097_v4  ;;  %v795_v51 = vadd.f32 %v791_v19, %v747_v27  ;;  %v796_v34 = vadd.f32 %v792_v30, %v748_v21 }
 0x117   :  { %2711 = vset.pattern.permute.xlu1 %v4547_v24  ;;  %v839_v10 = vmul.f32 %v832_v9, %v3474_v28  ;;  %v840_v31 = vmul.f32 %v836_v58, %v3474_v28  ;;  %v933_v48 = vrot.slane %v3622_v57, %v3110_v14  ;;  %v887_v56 = vmul.f32 %v877_v1, %v3538_v11 }
 0x118   :  { %2145 = vperm.xlu1 %2711, %v2994_v50   ;;  %v886_v32 = vmul.f32 %v873_v37, %v3538_v11  ;;  %v961_v5 = vrot.slane %v3622_v57, %v3148_v63  ;;  %v941_v46 = vrot.slane %v3628_v43, %v3110_v14  ;;  %v888_v38 = vmul.f32 %v881_v17, %v3538_v11  ;;  %v983_v44 = vpop.permute.xlu0 %982 }
 0x119   :  { %v889_v9 = vmul.f32 %v885_v36, %v3538_v11  ;;  %v841_v28 = vadd.f32 %v837_v0, %v793_v7  ;;  %v842_v58 = vadd.f32 %v838_v41, %v794_v49  ;;  %v901_v8 = vrot.slane %v3637_v16, %v3107_v12 }
 0x11a   :  { %v985_v39 = vpop.permute.xlu1 %984  ;;  %v915_v55 = vmul.f32 %v905_v3, %v896_v23  ;;  %v4548_v35 = vmov 24   ;;  %v843_v22 = vadd.f32 %v839_v10, %v795_v51  ;;  %v844_v62 = vadd.f32 %v840_v31, %v796_v34 }
 0x11b   :  { %v909_v15 = vrot.slane %v3632_v47, %v3107_v12  ;;  %v917_v25 = vmul.f32 %v913_v20, %v896_v23  ;;  %v890_v13 = vadd.f32 %v886_v32, %v841_v28  ;;  %v891_v45 = vadd.f32 %v887_v56, %v842_v58 }
 0x11c   :  { %2712 = vset.pattern.permute.xlu1 %v4548_v35  ;;  %v988_v11 = vsel %vm986_vm10, %v983_v44, %v985_v39  ;;  %v994_v6 = vsel %vm986_vm10, %v985_v39, 0.0  ;;  %v892_v57 = vadd.f32 %v888_v38, %v843_v22  ;;  %v893_v42 = vadd.f32 %v889_v9, %v844_v62  ;;  %v1001_v41 = vpop.permute.xlu0 %1000 }
 0x11d   :  { %2193 = vperm.xlu1 %2712, %v2994_v50   ;;  %v987_v19 = vsel %vm986_vm10, %v979_v61, %v981_v40  ;;  %v993_v27 = vsel %vm986_vm10, %v981_v40, 0.0  ;;  %v929_v21 = vrot.slane %v3637_v16, %v3110_v14  ;;  %v969_v50 = vrot.slane %v3628_v43, %v3148_v63 }
 0x11e   :  { %v3675_v26 = vpop.permute.xlu1 %1028  ;;  %v937_v30 = vrot.slane %v3632_v47, %v3110_v14  ;;  %v914_v1 = vmul.f32 %v901_v8, %v896_v23  ;;  %v965_v3 = vrot.slane %v3632_v47, %v3148_v63  ;;  %v916_v7 = vmul.f32 %v909_v15, %v896_v23 }
 0x11f   :  { %v3689_v36 = vsel %vm3125_vm3, %v988_v11, 0.0  ;;  %v3693_v40 = vsel %vm3101_vm1, %v994_v6, 0.0  ;;  %v4549_v20 = vmov 27   ;;  %v919_v43 = vadd.f32 %v915_v55, %v891_v45 }
 0x120   :  { %v918_v17 = vadd.f32 %v914_v1, %v890_v13  ;;  %v3698_v61 = vsel %vm3125_vm3, %v987_v19, 0.0  ;;  %v3702_v47 = vsel %vm3101_vm1, %v993_v27, 0.0  ;;  %v920_v23 = vadd.f32 %v916_v7, %v892_v57  ;;  %v1085_v44 = vpop.permute.xlu0 %1084 }
 0x121   :  { %2715 = vset.pattern.permute.xlu1 %v4549_v20  ;;  %v921_v24 = vadd.f32 %v917_v25, %v893_v42  ;;  %v942_v49 = vmul.f32 %v929_v21, %v3581_v60  ;;  %v943_v0 = vmul.f32 %v933_v48, %v3581_v60  ;;  %v944_v51 = vmul.f32 %v937_v30, %v3581_v60 }
 0x122   :  { %v945_v34 = vmul.f32 %v941_v46, %v3581_v60  ;;  %v1014_v10 = vrot.slane %v3689_v36, %v3097_v4  ;;  %v1018_v31 = vrot.slane %v3693_v40, %v3097_v4  ;;  %v957_v32 = vrot.slane %v3637_v16, %v3148_v63 }
 0x123   :  { %v1057_v37 = vpop.permute.xlu1 %1056  ;;  %v1006_v56 = vrot.slane %v3698_v61, %v3097_v4  ;;  %v1010_v48 = vrot.slane %v3702_v47, %v3097_v4  ;;  %v972_v39 = vmul.f32 %v965_v3, %v3617_v59  ;;  %v973_v38 = vmul.f32 %v969_v50, %v3617_v59 }
 0x124   :  { %v946_v60 = vadd.f32 %v942_v49, %v918_v17  ;;  %v947_v46 = vadd.f32 %v943_v0, %v919_v43  ;;  %v970_v9 = vmul.f32 %v957_v32, %v3617_v59  ;;  %v971_v28 = vmul.f32 %v961_v5, %v3617_v59  ;;  %v1116_v17 = vpop.permute.xlu0 %1115 }
 0x125   :  { %v948_v8 = vadd.f32 %v944_v51, %v920_v23  ;;  %v949_v16 = vadd.f32 %v945_v34, %v921_v24  ;;  %v1021_v55 = vmul.f32 %v1014_v10, %v1001_v41  ;;  %v1022_v35 = vmul.f32 %v1018_v31, %v1001_v41 }
 0x126   :  { %v1034_v22 = vrot.slane %v3698_v61, %v3107_v12  ;;  %v1038_v62 = vrot.slane %v3702_v47, %v3107_v12  ;;  %v1019_v15 = vmul.f32 %v1006_v56, %v1001_v41  ;;  %v1020_v25 = vmul.f32 %v1010_v48, %v1001_v41 }
 0x127   :  { %v1112_v58 = vpop.permute.xlu1 %1111  ;;  %v976_v13 = vadd.f32 %v972_v39, %v948_v8  ;;  %v977_v45 = vadd.f32 %v973_v38, %v949_v16  ;;  %v1042_v11 = vrot.slane %v3689_v36, %v3107_v12  ;;  %v1046_v59 = vrot.slane %v3693_v40, %v3107_v12 }
 0x128   :  { %v974_v5 = vadd.f32 %v970_v9, %v946_v60  ;;  %v975_v6 = vadd.f32 %v971_v28, %v947_v46  ;;  %v1047_v57 = vmul.f32 %v1034_v22, %v3675_v26  ;;  %v1048_v42 = vmul.f32 %v1038_v62, %v3675_v26  ;;  %v1130_v28 = vpop.permute.xlu0 %1129 }
 0x129   :  { %v1062_v27 = vrot.slane %v3698_v61, %v3110_v14  ;;  %v1066_v21 = vrot.slane %v3702_v47, %v3110_v14  ;;  %v1025_v50 = vadd.f32 %v1021_v55, %v976_v13  ;;  %v1026_v30 = vadd.f32 %v1022_v35, %v977_v45 }
 0x12a   :  { %v1023_v1 = vadd.f32 %v1019_v15, %v974_v5  ;;  %v1024_v3 = vadd.f32 %v1020_v25, %v975_v6  ;;  %v1090_v7 = vrot.slane %v3698_v61, %v3148_v63  ;;  %v1094_v20 = vrot.slane %v3702_v47, %v3148_v63 }
 0x12b   :  { %v1114_v19 = vpop.permute.xlu1 %1113  ;;  %v1049_v43 = vmul.f32 %v1042_v11, %v3675_v26  ;;  %v1050_v23 = vmul.f32 %v1046_v59, %v3675_v26  ;;  %v1075_v24 = vmul.f32 %v1062_v27, %v1057_v37  ;;  %v1076_v49 = vmul.f32 %v1066_v21, %v1057_v37 }
 0x12c   :  { %v1070_v0 = vrot.slane %v3689_v36, %v3110_v14  ;;  %v1074_v41 = vrot.slane %v3693_v40, %v3110_v14  ;;  %v1051_v51 = vadd.f32 %v1047_v57, %v1023_v1  ;;  %v1052_v34 = vadd.f32 %v1048_v42, %v1024_v3  ;;  %v1214_v1 = vpop.permute.xlu0 %1213 }
 0x12d   :  { %v1053_v61 = vadd.f32 %v1049_v43, %v1025_v50  ;;  %v1054_v31 = vadd.f32 %v1050_v23, %v1026_v30  ;;  %v3753_v48 = vsel %vm1119_vm11, %v1112_v58, %v1114_v19  ;;  %v3756_v39 = vsel %vm1119_vm11, %v1114_v19, 0.0 }
 0x12e   :  { %v1077_v26 = vmul.f32 %v1070_v0, %v1057_v37  ;;  %v1078_v56 = vmul.f32 %v1074_v41, %v1057_v37  ;;  %v1098_v38 = vrot.slane %v3689_v36, %v3148_v63  ;;  %v1102_v60 = vrot.slane %v3693_v40, %v3148_v63 }
 0x12f   :  { %v1118_v10 = vpop.permute.xlu1 %1117  ;;  %v1079_v46 = vadd.f32 %v1075_v24, %v1051_v51  ;;  %v1080_v9 = vadd.f32 %v1076_v49, %v1052_v34  ;;  %v1103_v16 = vmul.f32 %v1090_v7, %v1085_v44  ;;  %v1104_v55 = vmul.f32 %v1094_v20, %v1085_v44 }
 0x130   :  { %v3747_v47 = vsel %vm1119_vm11, %v1116_v17, %v1118_v10  ;;  %v3750_v32 = vsel %vm1119_vm11, %v1118_v10, 0.0  ;;  %v1135_v35 = vrot.slane %v3753_v48, %v3097_v4  ;;  %v1139_v36 = vrot.slane %v3756_v39, %v3097_v4 }
 0x131   :  { %v1143_v8 = vrot.slane %v3747_v47, %v3097_v4  ;;  %v1147_v37 = vrot.slane %v3750_v32, %v3097_v4  ;;  %v1081_v22 = vadd.f32 %v1077_v26, %v1053_v61  ;;  %v1082_v40 = vadd.f32 %v1078_v56, %v1054_v31 }
 0x132   :  { %v1105_v62 = vmul.f32 %v1098_v38, %v1085_v44  ;;  %v1106_v15 = vmul.f32 %v1102_v60, %v1085_v44  ;;  %v1107_v25 = vadd.f32 %v1103_v16, %v1079_v46  ;;  %v1108_v13 = vadd.f32 %v1104_v55, %v1080_v9 }
 0x133   :  { %v1158_v58 = vpop.permute.xlu1 %1157  ;;  %v1150_v45 = vmul.f32 %v1143_v8, %v1130_v28  ;;  %v1151_v11 = vmul.f32 %v1147_v37, %v1130_v28  ;;  %v1171_v59 = vrot.slane %v3747_v47, %v3107_v12  ;;  %v1175_v5 = vrot.slane %v3750_v32, %v3107_v12 }
 0x134   :  { %v1148_v6 = vmul.f32 %v1135_v35, %v1130_v28  ;;  %v1149_v57 = vmul.f32 %v1139_v36, %v1130_v28  ;;  %v1163_v42 = vrot.slane %v3753_v48, %v3107_v12  ;;  %v1167_v19 = vrot.slane %v3756_v39, %v3107_v12  ;;  %v1245_v28 = vpop.permute.xlu0 %1244 }
 0x135   :  { %v1109_v44 = vadd.f32 %v1105_v62, %v1081_v22  ;;  %v1110_v21 = vadd.f32 %v1106_v15, %v1082_v40  ;;  %v1191_v50 = vrot.slane %v3753_v48, %v3110_v14  ;;  %v1195_v30 = vrot.slane %v3756_v39, %v3110_v14 }
 0x136   :  { %v1199_v3 = vrot.slane %v3747_v47, %v3110_v14  ;;  %v1203_v7 = vrot.slane %v3750_v32, %v3110_v14  ;;  %v1176_v20 = vmul.f32 %v1163_v42, %v1158_v58  ;;  %v1177_v17 = vmul.f32 %v1167_v19, %v1158_v58 }
 0x137   :  { %v1154_v43 = vadd.f32 %v1150_v45, %v1109_v44  ;;  %v1155_v23 = vadd.f32 %v1151_v11, %v1110_v21  ;;  %v1178_v24 = vmul.f32 %v1171_v59, %v1158_v58  ;;  %v1179_v49 = vmul.f32 %v1175_v5, %v1158_v58 }
 0x138   :  { %v1186_v27 = vpop.permute.xlu1 %1185  ;;  %v1152_v0 = vadd.f32 %v1148_v6, %v1107_v25  ;;  %v1153_v41 = vadd.f32 %v1149_v57, %v1108_v13  ;;  %v1219_v26 = vrot.slane %v3753_v48, %v3148_v63  ;;  %v1223_v56 = vrot.slane %v3756_v39, %v3148_v63  ;;  %v1263_v5 = vpop.permute.xlu0 %1262 }
 0x139   :  { %v1204_v51 = vmul.f32 %v1191_v50, %v1186_v27  ;;  %v1205_v34 = vmul.f32 %v1195_v30, %v1186_v27  ;;  %v1206_v61 = vmul.f32 %v1199_v3, %v1186_v27  ;;  %v1207_v31 = vmul.f32 %v1203_v7, %v1186_v27 }
 0x13a   :  { %v1180_v38 = vadd.f32 %v1176_v20, %v1152_v0  ;;  %v1181_v60 = vadd.f32 %v1177_v17, %v1153_v41  ;;  %v1227_v46 = vrot.slane %v3747_v47, %v3148_v63  ;;  %v1231_v9 = vrot.slane %v3750_v32, %v3148_v63 }
 0x13b   :  { %v1182_v8 = vadd.f32 %v1178_v24, %v1154_v43  ;;  %v1183_v37 = vadd.f32 %v1179_v49, %v1155_v23  ;;  %v1232_v22 = vmul.f32 %v1219_v26, %v1214_v1  ;;  %v1233_v40 = vmul.f32 %v1223_v56, %v1214_v1 }
 0x13c   :  { %v1241_v10 = vpop.permute.xlu1 %1240  ;;  %v1208_v58 = vadd.f32 %v1204_v51, %v1180_v38  ;;  %v1209_v16 = vadd.f32 %v1205_v34, %v1181_v60  ;;  %v1234_v62 = vmul.f32 %v1227_v46, %v1214_v1  ;;  %v1235_v15 = vmul.f32 %v1231_v9, %v1214_v1 }
 0x13d   :  { %v1210_v35 = vadd.f32 %v1206_v61, %v1182_v8  ;;  %v1211_v36 = vadd.f32 %v1207_v31, %v1183_v37 }
 0x13e   :  { %v1236_v11 = vadd.f32 %v1232_v22, %v1208_v58  ;;  %v1237_v59 = vadd.f32 %v1233_v40, %v1209_v16 }
 0x13f   :  { %v1238_v42 = vadd.f32 %v1234_v62, %v1210_v35  ;;  %v1239_v19 = vadd.f32 %v1235_v15, %v1211_v36  ;;  %v1347_v36 = vpop.permute.xlu0 %1346 }
 0x140   :  { %v1243_v55 = vpop.permute.xlu1 %1242 }
 0x141   :  { %v1249_v48 = vsel %vm1248_vm12, %v1241_v10, %v1243_v55  ;;  %v1255_v39 = vsel %vm1248_vm12, %v1243_v55, 0.0 }
 0x142   :  { %v1257_v47 = vsel %vm3269_vm6, %v1249_v48, 0.0  ;;  %v1258_v32 = vsel %vm3289_vm7, %v1255_v39, 0.0 }
 0x143   :  { %v1268_v25 = vrot.slane %v1257_v47, %v3097_v4  ;;  %v1272_v13 = vrot.slane %v1258_v32, %v3097_v4  ;;  %v1296_v20 = vrot.slane %v1257_v47, %v3107_v12  ;;  %v1300_v17 = vrot.slane %v1258_v32, %v3107_v12 }
 0x144   :  { %v1247_v45 = vpop.permute.xlu1 %1246  ;;  %v1352_v43 = vrot.slane %v1257_v47, %v3148_v63  ;;  %v1356_v23 = vrot.slane %v1258_v32, %v3148_v63  ;;  %v1324_v46 = vrot.slane %v1257_v47, %v3110_v14  ;;  %v1328_v9 = vrot.slane %v1258_v32, %v3110_v14 }
 0x145   :  { %v1250_v6 = vsel %vm1248_vm12, %v1245_v28, %v1247_v45  ;;  %v1256_v57 = vsel %vm1248_vm12, %v1247_v45, 0.0  ;;  %v1281_v27 = vmul.f32 %v1268_v25, %v1263_v5  ;;  %v1282_v44 = vmul.f32 %v1272_v13, %v1263_v5 }
 0x146   :  { %v1259_v21 = vsel %vm3269_vm6, %v1250_v6, 0.0  ;;  %v1260_v50 = vsel %vm3289_vm7, %v1256_v57, 0.0  ;;  %v1365_v62 = vmul.f32 %v1352_v43, %v1347_v36  ;;  %v1366_v15 = vmul.f32 %v1356_v23, %v1347_v36 }
 0x147   :  { %v1276_v30 = vrot.slane %v1259_v21, %v3097_v4  ;;  %v1280_v1 = vrot.slane %v1260_v50, %v3097_v4  ;;  %v1304_v3 = vrot.slane %v1259_v21, %v3107_v12  ;;  %v1308_v7 = vrot.slane %v1260_v50, %v3107_v12 }
 0x148   :  { %v1291_v24 = vpop.permute.xlu1 %1290  ;;  %v1360_v41 = vrot.slane %v1259_v21, %v3148_v63  ;;  %v1364_v51 = vrot.slane %v1260_v50, %v3148_v63  ;;  %v1285_v34 = vadd.f32 %v1281_v27, %v1236_v11  ;;  %v1286_v10 = vadd.f32 %v1282_v44, %v1237_v59 }
 0x149   :  { %v1283_v49 = vmul.f32 %v1276_v30, %v1263_v5  ;;  %v1284_v0 = vmul.f32 %v1280_v1, %v1263_v5  ;;  %v1309_v61 = vmul.f32 %v1296_v20, %v1291_v24  ;;  %v1310_v31 = vmul.f32 %v1300_v17, %v1291_v24 }
 0x14a   :  { %v1311_v38 = vmul.f32 %v1304_v3, %v1291_v24  ;;  %v1312_v60 = vmul.f32 %v1308_v7, %v1291_v24  ;;  %v1332_v28 = vrot.slane %v1259_v21, %v3110_v14  ;;  %v1336_v8 = vrot.slane %v1260_v50, %v3110_v14  ;;  %v4550_v21 = vld [vmem:[#allocation6_spill] sm:$0xff] }
 0x14b   :  { %v1287_v26 = vadd.f32 %v1283_v49, %v1238_v42  ;;  %v1288_v56 = vadd.f32 %v1284_v0, %v1239_v19  ;;  %v1313_v37 = vadd.f32 %v1309_v61, %v1285_v34  ;;  %v1314_v58 = vadd.f32 %v1310_v31, %v1286_v10  ;;  %v3873_v31 = vld [vmem:[%s4477_s5] sm:$0xf] }
 0x14c   :  { %v1367_v25 = vmul.f32 %v1360_v41, %v1347_v36  ;;  %v1368_v47 = vmul.f32 %v1364_v51, %v1347_v36 }
 0x14d   :  { %v1315_v16 = vadd.f32 %v1311_v38, %v1287_v26  ;;  %v1316_v55 = vadd.f32 %v1312_v60, %v1288_v56  ;;  %v1319_v35 = vpop.permute.xlu1 %1318  ;;  %v4551_v56 = vmov 26  }
 0x14e   :  { %v1337_v48 = vmul.f32 %v1324_v46, %v1319_v35  ;;  %v1338_v39 = vmul.f32 %v1328_v9, %v1319_v35  ;;  %v1339_v22 = vmul.f32 %v1332_v28, %v1319_v35  ;;  %v1340_v40 = vmul.f32 %v1336_v8, %v1319_v35 }
 0x14f   :  { %v4552_v46 = vmov 29   ;;  %v4554_v35 = vmov 33  }
 0x150   :  { %v1341_v13 = vadd.f32 %v1337_v48, %v1313_v37  ;;  %v1342_v32 = vadd.f32 %v1338_v39, %v1314_v58  ;;  %v1343_v45 = vadd.f32 %v1339_v22, %v1315_v16  ;;  %v1344_v11 = vadd.f32 %v1340_v40, %v1316_v55  ;;  %v3921_v48 = vpop.permute.xlu0 %1425 }
 0x151   :  { %v4553_v37 = vmov 30   ;;  %v4555_v40 = vmov 34  }
 0x152   :  { %v1376_v59 = vpop.permute.xlu1 %1375  ;;  %v1369_v5 = vadd.f32 %v1365_v62, %v1341_v13  ;;  %v1370_v6 = vadd.f32 %v1366_v15, %v1342_v32  ;;  %v1371_v57 = vadd.f32 %v1367_v25, %v1343_v45  ;;  %v1372_v42 = vadd.f32 %v1368_v47, %v1344_v11 }
 0x153   :  { %v1378_v19 = vmul.f32 %v3531_v52, %v1376_v59  ;;  %v1379_v27 = vmul.f32 %v1376_v59, %v2858_v2  ;;  %v1380_v44 = vmul.f32 %v3550_v33, %v1376_v59  ;;  %v1381_v50 = vmul.f32 %v1376_v59, %v4550_v21 }
 0x154   :  { %v3934_v62 = vpop.permute.xlu0 %1509  ;;  %v4556_v25 = vmov 0   ;;  %v4557_v13 = vmov 28   ;;  %v4558_v45 = vmov 31  }
 0x155   :  { %v1382_v30 = vadd.f32 %v1378_v19, %v1369_v5  ;;  %v1383_v1 = vadd.f32 %v1379_v27, %v1370_v6  ;;  %v1384_v3 = vadd.f32 %v1380_v44, %v1371_v57  ;;  %v1385_v7 = vadd.f32 %v1381_v50, %v1372_v42 }
 0x156   :  { %v1389_v20 = vpop.permute.xlu1 %1388  ;;  %v4559_v6 = vmov 32   ;;  %v4561_v19 = vmov 35  }
 0x157   :  { %v1391_v17 = vadd.f32 %v1389_v20, %v1382_v30  ;;  %v1392_v43 = vadd.f32 %v1389_v20, %v1383_v1  ;;  %v1393_v23 = vadd.f32 %v1389_v20, %v1384_v3  ;;  %v1394_v24 = vadd.f32 %v1389_v20, %v1385_v7  ;;  %v2564_v1 = vld [vmem:[%s4478_s6] sm:$0xf] }
 0x158   :  { %v3941_v15 = vpop.permute.xlu0 %1553 }
 0x159   :  { %v3826_v49 = vmax.f32 %v1391_v17, 0.0  ;;  %v3828_v0 = vmax.f32 %v1392_v43, 0.0  ;;  %v3836_v33 = vmax.f32 %v1393_v23, 0.0  ;;  %v3838_v41 = vmax.f32 %v1394_v24, 0.0 }
 0x15b   :  { %1405 = vrot.lane.b32.xlu1 %v3828_v0, %s2761_s28  ;;  %1403 = vrot.lane.b32.xlu0 %v3826_v49, %s2761_s28  ;;  %v3834_v52 = vpop.permute.xlu1 %1453  ;;  %v1943_v9 = vrot.slane %v3836_v33, %v3097_v4  ;;  %v1971_v58 = vrot.slane %v3836_v33, %v3107_v12  ;;  %v2027_v36 = vrot.slane %v3836_v33, %v3148_v63 }
 0x15c   :  { %v3946_v47 = vpop.permute.xlu0 %1637  ;;  %v1991_v43 = vrot.slane %v3826_v49, %v3110_v14 }
 0x15f   :  { %1409 = vrot.lane.b32.xlu1 %v3838_v41, %s2761_s28  ;;  %1407 = vrot.lane.b32.xlu0 %v3836_v33, %s2761_s28  ;;  %s2593_s28 = sshll.u32 %s2803_s27, 4  ;;  %s2594_s28 = int_to_ptr.vmem [resolvable:$true] %s2593_s28 }
 0x160   :  { %v3844_v51 = vpop.permute.xlu1 %1481  ;;  %v3951_v32 = vpop.permute.xlu0 %1685  ;;  %p2740_p1 = scmp.lt.s32.totalorder %s2594_s28, %s2594_s28 }
 0x163   :  { %1536 = vrot.lane.b32.xlu1 %v3826_v49, %s2764_s8  ;;  %1540 = vrot.lane.b32.xlu0 %v3836_v33, %s2764_s8 }
 0x164   :  { %v3956_v11 = vpop.permute.xlu0 %1769 }
 0x165   :  { %v3850_v34 = vpop.permute.xlu1 %1581 }
 0x167   :  { %1538 = vrot.lane.b32.xlu1 %v3828_v0, %s2764_s8  ;;  %1668 = vrot.lane.b32.xlu0 %v3836_v33, %s2768_s1 }
 0x168   :  { %v3962_v59 = vpop.permute.xlu0 %1817 }
 0x16a   :  { %v3856_v10 = vpop.permute.xlu1 %1609 }
 0x16b   :  { %1542 = vrot.lane.b32.xlu1 %v3838_v41, %s2764_s8  ;;  %1800 = vrot.lane.b32.xlu0 %v3836_v33, %s2772_s9  ;;  %s2735_s8 = scalar_lea.vmem %s2594_s28, 256 }
 0x16c   :  { %v3965_v5 = vpop.permute.xlu0 %1901  ;;  %p2736_p0 = scmp.ne.s32.totalorder %s2594_s28, %s2735_s8  ;;  %p2741_p2 = scmp.lt.s32.totalorder %s2735_s8, %s2735_s8 }
 0x16e   :  { %p2742_p3 = por %p2741_p2, %p2740_p1 }
 0x16f   :  { %1664 = vrot.lane.b32.xlu1 %v3826_v49, %s2768_s1  ;;  %2044 = vrot.lane.b32.xlu0 %v3836_v33, %s2778_s10  ;;  %v3866_v61 = vpop.permute.xlu1 %1713 }
 0x170   :  { %v3971_v42 = vpop.permute.xlu0 %1985  ;;  %p2743_p4 = pnand %p2742_p3, %p2736_p0 }
 0x173   :  { %1666 = vrot.lane.b32.xlu1 %v3828_v0, %s2768_s1  ;;  %2221 = vperm.xlu0 %2713, %v3873_v31  }
 0x174   :  { %v3876_v26 = vpop.permute.xlu1 %1741  ;;  %v3980_v44 = vpop.permute.xlu0 %2089 }
 0x175   :  { %4563 = vst [vmem:[#allocation9_spill] sm:$0xff] %v3980_v44 }
 0x177   :  { %1670 = vrot.lane.b32.xlu1 %v3838_v41, %s2768_s1  ;;  %2176 = vrot.lane.b32.xlu0 %v3836_v33, %s2781_s11 }
 0x178   :  { %2714 = vset.pattern.permute.xlu0 %v4551_v56  ;;  %v3986_v30 = vpop.permute.xlu0 %2117 }
 0x179   :  { %v3883_v38 = vpop.permute.xlu1 %1845  ;;  %4565 = vst [vmem:[#allocation11_spill] sm:$0xff] %v3986_v30 }
 0x17b   :  { %1796 = vrot.lane.b32.xlu1 %v3826_v49, %s2772_s9  ;;  %2249 = vperm.xlu0 %2714, %v3873_v31  }
 0x17e   :  { %v3888_v60 = vpop.permute.xlu1 %1873 }
 0x17f   :  { %1798 = vrot.lane.b32.xlu1 %v3828_v0, %s2772_s9  ;;  %2717 = vset.pattern.permute.xlu0 %v4552_v46 }
 0x180   :  { %2349 = vperm.xlu0 %2717, %v3873_v31  }
 0x183   :  { %v3896_v28 = vpop.permute.xlu1 %1929  ;;  %1802 = vrot.lane.b32.xlu1 %v3838_v41, %s2772_s9 }
 0x184   :  { %v3901_v8 = vmul.f32 %v1943_v9, %v3896_v28  ;;  %2308 = vrot.lane.b32.xlu0 %v3836_v33, %s2787_s12 }
 0x185   :  { %2718 = vset.pattern.permute.xlu0 %v4553_v37  ;;  %v1995_v37 = vrot.slane %v3828_v0, %v3110_v14 }
 0x187   :  { %2040 = vrot.lane.b32.xlu1 %v3826_v49, %s2778_s10 }
 0x188   :  { %v3910_v16 = vpop.permute.xlu1 %1957  ;;  %2377 = vperm.xlu0 %2718, %v3873_v31  }
 0x189   :  { %v3914_v55 = vmul.f32 %v1971_v58, %v3910_v16 }
 0x18b   :  { %2042 = vrot.lane.b32.xlu1 %v3828_v0, %s2778_s10 }
 0x18c   :  { %2721 = vset.pattern.permute.xlu0 %v4554_v35 }
 0x18d   :  { %v3923_v39 = vpop.permute.xlu1 %2013  ;;  %2481 = vperm.xlu0 %2721, %v3873_v31  }
 0x18e   :  { %v3927_v22 = vmul.f32 %v2027_v36, %v3923_v39 }
 0x18f   :  { %2046 = vrot.lane.b32.xlu1 %v3838_v41, %s2778_s10 }
 0x191   :  { %2436 = vrot.lane.b32.xlu0 %v3836_v33, %s2792_s13 }
 0x192   :  { %2722 = vset.pattern.permute.xlu0 %v4555_v40  ;;  %v3969_v57 = vpop.permute.xlu1 %2061 }
 0x193   :  { %2172 = vrot.lane.b32.xlu1 %v3826_v49, %s2781_s11  ;;  %4560 = vst [vmem:[#allocation7_spill] sm:$0xff] %v3969_v57 }
 0x195   :  { %2509 = vperm.xlu0 %2722, %v3873_v31  }
 0x197   :  { %2174 = vrot.lane.b32.xlu1 %v3828_v0, %s2781_s11  ;;  %v3978_v27 = vpop.permute.xlu1 %2145 }
 0x198   :  { %4562 = vst [vmem:[#allocation8_spill] sm:$0xff] %v3978_v27 }
 0x199   :  { %2725 = vset.pattern.permute.xlu0 %v4556_v25 }
 0x19b   :  { %2178 = vrot.lane.b32.xlu1 %v3838_v41, %s2781_s11 }
 0x19c   :  { %v3984_v50 = vpop.permute.xlu1 %2193 }
 0x19d   :  { %4564 = vst [vmem:[#allocation10_spill] sm:$0xff] %v3984_v50 }
 0x19f   :  { %2277 = vperm.xlu1 %2715, %v3873_v31  }
 0x1a3   :  { %2716 = vset.pattern.permute.xlu1 %v4557_v13 }
 0x1a4   :  { %2321 = vperm.xlu1 %2716, %v3873_v31  }
 0x1a8   :  { %2304 = vrot.lane.b32.xlu1 %v3826_v49, %s2787_s12 }
 0x1a9   :  { %2719 = vset.pattern.permute.xlu1 %v4558_v45 }
 0x1ac   :  { %2306 = vrot.lane.b32.xlu1 %v3828_v0, %s2787_s12 }
 0x1b0   :  { %2310 = vrot.lane.b32.xlu1 %v3838_v41, %s2787_s12 }
 0x1b4   :  { %2405 = vperm.xlu1 %2719, %v3873_v31  }
 0x1b8   :  { %2720 = vset.pattern.permute.xlu1 %v4559_v6 }
 0x1b9   :  { %2453 = vperm.xlu1 %2720, %v3873_v31  }
 0x1bd   :  { %2432 = vrot.lane.b32.xlu1 %v3826_v49, %s2792_s13 }
 0x1be   :  { %2723 = vset.pattern.permute.xlu1 %v4561_v19 }
 0x1c1   :  { %2434 = vrot.lane.b32.xlu1 %v3828_v0, %s2792_s13 }
 0x1c5   :  { %2438 = vrot.lane.b32.xlu1 %v3838_v41, %s2792_s13 }
 0x1c9   :  { %2537 = vperm.xlu1 %2723, %v3873_v31  }
 0x1cd   :  { %v1406_v3 = vpop.permute.xlu1 %1405  ;;  %v1404_v7 = vpop.permute.xlu0 %1403  ;;  %2724 = vset.pattern.permute.xlu1 %v4556_v25 }
 0x1ce   :  { %v1411_v20 = vsel %vm124_vm2, %v1404_v7, %v1406_v3  ;;  %v1417_v17 = vsel %vm124_vm2, 0.0, %v1404_v7  ;;  %2567 = vperm.xlu1 %2724, %v2564_v1  }
 0x1cf   :  { %v1419_v23 = vsel %vm3125_vm3, %v1417_v17, 0.0  ;;  %v1420_v24 = vsel %vm3101_vm1, %v1411_v20, 0.0 }
 0x1d0   :  { %v1431_v31 = vrot.slane %v1419_v23, %v3097_v4  ;;  %v1435_v56 = vrot.slane %v1420_v24, %v3097_v4  ;;  %v1459_v46 = vrot.slane %v1419_v23, %v3107_v12  ;;  %v1463_v9 = vrot.slane %v1420_v24, %v3107_v12 }
 0x1d1   :  { %v1487_v35 = vrot.slane %v1419_v23, %v3110_v14  ;;  %v1491_v36 = vrot.slane %v1420_v24, %v3110_v14  ;;  %v1410_v40 = vpop.permute.xlu1 %1409  ;;  %v1408_v25 = vpop.permute.xlu0 %1407  ;;  %v1515_v20 = vrot.slane %v1419_v23, %v3148_v63 }
 0x1d2   :  { %v1444_v13 = vmul.f32 %v1431_v31, %v3921_v48  ;;  %v1445_v45 = vmul.f32 %v1435_v56, %v3921_v48  ;;  %v1472_v6 = vmul.f32 %v1459_v46, %v3834_v52  ;;  %v1473_v19 = vmul.f32 %v1463_v9, %v3834_v52 }
 0x1d3   :  { %v1500_v7 = vmul.f32 %v1487_v35, %v3844_v51  ;;  %v1412_v31 = vsel %vm124_vm2, %v1408_v25, %v1410_v40  ;;  %v1418_v56 = vsel %vm124_vm2, 0.0, %v1408_v25  ;;  %v1519_v9 = vrot.slane %v1420_v24, %v3148_v63 }
 0x1d4   :  { %v1476_v17 = vadd.f32 %v1472_v6, %v1444_v13  ;;  %v1477_v58 = vadd.f32 %v1473_v19, %v1445_v45  ;;  %v1421_v1 = vsel %vm3125_vm3, %v1418_v56, 0.0  ;;  %v1422_v3 = vsel %vm3101_vm1, %v1412_v31, 0.0 }
 0x1d5   :  { %v1537_v35 = vpop.permute.xlu1 %1536  ;;  %v1501_v23 = vmul.f32 %v1491_v36, %v3844_v51  ;;  %v1439_v45 = vrot.slane %v1421_v1, %v3097_v4  ;;  %v1443_v40 = vrot.slane %v1422_v3, %v3097_v4  ;;  %v4034_v25 = vmul.f32 %v1991_v43, %v3971_v42 }
 0x1d6   :  { %v1504_v13 = vadd.f32 %v1500_v7, %v1476_v17  ;;  %v1467_v6 = vrot.slane %v1421_v1, %v3107_v12  ;;  %v1471_v24 = vrot.slane %v1422_v3, %v3107_v12  ;;  %v1495_v19 = vrot.slane %v1421_v1, %v3110_v14  ;;  %v1541_v7 = vpop.permute.xlu0 %1540 }
 0x1d7   :  { %v1505_v56 = vadd.f32 %v1501_v23, %v1477_v58  ;;  %v1528_v31 = vmul.f32 %v1515_v20, %v3934_v62  ;;  %v1446_v46 = vmul.f32 %v1439_v45, %v3921_v48  ;;  %v1499_v36 = vrot.slane %v1422_v3, %v3110_v14 }
 0x1d8   :  { %v1529_v17 = vmul.f32 %v1519_v9, %v3934_v62  ;;  %v1447_v21 = vmul.f32 %v1443_v40, %v3921_v48  ;;  %v1474_v43 = vmul.f32 %v1467_v6, %v3834_v52  ;;  %v1475_v2 = vmul.f32 %v1471_v24, %v3834_v52 }
 0x1d9   :  { %v1539_v50 = vpop.permute.xlu1 %1538  ;;  %v1532_v27 = vadd.f32 %v1528_v31, %v1504_v13  ;;  %v1502_v30 = vmul.f32 %v1495_v19, %v3844_v51  ;;  %v1523_v58 = vrot.slane %v1421_v1, %v3148_v63  ;;  %v1550_v20 = vsel %vm262_vm4, 0.0, %v1537_v35 }
 0x1da   :  { %v1478_v23 = vadd.f32 %v1474_v43, %v1446_v46  ;;  %v1559_v45 = vrot.slane %v1550_v20, %v3097_v4  ;;  %v1587_v44 = vrot.slane %v1550_v20, %v3107_v12  ;;  %v1551_v9 = vsel %vm262_vm4, 0.0, %v1541_v7 }
 0x1db   :  { %v4053_v48 = vmul.f32 %v1995_v37, %v3971_v42  ;;  %v1533_v40 = vadd.f32 %v1529_v17, %v1505_v56  ;;  %v1503_v52 = vmul.f32 %v1499_v36, %v3844_v51  ;;  %v1527_v13 = vrot.slane %v1422_v3, %v3148_v63 }
 0x1dc   :  { %v1479_v6 = vadd.f32 %v1475_v2, %v1447_v21  ;;  %v1506_v24 = vadd.f32 %v1502_v30, %v1478_v23  ;;  %v1530_v1 = vmul.f32 %v1523_v58, %v3934_v62  ;;  %v1572_v46 = vmul.f32 %v1559_v45, %v3941_v15  ;;  %v4069_v58 = vpop.permute.xlu0 %1668 }
 0x1dd   :  { %v1543_v19 = vpop.permute.xlu1 %1542  ;;  %v1615_v31 = vrot.slane %v1550_v20, %v3110_v14  ;;  %v1643_v43 = vrot.slane %v1550_v20, %v3148_v63  ;;  %v1567_v57 = vrot.slane %v1551_v9, %v3097_v4  ;;  %v1595_v37 = vrot.slane %v1551_v9, %v3107_v12 }
 0x1de   :  { %v1534_v56 = vadd.f32 %v1530_v1, %v1506_v24  ;;  %v1576_v17 = vadd.f32 %v1572_v46, %v1532_v27  ;;  %v1600_v51 = vmul.f32 %v1587_v44, %v3850_v34  ;;  %v1623_v2 = vrot.slane %v1551_v9, %v3110_v14 }
 0x1df   :  { %v1531_v21 = vmul.f32 %v1527_v13, %v3934_v62  ;;  %v1574_v30 = vmul.f32 %v1567_v57, %v3941_v15  ;;  %v1651_v3 = vrot.slane %v1551_v9, %v3148_v63  ;;  %v1544_v36 = vsel %vm262_vm4, %v1537_v35, %v1539_v50 }
 0x1e0   :  { %v1507_v20 = vadd.f32 %v1503_v52, %v1479_v6  ;;  %v1604_v23 = vadd.f32 %v1600_v51, %v1576_v17  ;;  %v1563_v45 = vrot.slane %v1544_v36, %v3097_v4  ;;  %v1591_v27 = vrot.slane %v1544_v36, %v3107_v12 }
 0x1e1   :  { %v1665_v24 = vpop.permute.xlu1 %1664  ;;  %v1628_v44 = vmul.f32 %v1615_v31, %v3856_v10  ;;  %v1578_v1 = vadd.f32 %v1574_v30, %v1534_v56  ;;  %v1602_v62 = vmul.f32 %v1595_v37, %v3850_v34  ;;  %v1619_v57 = vrot.slane %v1544_v36, %v3110_v14 }
 0x1e2   :  { %v1656_v9 = vmul.f32 %v1643_v43, %v3946_v47  ;;  %v1630_v50 = vmul.f32 %v1623_v2, %v3856_v10  ;;  %v1573_v35 = vmul.f32 %v1563_v45, %v3941_v15  ;;  %v1679_v52 = vsel %vm391_vm5, 0.0, %v4069_v58 }
 0x1e3   :  { %v1606_v13 = vadd.f32 %v1602_v62, %v1578_v1  ;;  %v1658_v6 = vmul.f32 %v1651_v3, %v3946_v47  ;;  %v1647_v46 = vrot.slane %v1544_v36, %v3148_v63  ;;  %v1682_v31 = vsel %vm3269_vm6, %v1679_v52, 0.0 }
 0x1e4   :  { %v1632_v37 = vadd.f32 %v1628_v44, %v1604_v23  ;;  %v1577_v56 = vadd.f32 %v1573_v35, %v1533_v40  ;;  %v1601_v17 = vmul.f32 %v1591_v27, %v3850_v34  ;;  %v1699_v43 = vrot.slane %v1682_v31, %v3097_v4  ;;  %v4093_v40 = vpop.permute.xlu0 %1800 }
 0x1e5   :  { %v1667_v51 = vpop.permute.xlu1 %1666  ;;  %v1634_v2 = vadd.f32 %v1630_v50, %v1606_v13  ;;  %v1629_v30 = vmul.f32 %v1619_v57, %v3856_v10  ;;  %v1727_v45 = vrot.slane %v1682_v31, %v3107_v12  ;;  %v1545_v1 = vsel %vm262_vm4, %v1541_v7, %v1543_v19 }
 0x1e6   :  { %v1605_v3 = vadd.f32 %v1601_v17, %v1577_v56  ;;  %v1755_v36 = vrot.slane %v1682_v31, %v3110_v14  ;;  %v1783_v62 = vrot.slane %v1682_v31, %v3148_v63  ;;  %v1571_v23 = vrot.slane %v1545_v1, %v3097_v4 }
 0x1e7   :  { %v1535_v27 = vadd.f32 %v1531_v21, %v1507_v20  ;;  %v1662_v44 = vadd.f32 %v1658_v6, %v1634_v2  ;;  %v1657_v35 = vmul.f32 %v1647_v46, %v3946_v47  ;;  %v1706_v50 = vmul.f32 %v1699_v43, %v3951_v32 }
 0x1e8   :  { %v1660_v57 = vadd.f32 %v1656_v9, %v1632_v37  ;;  %v1633_v52 = vadd.f32 %v1629_v30, %v1605_v3  ;;  %v1575_v13 = vmul.f32 %v1571_v23, %v3941_v15  ;;  %v1599_v7 = vrot.slane %v1545_v1, %v3107_v12 }
 0x1e9   :  { %v1671_v19 = vpop.permute.xlu1 %1670  ;;  %v1710_v56 = vadd.f32 %v1706_v50, %v1662_v44  ;;  %v1734_v31 = vmul.f32 %v1727_v45, %v3866_v61  ;;  %v1811_v17 = vsel %vm528_vm8, 0.0, %v4093_v40  ;;  %v1678_v21 = vsel %vm391_vm5, 0.0, %v1665_v24 }
 0x1ea   :  { %v1762_v20 = vmul.f32 %v1755_v36, %v3876_v26  ;;  %v1790_v6 = vmul.f32 %v1783_v62, %v3956_v11  ;;  %v1579_v46 = vadd.f32 %v1575_v13, %v1535_v27  ;;  %v1627_v9 = vrot.slane %v1545_v1, %v3110_v14 }
 0x1eb   :  { %v1738_v37 = vadd.f32 %v1734_v31, %v1710_v56  ;;  %v1655_v15 = vrot.slane %v1545_v1, %v3148_v63  ;;  %v1814_v43 = vsel %vm3125_vm3, %v1811_v17, 0.0  ;;  %v1680_v2 = vsel %vm3269_vm6, %v1678_v21, 0.0 }
 0x1ec   :  { %v1661_v30 = vadd.f32 %v1657_v35, %v1633_v52  ;;  %v1603_v45 = vmul.f32 %v1599_v7, %v3850_v34  ;;  %v1831_v3 = vrot.slane %v1814_v43, %v3097_v4  ;;  %v1859_v36 = vrot.slane %v1814_v43, %v3107_v12 }
 0x1ed   :  { %v1797_v62 = vpop.permute.xlu1 %1796  ;;  %v1766_v23 = vadd.f32 %v1762_v20, %v1738_v37  ;;  %v1691_v27 = vrot.slane %v1680_v2, %v3097_v4  ;;  %v1719_v44 = vrot.slane %v1680_v2, %v3107_v12  ;;  %v1672_v1 = vsel %vm391_vm5, %v1665_v24, %v1667_v51 }
 0x1ee   :  { %v1607_v50 = vadd.f32 %v1603_v45, %v1579_v46  ;;  %v1631_v13 = vmul.f32 %v1627_v9, %v3856_v10  ;;  %v1887_v56 = vrot.slane %v1814_v43, %v3110_v14  ;;  %v1915_v35 = vrot.slane %v1814_v43, %v3148_v63 }
 0x1ef   :  { %v1794_v34 = vadd.f32 %v1790_v6, %v1766_v23  ;;  %v1659_v52 = vmul.f32 %v1655_v15, %v3946_v47  ;;  %v1838_v7 = vmul.f32 %v1831_v3, %v3962_v59  ;;  %v1704_v31 = vmul.f32 %v1691_v27, %v3951_v32 }
 0x1f0   :  { %v1866_v17 = vmul.f32 %v1859_v36, %v3883_v38  ;;  %v1732_v21 = vmul.f32 %v1719_v44, %v3866_v61  ;;  %v1747_v24 = vrot.slane %v1680_v2, %v3110_v14  ;;  %v1681_v10 = vsel %vm3289_vm7, %v1672_v1, 0.0 }
 0x1f1   :  { %v1799_v51 = vpop.permute.xlu1 %1798  ;;  %v1842_v20 = vadd.f32 %v1838_v7, %v1794_v34  ;;  %v1708_v46 = vadd.f32 %v1704_v31, %v1660_v57  ;;  %v1695_v6 = vrot.slane %v1681_v10, %v3097_v4  ;;  %v1723_v47 = vrot.slane %v1681_v10, %v3107_v12 }
 0x1f2   :  { %v1635_v9 = vadd.f32 %v1631_v13, %v1607_v50  ;;  %v1894_v37 = vmul.f32 %v1887_v56, %v3888_v60  ;;  %v1922_v15 = vmul.f32 %v1915_v35, %v3965_v5  ;;  %v1775_v43 = vrot.slane %v1680_v2, %v3148_v63 }
 0x1f3   :  { %v1870_v45 = vadd.f32 %v1866_v17, %v1842_v20  ;;  %v1736_v3 = vadd.f32 %v1732_v21, %v1708_v46  ;;  %v1760_v36 = vmul.f32 %v1747_v24, %v3876_v26  ;;  %v1705_v23 = vmul.f32 %v1695_v6, %v3951_v32 }
 0x1f4   :  { %v1751_v27 = vrot.slane %v1681_v10, %v3110_v14  ;;  %v1779_v57 = vrot.slane %v1681_v10, %v3148_v63  ;;  %v1673_v44 = vsel %vm391_vm5, %v4069_v58, %v1671_v19  ;;  %v1810_v1 = vsel %vm528_vm8, 0.0, %v1797_v62 }
 0x1f5   :  { %v1803_v50 = vpop.permute.xlu1 %1802  ;;  %v1898_v13 = vadd.f32 %v1894_v37, %v1870_v45  ;;  %v1709_v56 = vadd.f32 %v1705_v23, %v1661_v30  ;;  %v1733_v2 = vmul.f32 %v1723_v47, %v3866_v61  ;;  %v1683_v35 = vsel %vm3289_vm7, %v1673_v44, 0.0 }
 0x1f6   :  { %v1663_v34 = vadd.f32 %v1659_v52, %v1635_v9  ;;  %v1764_v7 = vadd.f32 %v1760_v36, %v1736_v3  ;;  %v1703_v31 = vrot.slane %v1683_v35, %v3097_v4  ;;  %v1731_v17 = vrot.slane %v1683_v35, %v3107_v12 }
 0x1f7   :  { %v1926_v21 = vadd.f32 %v1922_v15, %v1898_v13  ;;  %v1788_v24 = vmul.f32 %v1775_v43, %v3956_v11  ;;  %v1737_v58 = vadd.f32 %v1733_v2, %v1709_v56  ;;  %v1812_v19 = vsel %vm3125_vm3, %v1810_v1, 0.0 }
 0x1f8   :  { %v1761_v30 = vmul.f32 %v1751_v27, %v3876_v26  ;;  %v1789_v10 = vmul.f32 %v1779_v57, %v3956_v11  ;;  %v1707_v20 = vmul.f32 %v1703_v31, %v3951_v32  ;;  %v1759_v52 = vrot.slane %v1683_v35, %v3110_v14 }
 0x1f9   :  { %v1954_v46 = vadd.f32 %v3901_v8, %v1926_v21  ;;  %v1787_v6 = vrot.slane %v1683_v35, %v3148_v63  ;;  %v1823_v47 = vrot.slane %v1812_v19, %v3097_v4  ;;  %v1851_v9 = vrot.slane %v1812_v19, %v3107_v12  ;;  %v2041_v3 = vpop.permute.xlu1 %2040 }
 0x1fa   :  { %v1792_v37 = vadd.f32 %v1788_v24, %v1764_v7  ;;  %v1711_v15 = vadd.f32 %v1707_v20, %v1663_v34  ;;  %v1735_v43 = vmul.f32 %v1731_v17, %v3866_v61  ;;  %v1804_v45 = vsel %vm528_vm8, %v1797_v62, %v1799_v51 }
 0x1fb   :  { %v4159_v36 = vadd.f32 %v3914_v55, %v1954_v46  ;;  %v1765_v32 = vadd.f32 %v1761_v30, %v1737_v58  ;;  %v1836_v23 = vmul.f32 %v1823_v47, %v3962_v59  ;;  %v1879_v8 = vrot.slane %v1812_v19, %v3110_v14 }
 0x1fc   :  { %v1739_v27 = vadd.f32 %v1735_v43, %v1711_v15  ;;  %v1763_v57 = vmul.f32 %v1759_v52, %v3876_v26  ;;  %v1907_v44 = vrot.slane %v1812_v19, %v3148_v63  ;;  %v1813_v1 = vsel %vm3101_vm1, %v1804_v45, 0.0 }
 0x1fd   :  { %v1840_v61 = vadd.f32 %v1836_v23, %v1792_v37  ;;  %v1864_v62 = vmul.f32 %v1851_v9, %v3883_v38  ;;  %v1827_v51 = vrot.slane %v1813_v1, %v3097_v4  ;;  %v1855_v55 = vrot.slane %v1813_v1, %v3107_v12  ;;  %v2043_v58 = vpop.permute.xlu1 %2042 }
 0x1fe   :  { %v1767_v13 = vadd.f32 %v1763_v57, %v1739_v27  ;;  %v1791_v56 = vmul.f32 %v1787_v6, %v3956_v11  ;;  %v1883_v2 = vrot.slane %v1813_v1, %v3110_v14  ;;  %v1805_v26 = vsel %vm528_vm8, %v4093_v40, %v1803_v50 }
 0x1ff   :  { %v1793_v35 = vadd.f32 %v1789_v10, %v1765_v32  ;;  %v1868_v34 = vadd.f32 %v1864_v62, %v1840_v61  ;;  %v1892_v7 = vmul.f32 %v1879_v8, %v3888_v60  ;;  %v1837_v31 = vmul.f32 %v1827_v51, %v3962_v59 }
 0x200   :  { %v1920_v17 = vmul.f32 %v1907_v44, %v3965_v5  ;;  %v1865_v21 = vmul.f32 %v1855_v55, %v3883_v38  ;;  %v1911_v24 = vrot.slane %v1813_v1, %v3148_v63  ;;  %v1815_v11 = vsel %vm3101_vm1, %v1805_v26, 0.0 }
 0x201   :  { %v1896_v19 = vadd.f32 %v1892_v7, %v1868_v34  ;;  %v1841_v30 = vadd.f32 %v1837_v31, %v1793_v35  ;;  %v1835_v40 = vrot.slane %v1815_v11, %v3097_v4  ;;  %v1863_v50 = vrot.slane %v1815_v11, %v3107_v12  ;;  %v2047_v55 = vpop.permute.xlu1 %2046 }
 0x202   :  { %v4566_v10 = vrot.slane %v3826_v49, %v3097_v4  ;;  %v1963_v52 = vrot.slane %v3826_v49, %v3107_v12  ;;  %v1795_v46 = vadd.f32 %v1791_v56, %v1767_v13  ;;  %v1893_v6 = vmul.f32 %v1883_v2, %v3888_v60 }
 0x203   :  { %v1924_v47 = vadd.f32 %v1920_v17, %v1896_v19  ;;  %v1869_v9 = vadd.f32 %v1865_v21, %v1841_v30  ;;  %v1839_v37 = vmul.f32 %v1835_v40, %v3962_v59  ;;  %v1891_v15 = vrot.slane %v1815_v11, %v3110_v14  ;;  %v2045_v30 = vpop.permute.xlu0 %2044 }
 0x204   :  { %v1948_v20 = vmul.f32 %v4566_v10, %v3896_v28  ;;  %v4567_v43 = vrot.slane %v3836_v33, %v3110_v14  ;;  %v1976_v32 = vmul.f32 %v1963_v52, %v3910_v16  ;;  %v1921_v23 = vmul.f32 %v1911_v24, %v3965_v5 }
 0x205   :  { %v1919_v8 = vrot.slane %v1815_v11, %v3148_v63  ;;  %v1897_v57 = vadd.f32 %v1893_v6, %v1869_v9  ;;  %v1843_v44 = vadd.f32 %v1839_v37, %v1795_v46  ;;  %v1867_v1 = vmul.f32 %v1863_v50, %v3883_v38  ;;  %v2173_v10 = vpop.permute.xlu1 %2172 }
 0x206   :  { %v2006_v45 = vmul.f32 %v4567_v43, %v3971_v42  ;;  %v1952_v27 = vadd.f32 %v1948_v20, %v1924_v47  ;;  %v1947_v59 = vrot.slane %v3838_v41, %v3097_v4  ;;  %v4568_v61 = vrot.slane %v3828_v0, %v3097_v4 }
 0x207   :  { %v1967_v62 = vrot.slane %v3828_v0, %v3107_v12  ;;  %v2019_v51 = vrot.slane %v3826_v49, %v3148_v63  ;;  %v1925_v56 = vadd.f32 %v1921_v23, %v1897_v57  ;;  %v1871_v2 = vadd.f32 %v1867_v1, %v1843_v44 }
 0x208   :  { %v1949_v33 = vmul.f32 %v4568_v61, %v3896_v28  ;;  %v1980_v13 = vadd.f32 %v1976_v32, %v1952_v27  ;;  %v1895_v38 = vmul.f32 %v1891_v15, %v3888_v60  ;;  %v2048_v34 = vsel %vm853_vm9, %v2041_v3, %v2043_v58 }
 0x209   :  { %v1977_v26 = vmul.f32 %v1967_v62, %v3910_v16  ;;  %v2032_v35 = vmul.f32 %v2019_v51, %v3923_v39  ;;  %v2054_v7 = vsel %vm853_vm9, %v2043_v58, 0.0  ;;  %v1923_v21 = vmul.f32 %v1919_v8, %v3965_v5  ;;  %v2175_v8 = vpop.permute.xlu1 %2174 }
 0x20a   :  { %v1953_v31 = vadd.f32 %v1949_v33, %v1925_v56  ;;  %v1899_v17 = vadd.f32 %v1895_v38, %v1871_v2  ;;  %v2008_v49 = vadd.f32 %v4034_v25, %v1980_v13  ;;  %v1951_v24 = vmul.f32 %v1947_v59, %v3896_v28  ;;  %v4264_v59 = vpop.permute.xlu0 %2221  ;;  %v4571_v13 = vld [vmem:[#allocation9_spill] sm:$0xff] }
 0x20b   :  { %v1975_v11 = vrot.slane %v3838_v41, %v3107_v12  ;;  %v2023_v60 = vrot.slane %v3828_v0, %v3148_v63  ;;  %v2010_v19 = vadd.f32 %v2006_v45, %v4159_v36  ;;  %v4225_v50 = vsel %vm3269_vm6, %v2048_v34, 0.0 }
 0x20c   :  { %v1981_v3 = vadd.f32 %v1977_v26, %v1953_v31  ;;  %v1927_v40 = vadd.f32 %v1923_v21, %v1899_v17  ;;  %v2036_v58 = vadd.f32 %v2032_v35, %v2008_v49  ;;  %v4230_v28 = vsel %vm3289_vm7, %v2054_v7, 0.0  ;;  %v4572_v17 = vld [vmem:[#allocation11_spill] sm:$0xff] }
 0x20d   :  { %v1979_v5 = vmul.f32 %v1975_v11, %v3910_v16  ;;  %v2038_v25 = vadd.f32 %v3927_v22, %v2010_v19  ;;  %v2049_v0 = vsel %vm853_vm9, %v2045_v30, %v2047_v55  ;;  %v2033_v36 = vmul.f32 %v2023_v60, %v3923_v39  ;;  %v2179_v7 = vpop.permute.xlu1 %2178 }
 0x20e   :  { %v1955_v20 = vadd.f32 %v1951_v24, %v1927_v40  ;;  %v2009_v52 = vadd.f32 %v4053_v48, %v1981_v3  ;;  %v2055_v46 = vsel %vm853_vm9, %v2047_v55, 0.0  ;;  %v4569_v16 = vrot.slane %v3838_v41, %v3110_v14  ;;  %v2177_v11 = vpop.permute.xlu0 %2176 }
 0x20f   :  { %v2031_v47 = vrot.slane %v3838_v41, %v3148_v63  ;;  %v2067_v22 = vrot.slane %v4225_v50, %v3097_v4  ;;  %v2071_v15 = vrot.slane %v4230_v28, %v3097_v4  ;;  %v4249_v48 = vsel %vm3269_vm6, %v2049_v0, 0.0  ;;  %v4570_v41 = vld [vmem:[#allocation7_spill] sm:$0xff] }
 0x210   :  { %v2007_v6 = vmul.f32 %v4569_v16, %v3971_v42  ;;  %v1983_v9 = vadd.f32 %v1979_v5, %v1955_v20  ;;  %v2037_v37 = vadd.f32 %v2033_v36, %v2009_v52  ;;  %v4253_v43 = vsel %vm3289_vm7, %v2055_v46, 0.0 }
 0x211   :  { %v2035_v42 = vmul.f32 %v2031_v47, %v3923_v39  ;;  %v2080_v32 = vmul.f32 %v2067_v22, %v4570_v41  ;;  %v2075_v23 = vrot.slane %v4249_v48, %v3097_v4  ;;  %v2081_v27 = vmul.f32 %v2071_v15, %v4570_v41 }
 0x212   :  { %v2011_v45 = vadd.f32 %v2007_v6, %v1983_v9  ;;  %v2099_v57 = vrot.slane %v4230_v28, %v3107_v12  ;;  %v2079_v1 = vrot.slane %v4253_v43, %v3097_v4  ;;  %v2095_v39 = vrot.slane %v4225_v50, %v3107_v12 }
 0x213   :  { %v2085_v61 = vadd.f32 %v2081_v27, %v2037_v37  ;;  %v2127_v33 = vrot.slane %v4230_v28, %v3110_v14  ;;  %v2084_v62 = vadd.f32 %v2080_v32, %v2036_v58  ;;  %v2082_v51 = vmul.f32 %v2075_v23, %v4570_v41 }
 0x214   :  { %v2039_v44 = vadd.f32 %v2035_v42, %v2011_v45  ;;  %v2107_v55 = vrot.slane %v4253_v43, %v3107_v12  ;;  %v2109_v56 = vmul.f32 %v2099_v57, %v4571_v13  ;;  %v2083_v2 = vmul.f32 %v2079_v1, %v4570_v41  ;;  %v2250_v45 = vpop.permute.xlu0 %2249  ;;  %v4573_v41 = vld [vmem:[#allocation8_spill] sm:$0xff]  ;;  %v4574_v1 = vld [vmem:[#allocation10_spill] sm:$0xff] }
 0x215   :  { %v2108_v38 = vmul.f32 %v2095_v39, %v4571_v13  ;;  %v2123_v26 = vrot.slane %v4225_v50, %v3110_v14  ;;  %v2180_v35 = vsel %vm986_vm10, %v2173_v10, %v2175_v8  ;;  %v2186_v34 = vsel %vm986_vm10, %v2175_v8, 0.0 }
 0x216   :  { %v2113_v31 = vadd.f32 %v2109_v56, %v2085_v61  ;;  %v2137_v21 = vmul.f32 %v2127_v33, %v4572_v17  ;;  %v2087_v49 = vadd.f32 %v2083_v2, %v2039_v44  ;;  %v2103_v24 = vrot.slane %v4249_v48, %v3107_v12 }
 0x217   :  { %v2112_v60 = vadd.f32 %v2108_v38, %v2084_v62  ;;  %v2086_v19 = vadd.f32 %v2082_v51, %v2038_v25  ;;  %v2111_v30 = vmul.f32 %v2107_v55, %v4571_v13  ;;  %v2135_v3 = vrot.slane %v4253_v43, %v3110_v14 }
 0x218   :  { %v4288_v40 = vsel %vm3125_vm3, %v2180_v35, 0.0  ;;  %v4292_v58 = vsel %vm3101_vm1, %v2186_v34, 0.0  ;;  %v2181_v5 = vsel %vm986_vm10, %v2177_v11, %v2179_v7  ;;  %v2187_v0 = vsel %vm986_vm10, %v2179_v7, 0.0  ;;  %v4346_v34 = vpop.permute.xlu0 %2349 }
 0x219   :  { %v2136_v10 = vmul.f32 %v2123_v26, %v4572_v17  ;;  %v2151_v25 = vrot.slane %v4225_v50, %v3148_v63  ;;  %v2155_v36 = vrot.slane %v4230_v28, %v3148_v63  ;;  %v2141_v20 = vadd.f32 %v2137_v21, %v2113_v31 }
 0x21a   :  { %v2110_v52 = vmul.f32 %v2103_v24, %v4571_v13  ;;  %v2115_v46 = vadd.f32 %v2111_v30, %v2087_v49  ;;  %v2131_v16 = vrot.slane %v4249_v48, %v3110_v14  ;;  %v2199_v47 = vrot.slane %v4288_v40, %v3097_v4 }
 0x21b   :  { %v2203_v22 = vrot.slane %v4292_v58, %v3097_v4  ;;  %v4312_v50 = vsel %vm3125_vm3, %v2181_v5, 0.0  ;;  %v4316_v28 = vsel %vm3101_vm1, %v2187_v0, 0.0  ;;  %v2140_v9 = vadd.f32 %v2136_v10, %v2112_v60 }
 0x21c   :  { %v2114_v37 = vadd.f32 %v2110_v52, %v2086_v19  ;;  %v2139_v15 = vmul.f32 %v2135_v3, %v4572_v17  ;;  %v2163_v42 = vrot.slane %v4253_v43, %v3148_v63  ;;  %v2164_v32 = vmul.f32 %v2151_v25, %v4573_v41 }
 0x21d   :  { %v2165_v23 = vmul.f32 %v2155_v36, %v4573_v41  ;;  %v2159_v54 = vrot.slane %v4249_v48, %v3148_v63  ;;  %v2138_v8 = vmul.f32 %v2131_v16, %v4572_v17  ;;  %v2207_v27 = vrot.slane %v4312_v50, %v3097_v4 }
 0x21e   :  { %v4304_v6 = vpop.permute.xlu1 %2277  ;;  %v2143_v53 = vadd.f32 %v2139_v15, %v2115_v46  ;;  %v2211_v57 = vrot.slane %v4316_v28, %v3097_v4  ;;  %v2212_v43 = vmul.f32 %v2199_v47, %v4574_v1  ;;  %v2213_v39 = vmul.f32 %v2203_v22, %v4574_v1  ;;  %v2309_v22 = vpop.permute.xlu0 %2308 }
 0x21f   :  { %v2169_v44 = vadd.f32 %v2165_v23, %v2141_v20  ;;  %v2168_v33 = vadd.f32 %v2164_v32, %v2140_v9  ;;  %v2142_v62 = vadd.f32 %v2138_v8, %v2114_v37  ;;  %v2167_v48 = vmul.f32 %v2163_v42, %v4573_v41 }
 0x220   :  { %v2166_v51 = vmul.f32 %v2159_v54, %v4573_v41  ;;  %v2227_v55 = vrot.slane %v4288_v40, %v3107_v12  ;;  %v2231_v13 = vrot.slane %v4292_v58, %v3107_v12  ;;  %v2255_v56 = vrot.slane %v4288_v40, %v3110_v14 }
 0x221   :  { %v2171_v2 = vadd.f32 %v2167_v48, %v2143_v53  ;;  %v2259_v38 = vrot.slane %v4292_v58, %v3110_v14  ;;  %v2214_v26 = vmul.f32 %v2207_v27, %v4574_v1  ;;  %v2215_v35 = vmul.f32 %v2211_v57, %v4574_v1 }
 0x222   :  { %v2216_v7 = vadd.f32 %v2212_v43, %v2168_v33  ;;  %v2217_v31 = vadd.f32 %v2213_v39, %v2169_v44  ;;  %v2170_v21 = vadd.f32 %v2166_v51, %v2142_v62  ;;  %v2235_v49 = vrot.slane %v4312_v50, %v3107_v12 }
 0x223   :  { %v4332_v61 = vpop.permute.xlu1 %2321  ;;  %v2239_v24 = vrot.slane %v4316_v28, %v3107_v12  ;;  %v2240_v11 = vmul.f32 %v2227_v55, %v4264_v59  ;;  %v2241_v60 = vmul.f32 %v2231_v13, %v4264_v59  ;;  %v2268_v19 = vmul.f32 %v2255_v56, %v2250_v45  ;;  %v2378_v13 = vpop.permute.xlu0 %2377 }
 0x224   :  { %v2283_v30 = vrot.slane %v4288_v40, %v3148_v63  ;;  %v2269_v3 = vmul.f32 %v2259_v38, %v2250_v45  ;;  %v2287_v5 = vrot.slane %v4292_v58, %v3148_v63  ;;  %v2218_v0 = vadd.f32 %v2214_v26, %v2170_v21 }
 0x225   :  { %v2219_v10 = vadd.f32 %v2215_v35, %v2171_v2  ;;  %v2244_v25 = vadd.f32 %v2240_v11, %v2216_v7  ;;  %v2245_v36 = vadd.f32 %v2241_v60, %v2217_v31  ;;  %v2263_v20 = vrot.slane %v4312_v50, %v3110_v14 }
 0x226   :  { %v2267_v52 = vrot.slane %v4316_v28, %v3110_v14  ;;  %v2242_v16 = vmul.f32 %v2235_v49, %v4264_v59  ;;  %v2243_v47 = vmul.f32 %v2239_v24, %v4264_v59  ;;  %v2291_v9 = vrot.slane %v4312_v50, %v3148_v63 }
 0x227   :  { %v2305_v17 = vpop.permute.xlu1 %2304  ;;  %v2295_v37 = vrot.slane %v4316_v28, %v3148_v63  ;;  %v2296_v32 = vmul.f32 %v2283_v30, %v4304_v6  ;;  %v2297_v23 = vmul.f32 %v2287_v5, %v4304_v6  ;;  %v2270_v54 = vmul.f32 %v2263_v20, %v2250_v45 }
 0x228   :  { %v2246_v59 = vadd.f32 %v2242_v16, %v2218_v0  ;;  %v2247_v41 = vadd.f32 %v2243_v47, %v2219_v10  ;;  %v2271_v8 = vmul.f32 %v2267_v52, %v2250_v45  ;;  %v2272_v53 = vadd.f32 %v2268_v19, %v2244_v25 }
 0x229   :  { %v2273_v27 = vadd.f32 %v2269_v3, %v2245_v36  ;;  %v2298_v57 = vmul.f32 %v2291_v9, %v4304_v6  ;;  %v2299_v28 = vmul.f32 %v2295_v37, %v4304_v6  ;;  %v4408_v36 = vpop.permute.xlu0 %2481 }
 0x22a   :  { %v2274_v45 = vadd.f32 %v2270_v54, %v2246_v59  ;;  %v2275_v48 = vadd.f32 %v2271_v8, %v2247_v41  ;;  %v2300_v51 = vadd.f32 %v2296_v32, %v2272_v53 }
 0x22b   :  { %v2307_v46 = vpop.permute.xlu1 %2306  ;;  %v2301_v55 = vadd.f32 %v2297_v23, %v2273_v27 }
 0x22c   :  { %v4365_v40 = vsel %vm1119_vm11, %v2305_v17, %v2307_v46  ;;  %v4368_v58 = vsel %vm1119_vm11, %v2307_v46, 0.0  ;;  %v2302_v35 = vadd.f32 %v2298_v57, %v2274_v45  ;;  %v2303_v7 = vadd.f32 %v2299_v28, %v2275_v48 }
 0x22d   :  { %v2327_v15 = vrot.slane %v4365_v40, %v3097_v4  ;;  %v2331_v42 = vrot.slane %v4368_v58, %v3097_v4  ;;  %v2355_v6 = vrot.slane %v4365_v40, %v3107_v12  ;;  %v2359_v56 = vrot.slane %v4368_v58, %v3107_v12 }
 0x22e   :  { %v2383_v30 = vrot.slane %v4365_v40, %v3110_v14  ;;  %v2411_v9 = vrot.slane %v4365_v40, %v3148_v63 }
 0x22f   :  { %v2311_v50 = vpop.permute.xlu1 %2310  ;;  %v2340_v43 = vmul.f32 %v2327_v15, %v4332_v61  ;;  %v2341_v39 = vmul.f32 %v2331_v42, %v4332_v61  ;;  %v2368_v60 = vmul.f32 %v2355_v6, %v4346_v34  ;;  %v2369_v19 = vmul.f32 %v2359_v56, %v4346_v34 }
 0x230   :  { %v2313_v44 = vsel %vm1119_vm11, %v2309_v22, %v2311_v50  ;;  %v2319_v1 = vsel %vm1119_vm11, %v2311_v50, 0.0  ;;  %v2396_v47 = vmul.f32 %v2383_v30, %v2378_v13  ;;  %v2437_v50 = vpop.permute.xlu0 %2436 }
 0x231   :  { %v2335_v33 = vrot.slane %v2313_v44, %v3097_v4  ;;  %v2339_v62 = vrot.slane %v2319_v1, %v3097_v4  ;;  %v2363_v31 = vrot.slane %v2313_v44, %v3107_v12  ;;  %v2367_v17 = vrot.slane %v2319_v1, %v3107_v12 }
 0x232   :  { %v2344_v21 = vadd.f32 %v2340_v43, %v2300_v51  ;;  %v2345_v49 = vadd.f32 %v2341_v39, %v2301_v55  ;;  %v2391_v0 = vrot.slane %v2313_v44, %v3110_v14  ;;  %v2395_v10 = vrot.slane %v2319_v1, %v3110_v14 }
 0x233   :  { %v2342_v2 = vmul.f32 %v2335_v33, %v4332_v61  ;;  %v2343_v38 = vmul.f32 %v2339_v62, %v4332_v61  ;;  %v2406_v26 = vpop.permute.xlu1 %2405  ;;  %v2387_v61 = vrot.slane %v4368_v58, %v3110_v14  ;;  %v2370_v3 = vmul.f32 %v2363_v31, %v4346_v34 }
 0x234   :  { %v2371_v5 = vmul.f32 %v2367_v17, %v4346_v34  ;;  %v2372_v20 = vadd.f32 %v2368_v60, %v2344_v21  ;;  %v2373_v52 = vadd.f32 %v2369_v19, %v2345_v49  ;;  %v2415_v34 = vrot.slane %v4368_v58, %v3148_v63  ;;  %v2510_v6 = vpop.permute.xlu0 %2509 }
 0x235   :  { %v2346_v24 = vadd.f32 %v2342_v2, %v2302_v35  ;;  %v2347_v11 = vadd.f32 %v2343_v38, %v2303_v7  ;;  %v2397_v22 = vmul.f32 %v2387_v61, %v2378_v13  ;;  %v2398_v37 = vmul.f32 %v2391_v0, %v2378_v13 }
 0x236   :  { %v2399_v15 = vmul.f32 %v2395_v10, %v2378_v13  ;;  %v2419_v42 = vrot.slane %v2313_v44, %v3148_v63  ;;  %v2423_v59 = vrot.slane %v2319_v1, %v3148_v63  ;;  %v2400_v32 = vadd.f32 %v2396_v47, %v2372_v20 }
 0x237   :  { %v2374_v46 = vadd.f32 %v2370_v3, %v2346_v24  ;;  %v2375_v16 = vadd.f32 %v2371_v5, %v2347_v11  ;;  %v2401_v23 = vadd.f32 %v2397_v22, %v2373_v52  ;;  %v2424_v54 = vmul.f32 %v2411_v9, %v2406_v26 }
 0x238   :  { %v4406_v25 = vpop.permute.xlu1 %2453  ;;  %v2425_v8 = vmul.f32 %v2415_v34, %v2406_v26  ;;  %v2426_v57 = vmul.f32 %v2419_v42, %v2406_v26  ;;  %v2427_v28 = vmul.f32 %v2423_v59, %v2406_v26 }
 0x239   :  { %v2402_v53 = vadd.f32 %v2398_v37, %v2374_v46  ;;  %v2403_v27 = vadd.f32 %v2399_v15, %v2375_v16  ;;  %v2428_v43 = vadd.f32 %v2424_v54, %v2400_v32 }
 0x23a   :  { %v2429_v39 = vadd.f32 %v2425_v8, %v2401_v23 }
 0x23b   :  { %v2430_v44 = vadd.f32 %v2426_v57, %v2402_v53  ;;  %v2431_v62 = vadd.f32 %v2427_v28, %v2403_v27 }
 0x23c   :  { %v2433_v41 = vpop.permute.xlu1 %2432 }
 0x240   :  { %v2435_v40 = vpop.permute.xlu1 %2434 }
 0x241   :  { %v2440_v58 = vsel %vm1248_vm12, %v2433_v41, %v2435_v40  ;;  %v2446_v33 = vsel %vm1248_vm12, %v2435_v40, 0.0 }
 0x242   :  { %v2448_v1 = vsel %vm3269_vm6, %v2440_v58, 0.0  ;;  %v2449_v45 = vsel %vm3289_vm7, %v2446_v33, 0.0  ;;  %v2733_v58 = vld [vmem:[%s4472_s0] sm:$0xff] }
 0x243   :  { %v2459_v48 = vrot.slane %v2448_v1, %v3097_v4  ;;  %v2463_v51 = vrot.slane %v2449_v45, %v3097_v4  ;;  %v2487_v55 = vrot.slane %v2448_v1, %v3107_v12  ;;  %v2491_v13 = vrot.slane %v2449_v45, %v3107_v12 }
 0x244   :  { %v2543_v56 = vrot.slane %v2448_v1, %v3148_v63  ;;  %v2547_v2 = vrot.slane %v2449_v45, %v3148_v63  ;;  %v2439_v38 = vpop.permute.xlu1 %2438  ;;  %v2515_v26 = vrot.slane %v2448_v1, %v3110_v14  ;;  %v2519_v35 = vrot.slane %v2449_v45, %v3110_v14 }
 0x245   :  { %v2472_v7 = vmul.f32 %v2459_v48, %v4406_v25  ;;  %v2473_v31 = vmul.f32 %v2463_v51, %v4406_v25  ;;  %v2500_v17 = vmul.f32 %v2487_v55, %v4408_v36  ;;  %v2501_v21 = vmul.f32 %v2491_v13, %v4408_v36  ;;  %v2734_v51 = vld [vmem:[%s4472_s0 + $0x8] sm:$0xff]  ;;  %v4576_v13 = vld [vmem:[#allocation6_spill] sm:$0xff] }
 0x246   :  { %v2441_v49 = vsel %vm1248_vm12, %v2437_v50, %v2439_v38  ;;  %v2447_v24 = vsel %vm1248_vm12, %v2439_v38, 0.0  ;;  %v2528_v11 = vmul.f32 %v2515_v26, %v2510_v6  ;;  %v2529_v60 = vmul.f32 %v2519_v35, %v2510_v6 }
 0x247   :  { %v2450_v19 = vsel %vm3269_vm6, %v2441_v49, 0.0  ;;  %v2451_v30 = vsel %vm3289_vm7, %v2447_v24, 0.0  ;;  %v2476_v61 = vadd.f32 %v2472_v7, %v2428_v43  ;;  %v2477_v3 = vadd.f32 %v2473_v31, %v2429_v39 }
 0x248   :  { %v2467_v5 = vrot.slane %v2450_v19, %v3097_v4  ;;  %v2471_v0 = vrot.slane %v2451_v30, %v3097_v4  ;;  %v2495_v10 = vrot.slane %v2450_v19, %v3107_v12  ;;  %v2499_v20 = vrot.slane %v2451_v30, %v3107_v12  ;;  %v2538_v47 = vpop.permute.xlu1 %2537 }
 0x249   :  { %v2551_v52 = vrot.slane %v2450_v19, %v3148_v63  ;;  %v2555_v46 = vrot.slane %v2451_v30, %v3148_v63  ;;  %v2504_v16 = vadd.f32 %v2500_v17, %v2476_v61  ;;  %v2505_v29 = vadd.f32 %v2501_v21, %v2477_v3 }
 0x24a   :  { %v2474_v18 = vmul.f32 %v2467_v5, %v4406_v25  ;;  %v2475_v22 = vmul.f32 %v2471_v0, %v4406_v25  ;;  %v2502_v9 = vmul.f32 %v2495_v10, %v4408_v36  ;;  %v2503_v34 = vmul.f32 %v2499_v20, %v4408_v36 }
 0x24b   :  { %v2523_v4 = vrot.slane %v2450_v19, %v3110_v14  ;;  %v2527_v37 = vrot.slane %v2451_v30, %v3110_v14  ;;  %v2532_v12 = vadd.f32 %v2528_v11, %v2504_v16  ;;  %v2533_v15 = vadd.f32 %v2529_v60, %v2505_v29 }
 0x24c   :  { %v2478_v42 = vadd.f32 %v2474_v18, %v2430_v44  ;;  %v2479_v59 = vadd.f32 %v2475_v22, %v2431_v62  ;;  %v2556_v63 = vmul.f32 %v2543_v56, %v2538_v47  ;;  %v2557_v41 = vmul.f32 %v2547_v2, %v2538_v47  ;;  %v4575_v44 = vld [vmem:[#allocation5_spill] sm:$0xff] }
 0x24d   :  { %v2530_v32 = vmul.f32 %v2523_v4, %v2510_v6  ;;  %v2531_v23 = vmul.f32 %v2527_v37, %v2510_v6  ;;  %v2568_v54 = vpop.permute.xlu1 %2567  ;;  %v2558_v50 = vmul.f32 %v2551_v52, %v2538_v47  ;;  %v2559_v57 = vmul.f32 %v2555_v46, %v2538_v47 }
 0x24e   :  { %v2506_v8 = vadd.f32 %v2502_v9, %v2478_v42  ;;  %v2507_v53 = vadd.f32 %v2503_v34, %v2479_v59  ;;  %v2560_v25 = vadd.f32 %v2556_v63, %v2532_v12  ;;  %v2561_v27 = vadd.f32 %v2557_v41, %v2533_v15 }
 0x250   :  { %v2534_v36 = vadd.f32 %v2530_v32, %v2506_v8  ;;  %v2535_v28 = vadd.f32 %v2531_v23, %v2507_v53  ;;  %v2570_v40 = vadd.f32 %v2568_v54, %v2560_v25  ;;  %v2571_v43 = vadd.f32 %v2568_v54, %v2561_v27 }
 0x252   :  { %v2562_v14 = vadd.f32 %v2558_v50, %v2534_v36  ;;  %v2563_v39 = vadd.f32 %v2559_v57, %v2535_v28  ;;  %v2574_v33 = vadd.f32 %v2733_v58, %v2570_v40  ;;  %v2575_v62 = vadd.f32 %v2571_v43, %v4575_v44 }
 0x254   :  { %v2572_v1 = vadd.f32 %v2568_v54, %v2562_v14  ;;  %v2573_v45 = vadd.f32 %v2568_v54, %v2563_v39  ;;  %v2582_v48 = vcombine.low %v2574_v33, %v2575_v62 }
 0x256   :  { %v2576_v55 = vadd.f32 %v2734_v51, %v2572_v1  ;;  %v2577_v6 = vadd.f32 %v2573_v45, %v4576_v13  ;;  %2586 = vst [vmem:[#allocation2] sm:$0xff] %v2582_v48 }
 0x258   :  { %v2583_v56 = vcombine.low %v2576_v55, %v2577_v6 }
 0x25a   :  { %2587 = vst [vmem:[#allocation2 + $0x8] sm:$0xff] %v2583_v56 }
 0x25b   :  { %2746 = shalt.err (!%p2743_p4)
}
 0x25c   :  { %s2747_s10 = scalar_lea.hbm %s4479_s7, 256 }
 0x25d   :  { %p2748_p5 = scmp.ne.s32.totalorder %s4479_s7, %s2747_s10  ;;  %p2751_p6 = scmp.lt.u32.totalorder %s2747_s10, %s4479_s7 }
 0x25f   :  { %p2753_p7 = pnand %p2751_p6, %p2748_p5 }
 0x261   :  { %2756 = shalt.err (!%p2753_p7)
}
 0x262   :  { %s2804_s14 = smov 128   ;;  %s2805_s15 = smov 8  }
 0x263   :  { %2599 = dma.vmem_to_hbm [thread:$0]  %s2594_s28, 256, %s4479_s7, [#allocation3], %s2804_s14, %s2804_s14, %s2805_s15  }
 0x264   :  { %2757 = dma.done.wait [#allocation3], 256  }
 0x265   :  { %2758 = vsyncadd [#allocation3], 4294967040 }
 0x266   :  { %2603 = vsyncpa [#allocation3], 1 }

</bundles_post_ra>
